<compile_context>
chip_gen: v7x
topology: tpu7x:2x2x1
jax: 0.10.0
libtpu: 0.0.40
codegen_flags: <defaults>
</compile_context>

<pallas_src>
import jax
import jax.numpy as jnp
import numpy as np
from jax import lax
from jax.experimental import pallas as pl
from jax.experimental.pallas import tpu as pltpu  # noqa: F401  (kept for parity / future tiling)

NEG_SLOPE = 0.01  # F.leaky_relu default negative_slope


def _leaky_relu(v):
    return jnp.where(v > 0, v, NEG_SLOPE * v)


def _full_spec(shape):
    nd = len(shape)
    return pl.BlockSpec(shape, lambda i, _nd=nd: (0,) * _nd)


# ---------------------------------------------------------------------------
# The fused LeNet5 kernel.  Every heavy op is a 2-D jnp.dot (MXU); the rest is
# elementwise (bias, leaky_relu, max).  All loops are static and unrolled.
# ---------------------------------------------------------------------------
def lenet5_kernel(a1_ref, w1r_ref, sel1_ref, b1r_ref, shc1_ref, shr1_ref,
                  w2r_ref, sel2_ref, b2r_ref, shc2_ref, shr2_ref,
                  w1f_ref, self_ref, b1f_ref, w2f_ref, b2f_ref, w3f_ref, b3f_ref,
                  o_ref):
    def dot(a, b):
        return jnp.dot(a, b, preferred_element_type=jnp.float32)

    a1 = a1_ref[...]                                   # (N*H, Cin*W) = (64, 96)

    # ---- conv1: 5 banded matmuls + 5 row-selection matmuls (accumulate in vregs) ----
    acc1 = None
    for kh in range(w1r_ref.shape[0]):                 # static unroll over taps
        p = dot(a1, w1r_ref[kh])                       # (64, 168)
        t = dot(sel1_ref[kh], p)                       # (56, 168)  rows -> (n, out_row)
        acc1 = t if acc1 is None else acc1 + t
    act1 = _leaky_relu(acc1 + b1r_ref[...])            # (56, 168)

    # ---- pool1 (2x2 max), un-compacted: odd rows/cols become don't-care ----
    u1 = jnp.maximum(act1, dot(act1, shc1_ref[...]))   # max with col-neighbor
    v1 = jnp.maximum(u1, dot(shr1_ref[...], u1))       # max with row-neighbor

    # ---- conv2: banded matmuls read the even (pooled) rows/cols of v1 ----
    acc2 = None
    for kh in range(w2r_ref.shape[0]):
        q = dot(v1, w2r_ref[kh])                       # (56, 160)
        t = dot(sel2_ref[kh], q)                       # (20, 160)
        acc2 = t if acc2 is None else acc2 + t
    act2 = _leaky_relu(acc2 + b2r_ref[...])            # (20, 160)

    # ---- pool2 ----
    u2 = jnp.maximum(act2, dot(act2, shc2_ref[...]))
    v2 = jnp.maximum(u2, dot(shr2_ref[...], u2))       # (20, 160)

    # ---- fc1: flatten + pooled-row/col selection folded into the weights ----
    h = None
    for hp in range(w1f_ref.shape[0]):                 # 5 pooled rows, static unroll
        r = dot(self_ref[hp], v2)                      # (N, 160)
        t = dot(r, w1f_ref[hp])                        # (N, 120)
        h = t if h is None else h + t
    h = _leaky_relu(h + b1f_ref[...])                  # (N, 120)

    # ---- fc2, fc3 ----
    h = _leaky_relu(dot(h, w2f_ref[...]) + b2f_ref[...])   # (N, 84)
    out = dot(h, w3f_ref[...]) + b3f_ref[...]               # (N, 10)
    o_ref[...] = out.astype(o_ref.dtype)


# ---------------------------------------------------------------------------
# One-time parameter preparation (done OUTSIDE the per-forward jit):
# banded conv matrices, row-selection / shift constants, folded fc1 weight.
# ---------------------------------------------------------------------------
def prepare_params(p, batch, img_size=32):
    w1 = np.asarray(p['conv1_w'], np.float32)          # (C1o, Cin, 5, 5)
    w2 = np.asarray(p['conv2_w'], np.float32)          # (C2o, C1o, 5, 5)
    C1o, Cin, KH, KW = w1.shape
    C2o = w2.shape[0]
    H = W = img_size
    OH1, OW1 = H - KH + 1, W - KW + 1                  # 28, 28
    HP1, WP1 = OH1 // 2, OW1 // 2                      # 14, 14
    OH2, OW2 = HP1 - KH + 1, WP1 - KW + 1              # 10, 10
    HP2, WP2 = OH2 // 2, OW2 // 2                      # 5, 5

    def banded(w, w_in, ow, stride):
        co_n, ci_n, kh_n, kw_n = w.shape
        out = np.zeros((kh_n, ci_n * w_in, co_n * ow), np.float32)
        jo = np.arange(ow)
        for kh in range(kh_n):
            for kw in range(kw_n):
                for ci in range(ci_n):
                    for co in range(co_n):
                        out[kh, ci * w_in + stride * (jo + kw), co * ow + jo] = w[co, ci, kh, kw]
        return out

    def sel_rows(nb, rows_out, rows_in, kh, stride):
        m = np.zeros((nb * rows_out, nb * rows_in), np.float32)
        i = np.arange(rows_out)
        for n in range(nb):
            m[n * rows_out + i, n * rows_in + stride * (i + kh)] = 1.0
        return m

    w1r = banded(w1, W, OW1, 1)                        # (5,  96, 168)
    w2r = banded(w2, OW1, OW2, 2)                      # (5, 168, 160)
    sel1 = np.stack([sel_rows(batch, OH1, H, kh, 1) for kh in range(KH)])    # (5, 56, 64)
    sel2 = np.stack([sel_rows(batch, OH2, OH1, kh, 2) for kh in range(KH)])  # (5, 20, 56)

    shc1 = np.eye(C1o * OW1, k=-1, dtype=np.float32)   # col-neighbor shift (right-mul)
    shr1 = np.eye(batch * OH1, k=1, dtype=np.float32)  # row-neighbor shift (left-mul)
    shc2 = np.eye(C2o * OW2, k=-1, dtype=np.float32)
    shr2 = np.eye(batch * OH2, k=1, dtype=np.float32)

    b1r = np.repeat(np.asarray(p['conv1_b'], np.float32), OW1)[None, :]      # (1, 168)
    b2r = np.repeat(np.asarray(p['conv2_b'], np.float32), OW2)[None, :]      # (1, 160)

    # fc1 weight with the NCHW flatten + pooled-position selection folded in.
    fc1_w = np.asarray(p['fc1_w'], np.float32)         # (120, C2o*HP2*WP2)
    hid1 = fc1_w.shape[0]
    w1f = np.zeros((HP2, C2o * OW2, hid1), np.float32)
    for hp in range(HP2):
        for co in range(C2o):
            for jp in range(WP2):
                w1f[hp, co * OW2 + 2 * jp, :] = fc1_w[:, co * (HP2 * WP2) + hp * WP2 + jp]

    selfm = np.zeros((HP2, batch, batch * OH2), np.float32)
    for hp in range(HP2):
        for n in range(batch):
            selfm[hp, n, n * OH2 + 2 * hp] = 1.0

    return {
        'w1r': jnp.asarray(w1r), 'sel1': jnp.asarray(sel1), 'b1r': jnp.asarray(b1r),
        'shc1': jnp.asarray(shc1), 'shr1': jnp.asarray(shr1),
        'w2r': jnp.asarray(w2r), 'sel2': jnp.asarray(sel2), 'b2r': jnp.asarray(b2r),
        'shc2': jnp.asarray(shc2), 'shr2': jnp.asarray(shr2),
        'w1f': jnp.asarray(w1f), 'selF': jnp.asarray(selfm),
        'b1f': jnp.asarray(np.asarray(p['fc1_b'], np.float32))[None, :],
        'w2f': jnp.asarray(np.asarray(p['fc2_w'], np.float32).T),
        'b2f': jnp.asarray(np.asarray(p['fc2_b'], np.float32))[None, :],
        'w3f': jnp.asarray(np.asarray(p['fc3_w'], np.float32).T),
        'b3f': jnp.asarray(np.asarray(p['fc3_b'], np.float32))[None, :],
    }


# ---------------------------------------------------------------------------
# PyTorch-facing forward: NCHW input -> single fused Pallas kernel.
# ---------------------------------------------------------------------------
def lenet5_forward(x_nchw, prep):
    n, c, h, w = x_nchw.shape
    # lane-dense input slab: rows = (n, image-row), cols = (channel, image-col)
    a1 = jnp.transpose(x_nchw, (0, 2, 1, 3)).reshape(n * h, c * w)
    args = (a1,
            prep['w1r'], prep['sel1'], prep['b1r'], prep['shc1'], prep['shr1'],
            prep['w2r'], prep['sel2'], prep['b2r'], prep['shc2'], prep['shr2'],
            prep['w1f'], prep['selF'], prep['b1f'],
            prep['w2f'], prep['b2f'], prep['w3f'], prep['b3f'])
    out_shape = (n, prep['b3f'].shape[1])
    return pl.pallas_call(
        lenet5_kernel,
        out_shape=jax.ShapeDtypeStruct(out_shape, jnp.float32),
        grid=(1,),
        in_specs=[_full_spec(a.shape) for a in args],
        out_specs=_full_spec(out_shape),
    )(*args)


# ---------------------------------------------------------------------------
# Deterministic parameter init (PyTorch parameter shapes) and pure-JAX reference
# ---------------------------------------------------------------------------
def init_params(key, n_class=10, n_channels=3, conv_size=(6, 16),
                hidden_size=(120, 84), width=5):
    ks = jax.random.split(key, 10)

    def w(k, shape, scale=0.1):
        return (scale * jax.random.normal(k, shape)).astype(jnp.float32)

    flat = conv_size[1] * width * width
    return {
        'conv1_w': w(ks[0], (conv_size[0], n_channels, 5, 5)),
        'conv1_b': w(ks[1], (conv_size[0],)),
        'conv2_w': w(ks[2], (conv_size[1], conv_size[0], 5, 5)),
        'conv2_b': w(ks[3], (conv_size[1],)),
        'fc1_w': w(ks[4], (hidden_size[0], flat)),
        'fc1_b': w(ks[5], (hidden_size[0],)),
        'fc2_w': w(ks[6], (hidden_size[1], hidden_size[0])),
        'fc2_b': w(ks[7], (hidden_size[1],)),
        'fc3_w': w(ks[8], (n_class, hidden_size[1])),
        'fc3_b': w(ks[9], (n_class,)),
    }


def reference_forward(x, p):
    prec = lax.Precision.HIGHEST

    def conv(v, w, b):
        y = lax.conv_general_dilated(v, w, window_strides=(1, 1), padding='VALID',
                                     dimension_numbers=('NCHW', 'OIHW', 'NCHW'),
                                     precision=prec)
        return y + b.reshape(1, -1, 1, 1)

    def pool(v):
        n, c, h, w = v.shape
        return v.reshape(n, c, h // 2, 2, w // 2, 2).max(axis=(3, 5))

    y = pool(_leaky_relu(conv(x, p['conv1_w'], p['conv1_b'])))
    y = pool(_leaky_relu(conv(y, p['conv2_w'], p['conv2_b'])))
    y = y.reshape(y.shape[0], -1)
    y = _leaky_relu(jnp.dot(y, p['fc1_w'].T, precision=prec) + p['fc1_b'])
    y = _leaky_relu(jnp.dot(y, p['fc2_w'].T, precision=prec) + p['fc2_b'])
    return jnp.dot(y, p['fc3_w'].T, precision=prec) + p['fc3_b']


if __name__ == "__main__":
    key = jax.random.PRNGKey(0)
    k_param, k_x = jax.random.split(key)
    params = init_params(k_param)
    # PyTorch LeNet5 default: n_channels=3, img_size=32; small batch of 2 (NCHW).
    x = jax.random.normal(k_x, (2, 3, 32, 32), dtype=jnp.float32)

    # One-time parameter preparation (outside the per-forward jit).
    prep = prepare_params(params, batch=2, img_size=32)

    out = jax.jit(lenet5_forward)(x, prep)
    out = jax.block_until_ready(out)
    assert out.shape == (2, 10)

    ref = jax.block_until_ready(reference_forward(x, params))
    np.testing.assert_allclose(np.asarray(out), np.asarray(ref), rtol=1e-2, atol=1e-2)

    print("KERNEL_OK")
</pallas_src>

<mosaic_0001>
module attributes {stable_mosaic.version = 11 : i64} {
  func.func @lenet5_kernel(%arg0: i32, %arg1: memref<64x96xf32, #tpu.memory_space<vmem>>, %arg2: memref<5x96x168xf32, #tpu.memory_space<vmem>>, %arg3: memref<5x56x64xf32, #tpu.memory_space<vmem>>, %arg4: memref<1x168xf32, #tpu.memory_space<vmem>>, %arg5: memref<168x168xf32, #tpu.memory_space<vmem>>, %arg6: memref<56x56xf32, #tpu.memory_space<vmem>>, %arg7: memref<5x168x160xf32, #tpu.memory_space<vmem>>, %arg8: memref<5x20x56xf32, #tpu.memory_space<vmem>>, %arg9: memref<1x160xf32, #tpu.memory_space<vmem>>, %arg10: memref<160x160xf32, #tpu.memory_space<vmem>>, %arg11: memref<20x20xf32, #tpu.memory_space<vmem>>, %arg12: memref<5x160x120xf32, #tpu.memory_space<vmem>>, %arg13: memref<5x2x20xf32, #tpu.memory_space<vmem>>, %arg14: memref<1x120xf32, #tpu.memory_space<vmem>>, %arg15: memref<120x84xf32, #tpu.memory_space<vmem>>, %arg16: memref<1x84xf32, #tpu.memory_space<vmem>>, %arg17: memref<84x10xf32, #tpu.memory_space<vmem>>, %arg18: memref<1x10xf32, #tpu.memory_space<vmem>>, %arg19: memref<2x10xf32, #tpu.memory_space<vmem>>) attributes {dimension_semantics = [#tpu.dimension_semantics<arbitrary>], iteration_bounds = array<i64: 1>, scalar_prefetch = 0 : i64, scratch_operands = 0 : i64, tpu.core_type = #tpu.core_type<tc>, window_params = [{pipeline_mode = #tpu.pipeline_mode<synchronous>, transform_indices = @transform_0, window_bounds = array<i64: 64, 96>}, {pipeline_mode = #tpu.pipeline_mode<synchronous>, transform_indices = @transform_1, window_bounds = array<i64: 5, 96, 168>}, {pipeline_mode = #tpu.pipeline_mode<synchronous>, transform_indices = @transform_2, window_bounds = array<i64: 5, 56, 64>}, {pipeline_mode = #tpu.pipeline_mode<synchronous>, transform_indices = @transform_3, window_bounds = array<i64: 1, 168>}, {pipeline_mode = #tpu.pipeline_mode<synchronous>, transform_indices = @transform_4, window_bounds = array<i64: 168, 168>}, {pipeline_mode = #tpu.pipeline_mode<synchronous>, transform_indices = @transform_5, window_bounds = array<i64: 56, 56>}, {pipeline_mode = #tpu.pipeline_mode<synchronous>, transform_indices = @transform_6, window_bounds = array<i64: 5, 168, 160>}, {pipeline_mode = #tpu.pipeline_mode<synchronous>, transform_indices = @transform_7, window_bounds = array<i64: 5, 20, 56>}, {pipeline_mode = #tpu.pipeline_mode<synchronous>, transform_indices = @transform_8, window_bounds = array<i64: 1, 160>}, {pipeline_mode = #tpu.pipeline_mode<synchronous>, transform_indices = @transform_9, window_bounds = array<i64: 160, 160>}, {pipeline_mode = #tpu.pipeline_mode<synchronous>, transform_indices = @transform_10, window_bounds = array<i64: 20, 20>}, {pipeline_mode = #tpu.pipeline_mode<synchronous>, transform_indices = @transform_11, window_bounds = array<i64: 5, 160, 120>}, {pipeline_mode = #tpu.pipeline_mode<synchronous>, transform_indices = @transform_12, window_bounds = array<i64: 5, 2, 20>}, {pipeline_mode = #tpu.pipeline_mode<synchronous>, transform_indices = @transform_13, window_bounds = array<i64: 1, 120>}, {pipeline_mode = #tpu.pipeline_mode<synchronous>, transform_indices = @transform_14, window_bounds = array<i64: 120, 84>}, {pipeline_mode = #tpu.pipeline_mode<synchronous>, transform_indices = @transform_15, window_bounds = array<i64: 1, 84>}, {pipeline_mode = #tpu.pipeline_mode<synchronous>, transform_indices = @transform_16, window_bounds = array<i64: 84, 10>}, {pipeline_mode = #tpu.pipeline_mode<synchronous>, transform_indices = @transform_17, window_bounds = array<i64: 1, 10>}, {pipeline_mode = #tpu.pipeline_mode<synchronous>, transform_indices = @transform_18, window_bounds = array<i64: 2, 10>}]} {
    %c0 = arith.constant 0 : index
    %c0_0 = arith.constant 0 : index
    %0 = vector.load %arg1[%c0, %c0_0] : memref<64x96xf32, #tpu.memory_space<vmem>>, vector<64x96xf32>
    %c0_1 = arith.constant 0 : index
    %c0_2 = arith.constant 0 : index
    %c0_3 = arith.constant 0 : index
    %1 = vector.load %arg2[%c0_1, %c0_2, %c0_3] : memref<5x96x168xf32, #tpu.memory_space<vmem>>, vector<1x96x168xf32>
    %2 = vector.shape_cast %1 : vector<1x96x168xf32> to vector<96x168xf32>
    %cst = arith.constant dense<0.000000e+00> : vector<64x168xf32>
    %3 = tpu.matmul %0, %2, %cst {dimension_numbers = #tpu.dot_dimension_numbers<[1], [0], [0], [1], [0, 0, 1, 1], [], []>} : vector<64x96xf32>, vector<96x168xf32>, vector<64x168xf32> -> vector<64x168xf32>
    %c0_4 = arith.constant 0 : index
    %c0_5 = arith.constant 0 : index
    %c0_6 = arith.constant 0 : index
    %4 = vector.load %arg3[%c0_4, %c0_5, %c0_6] : memref<5x56x64xf32, #tpu.memory_space<vmem>>, vector<1x56x64xf32>
    %5 = vector.shape_cast %4 : vector<1x56x64xf32> to vector<56x64xf32>
    %cst_7 = arith.constant dense<0.000000e+00> : vector<56x168xf32>
    %6 = tpu.matmul %5, %3, %cst_7 {dimension_numbers = #tpu.dot_dimension_numbers<[1], [0], [0], [1], [0, 0, 1, 1], [], []>} : vector<56x64xf32>, vector<64x168xf32>, vector<56x168xf32> -> vector<56x168xf32>
    %c1 = arith.constant 1 : index
    %c0_8 = arith.constant 0 : index
    %c0_9 = arith.constant 0 : index
    %7 = vector.load %arg2[%c1, %c0_8, %c0_9] : memref<5x96x168xf32, #tpu.memory_space<vmem>>, vector<1x96x168xf32>
    %8 = vector.shape_cast %7 : vector<1x96x168xf32> to vector<96x168xf32>
    %cst_10 = arith.constant dense<0.000000e+00> : vector<64x168xf32>
    %9 = tpu.matmul %0, %8, %cst_10 {dimension_numbers = #tpu.dot_dimension_numbers<[1], [0], [0], [1], [0, 0, 1, 1], [], []>} : vector<64x96xf32>, vector<96x168xf32>, vector<64x168xf32> -> vector<64x168xf32>
    %c1_11 = arith.constant 1 : index
    %c0_12 = arith.constant 0 : index
    %c0_13 = arith.constant 0 : index
    %10 = vector.load %arg3[%c1_11, %c0_12, %c0_13] : memref<5x56x64xf32, #tpu.memory_space<vmem>>, vector<1x56x64xf32>
    %11 = vector.shape_cast %10 : vector<1x56x64xf32> to vector<56x64xf32>
    %cst_14 = arith.constant dense<0.000000e+00> : vector<56x168xf32>
    %12 = tpu.matmul %11, %9, %cst_14 {dimension_numbers = #tpu.dot_dimension_numbers<[1], [0], [0], [1], [0, 0, 1, 1], [], []>} : vector<56x64xf32>, vector<64x168xf32>, vector<56x168xf32> -> vector<56x168xf32>
    %13 = arith.addf %6, %12 : vector<56x168xf32>
    %c2 = arith.constant 2 : index
    %c0_15 = arith.constant 0 : index
    %c0_16 = arith.constant 0 : index
    %14 = vector.load %arg2[%c2, %c0_15, %c0_16] : memref<5x96x168xf32, #tpu.memory_space<vmem>>, vector<1x96x168xf32>
    %15 = vector.shape_cast %14 : vector<1x96x168xf32> to vector<96x168xf32>
    %cst_17 = arith.constant dense<0.000000e+00> : vector<64x168xf32>
    %16 = tpu.matmul %0, %15, %cst_17 {dimension_numbers = #tpu.dot_dimension_numbers<[1], [0], [0], [1], [0, 0, 1, 1], [], []>} : vector<64x96xf32>, vector<96x168xf32>, vector<64x168xf32> -> vector<64x168xf32>
    %c2_18 = arith.constant 2 : index
    %c0_19 = arith.constant 0 : index
    %c0_20 = arith.constant 0 : index
    %17 = vector.load %arg3[%c2_18, %c0_19, %c0_20] : memref<5x56x64xf32, #tpu.memory_space<vmem>>, vector<1x56x64xf32>
    %18 = vector.shape_cast %17 : vector<1x56x64xf32> to vector<56x64xf32>
    %cst_21 = arith.constant dense<0.000000e+00> : vector<56x168xf32>
    %19 = tpu.matmul %18, %16, %cst_21 {dimension_numbers = #tpu.dot_dimension_numbers<[1], [0], [0], [1], [0, 0, 1, 1], [], []>} : vector<56x64xf32>, vector<64x168xf32>, vector<56x168xf32> -> vector<56x168xf32>
    %20 = arith.addf %13, %19 : vector<56x168xf32>
    %c3 = arith.constant 3 : index
    %c0_22 = arith.constant 0 : index
    %c0_23 = arith.constant 0 : index
    %21 = vector.load %arg2[%c3, %c0_22, %c0_23] : memref<5x96x168xf32, #tpu.memory_space<vmem>>, vector<1x96x168xf32>
    %22 = vector.shape_cast %21 : vector<1x96x168xf32> to vector<96x168xf32>
    %cst_24 = arith.constant dense<0.000000e+00> : vector<64x168xf32>
    %23 = tpu.matmul %0, %22, %cst_24 {dimension_numbers = #tpu.dot_dimension_numbers<[1], [0], [0], [1], [0, 0, 1, 1], [], []>} : vector<64x96xf32>, vector<96x168xf32>, vector<64x168xf32> -> vector<64x168xf32>
    %c3_25 = arith.constant 3 : index
    %c0_26 = arith.constant 0 : index
    %c0_27 = arith.constant 0 : index
    %24 = vector.load %arg3[%c3_25, %c0_26, %c0_27] : memref<5x56x64xf32, #tpu.memory_space<vmem>>, vector<1x56x64xf32>
    %25 = vector.shape_cast %24 : vector<1x56x64xf32> to vector<56x64xf32>
    %cst_28 = arith.constant dense<0.000000e+00> : vector<56x168xf32>
    %26 = tpu.matmul %25, %23, %cst_28 {dimension_numbers = #tpu.dot_dimension_numbers<[1], [0], [0], [1], [0, 0, 1, 1], [], []>} : vector<56x64xf32>, vector<64x168xf32>, vector<56x168xf32> -> vector<56x168xf32>
    %27 = arith.addf %20, %26 : vector<56x168xf32>
    %c4 = arith.constant 4 : index
    %c0_29 = arith.constant 0 : index
    %c0_30 = arith.constant 0 : index
    %28 = vector.load %arg2[%c4, %c0_29, %c0_30] : memref<5x96x168xf32, #tpu.memory_space<vmem>>, vector<1x96x168xf32>
    %29 = vector.shape_cast %28 : vector<1x96x168xf32> to vector<96x168xf32>
    %cst_31 = arith.constant dense<0.000000e+00> : vector<64x168xf32>
    %30 = tpu.matmul %0, %29, %cst_31 {dimension_numbers = #tpu.dot_dimension_numbers<[1], [0], [0], [1], [0, 0, 1, 1], [], []>} : vector<64x96xf32>, vector<96x168xf32>, vector<64x168xf32> -> vector<64x168xf32>
    %c4_32 = arith.constant 4 : index
    %c0_33 = arith.constant 0 : index
    %c0_34 = arith.constant 0 : index
    %31 = vector.load %arg3[%c4_32, %c0_33, %c0_34] : memref<5x56x64xf32, #tpu.memory_space<vmem>>, vector<1x56x64xf32>
    %32 = vector.shape_cast %31 : vector<1x56x64xf32> to vector<56x64xf32>
    %cst_35 = arith.constant dense<0.000000e+00> : vector<56x168xf32>
    %33 = tpu.matmul %32, %30, %cst_35 {dimension_numbers = #tpu.dot_dimension_numbers<[1], [0], [0], [1], [0, 0, 1, 1], [], []>} : vector<56x64xf32>, vector<64x168xf32>, vector<56x168xf32> -> vector<56x168xf32>
    %34 = arith.addf %27, %33 : vector<56x168xf32>
    %c0_36 = arith.constant 0 : index
    %c0_37 = arith.constant 0 : index
    %35 = vector.load %arg4[%c0_36, %c0_37] : memref<1x168xf32, #tpu.memory_space<vmem>>, vector<1x168xf32>
    %36 = vector.broadcast %35 : vector<1x168xf32> to vector<56x168xf32>
    %37 = arith.addf %34, %36 : vector<56x168xf32>
    %cst_38 = arith.constant 0.000000e+00 : f32
    %38 = vector.broadcast %cst_38 : f32 to vector<56x168xf32>
    %39 = arith.cmpf ogt, %37, %38 : vector<56x168xf32>
    %cst_39 = arith.constant 0.00999999977 : f32
    %40 = vector.broadcast %cst_39 : f32 to vector<56x168xf32>
    %41 = arith.mulf %40, %37 : vector<56x168xf32>
    %42 = arith.select %39, %37, %41 : vector<56x168xi1>, vector<56x168xf32>
    %c0_40 = arith.constant 0 : index
    %c0_41 = arith.constant 0 : index
    %43 = vector.load %arg5[%c0_40, %c0_41] : memref<168x168xf32, #tpu.memory_space<vmem>>, vector<168x168xf32>
    %cst_42 = arith.constant dense<0.000000e+00> : vector<56x168xf32>
    %44 = tpu.matmul %42, %43, %cst_42 {dimension_numbers = #tpu.dot_dimension_numbers<[1], [0], [0], [1], [0, 0, 1, 1], [], []>} : vector<56x168xf32>, vector<168x168xf32>, vector<56x168xf32> -> vector<56x168xf32>
    %45 = arith.maximumf %42, %44 : vector<56x168xf32>
    %c0_43 = arith.constant 0 : index
    %c0_44 = arith.constant 0 : index
    %46 = vector.load %arg6[%c0_43, %c0_44] : memref<56x56xf32, #tpu.memory_space<vmem>>, vector<56x56xf32>
    %cst_45 = arith.constant dense<0.000000e+00> : vector<56x168xf32>
    %47 = tpu.matmul %46, %45, %cst_45 {dimension_numbers = #tpu.dot_dimension_numbers<[1], [0], [0], [1], [0, 0, 1, 1], [], []>} : vector<56x56xf32>, vector<56x168xf32>, vector<56x168xf32> -> vector<56x168xf32>
    %48 = arith.maximumf %45, %47 : vector<56x168xf32>
    %c0_46 = arith.constant 0 : index
    %c0_47 = arith.constant 0 : index
    %c0_48 = arith.constant 0 : index
    %49 = vector.load %arg7[%c0_46, %c0_47, %c0_48] : memref<5x168x160xf32, #tpu.memory_space<vmem>>, vector<1x168x160xf32>
    %50 = vector.shape_cast %49 : vector<1x168x160xf32> to vector<168x160xf32>
    %cst_49 = arith.constant dense<0.000000e+00> : vector<56x160xf32>
    %51 = tpu.matmul %48, %50, %cst_49 {dimension_numbers = #tpu.dot_dimension_numbers<[1], [0], [0], [1], [0, 0, 1, 1], [], []>} : vector<56x168xf32>, vector<168x160xf32>, vector<56x160xf32> -> vector<56x160xf32>
    %c0_50 = arith.constant 0 : index
    %c0_51 = arith.constant 0 : index
    %c0_52 = arith.constant 0 : index
    %52 = vector.load %arg8[%c0_50, %c0_51, %c0_52] : memref<5x20x56xf32, #tpu.memory_space<vmem>>, vector<1x20x56xf32>
    %53 = vector.shape_cast %52 : vector<1x20x56xf32> to vector<20x56xf32>
    %cst_53 = arith.constant dense<0.000000e+00> : vector<20x160xf32>
    %54 = tpu.matmul %53, %51, %cst_53 {dimension_numbers = #tpu.dot_dimension_numbers<[1], [0], [0], [1], [0, 0, 1, 1], [], []>} : vector<20x56xf32>, vector<56x160xf32>, vector<20x160xf32> -> vector<20x160xf32>
    %c1_54 = arith.constant 1 : index
    %c0_55 = arith.constant 0 : index
    %c0_56 = arith.constant 0 : index
    %55 = vector.load %arg7[%c1_54, %c0_55, %c0_56] : memref<5x168x160xf32, #tpu.memory_space<vmem>>, vector<1x168x160xf32>
    %56 = vector.shape_cast %55 : vector<1x168x160xf32> to vector<168x160xf32>
    %cst_57 = arith.constant dense<0.000000e+00> : vector<56x160xf32>
    %57 = tpu.matmul %48, %56, %cst_57 {dimension_numbers = #tpu.dot_dimension_numbers<[1], [0], [0], [1], [0, 0, 1, 1], [], []>} : vector<56x168xf32>, vector<168x160xf32>, vector<56x160xf32> -> vector<56x160xf32>
    %c1_58 = arith.constant 1 : index
    %c0_59 = arith.constant 0 : index
    %c0_60 = arith.constant 0 : index
    %58 = vector.load %arg8[%c1_58, %c0_59, %c0_60] : memref<5x20x56xf32, #tpu.memory_space<vmem>>, vector<1x20x56xf32>
    %59 = vector.shape_cast %58 : vector<1x20x56xf32> to vector<20x56xf32>
    %cst_61 = arith.constant dense<0.000000e+00> : vector<20x160xf32>
    %60 = tpu.matmul %59, %57, %cst_61 {dimension_numbers = #tpu.dot_dimension_numbers<[1], [0], [0], [1], [0, 0, 1, 1], [], []>} : vector<20x56xf32>, vector<56x160xf32>, vector<20x160xf32> -> vector<20x160xf32>
    %61 = arith.addf %54, %60 : vector<20x160xf32>
    %c2_62 = arith.constant 2 : index
    %c0_63 = arith.constant 0 : index
    %c0_64 = arith.constant 0 : index
    %62 = vector.load %arg7[%c2_62, %c0_63, %c0_64] : memref<5x168x160xf32, #tpu.memory_space<vmem>>, vector<1x168x160xf32>
    %63 = vector.shape_cast %62 : vector<1x168x160xf32> to vector<168x160xf32>
    %cst_65 = arith.constant dense<0.000000e+00> : vector<56x160xf32>
    %64 = tpu.matmul %48, %63, %cst_65 {dimension_numbers = #tpu.dot_dimension_numbers<[1], [0], [0], [1], [0, 0, 1, 1], [], []>} : vector<56x168xf32>, vector<168x160xf32>, vector<56x160xf32> -> vector<56x160xf32>
    %c2_66 = arith.constant 2 : index
    %c0_67 = arith.constant 0 : index
    %c0_68 = arith.constant 0 : index
    %65 = vector.load %arg8[%c2_66, %c0_67, %c0_68] : memref<5x20x56xf32, #tpu.memory_space<vmem>>, vector<1x20x56xf32>
    %66 = vector.shape_cast %65 : vector<1x20x56xf32> to vector<20x56xf32>
    %cst_69 = arith.constant dense<0.000000e+00> : vector<20x160xf32>
    %67 = tpu.matmul %66, %64, %cst_69 {dimension_numbers = #tpu.dot_dimension_numbers<[1], [0], [0], [1], [0, 0, 1, 1], [], []>} : vector<20x56xf32>, vector<56x160xf32>, vector<20x160xf32> -> vector<20x160xf32>
    %68 = arith.addf %61, %67 : vector<20x160xf32>
    %c3_70 = arith.constant 3 : index
    %c0_71 = arith.constant 0 : index
    %c0_72 = arith.constant 0 : index
    %69 = vector.load %arg7[%c3_70, %c0_71, %c0_72] : memref<5x168x160xf32, #tpu.memory_space<vmem>>, vector<1x168x160xf32>
    %70 = vector.shape_cast %69 : vector<1x168x160xf32> to vector<168x160xf32>
    %cst_73 = arith.constant dense<0.000000e+00> : vector<56x160xf32>
    %71 = tpu.matmul %48, %70, %cst_73 {dimension_numbers = #tpu.dot_dimension_numbers<[1], [0], [0], [1], [0, 0, 1, 1], [], []>} : vector<56x168xf32>, vector<168x160xf32>, vector<56x160xf32> -> vector<56x160xf32>
    %c3_74 = arith.constant 3 : index
    %c0_75 = arith.constant 0 : index
    %c0_76 = arith.constant 0 : index
    %72 = vector.load %arg8[%c3_74, %c0_75, %c0_76] : memref<5x20x56xf32, #tpu.memory_space<vmem>>, vector<1x20x56xf32>
    %73 = vector.shape_cast %72 : vector<1x20x56xf32> to vector<20x56xf32>
    %cst_77 = arith.constant dense<0.000000e+00> : vector<20x160xf32>
    %74 = tpu.matmul %73, %71, %cst_77 {dimension_numbers = #tpu.dot_dimension_numbers<[1], [0], [0], [1], [0, 0, 1, 1], [], []>} : vector<20x56xf32>, vector<56x160xf32>, vector<20x160xf32> -> vector<20x160xf32>
    %75 = arith.addf %68, %74 : vector<20x160xf32>
    %c4_78 = arith.constant 4 : index
    %c0_79 = arith.constant 0 : index
    %c0_80 = arith.constant 0 : index
    %76 = vector.load %arg7[%c4_78, %c0_79, %c0_80] : memref<5x168x160xf32, #tpu.memory_space<vmem>>, vector<1x168x160xf32>
    %77 = vector.shape_cast %76 : vector<1x168x160xf32> to vector<168x160xf32>
    %cst_81 = arith.constant dense<0.000000e+00> : vector<56x160xf32>
    %78 = tpu.matmul %48, %77, %cst_81 {dimension_numbers = #tpu.dot_dimension_numbers<[1], [0], [0], [1], [0, 0, 1, 1], [], []>} : vector<56x168xf32>, vector<168x160xf32>, vector<56x160xf32> -> vector<56x160xf32>
    %c4_82 = arith.constant 4 : index
    %c0_83 = arith.constant 0 : index
    %c0_84 = arith.constant 0 : index
    %79 = vector.load %arg8[%c4_82, %c0_83, %c0_84] : memref<5x20x56xf32, #tpu.memory_space<vmem>>, vector<1x20x56xf32>
    %80 = vector.shape_cast %79 : vector<1x20x56xf32> to vector<20x56xf32>
    %cst_85 = arith.constant dense<0.000000e+00> : vector<20x160xf32>
    %81 = tpu.matmul %80, %78, %cst_85 {dimension_numbers = #tpu.dot_dimension_numbers<[1], [0], [0], [1], [0, 0, 1, 1], [], []>} : vector<20x56xf32>, vector<56x160xf32>, vector<20x160xf32> -> vector<20x160xf32>
    %82 = arith.addf %75, %81 : vector<20x160xf32>
    %c0_86 = arith.constant 0 : index
    %c0_87 = arith.constant 0 : index
    %83 = vector.load %arg9[%c0_86, %c0_87] : memref<1x160xf32, #tpu.memory_space<vmem>>, vector<1x160xf32>
    %84 = vector.broadcast %83 : vector<1x160xf32> to vector<20x160xf32>
    %85 = arith.addf %82, %84 : vector<20x160xf32>
    %cst_88 = arith.constant 0.000000e+00 : f32
    %86 = vector.broadcast %cst_88 : f32 to vector<20x160xf32>
    %87 = arith.cmpf ogt, %85, %86 : vector<20x160xf32>
    %cst_89 = arith.constant 0.00999999977 : f32
    %88 = vector.broadcast %cst_89 : f32 to vector<20x160xf32>
    %89 = arith.mulf %88, %85 : vector<20x160xf32>
    %90 = arith.select %87, %85, %89 : vector<20x160xi1>, vector<20x160xf32>
    %c0_90 = arith.constant 0 : index
    %c0_91 = arith.constant 0 : index
    %91 = vector.load %arg10[%c0_90, %c0_91] : memref<160x160xf32, #tpu.memory_space<vmem>>, vector<160x160xf32>
    %cst_92 = arith.constant dense<0.000000e+00> : vector<20x160xf32>
    %92 = tpu.matmul %90, %91, %cst_92 {dimension_numbers = #tpu.dot_dimension_numbers<[1], [0], [0], [1], [0, 0, 1, 1], [], []>} : vector<20x160xf32>, vector<160x160xf32>, vector<20x160xf32> -> vector<20x160xf32>
    %93 = arith.maximumf %90, %92 : vector<20x160xf32>
    %c0_93 = arith.constant 0 : index
    %c0_94 = arith.constant 0 : index
    %94 = vector.load %arg11[%c0_93, %c0_94] : memref<20x20xf32, #tpu.memory_space<vmem>>, vector<20x20xf32>
    %cst_95 = arith.constant dense<0.000000e+00> : vector<20x160xf32>
    %95 = tpu.matmul %94, %93, %cst_95 {dimension_numbers = #tpu.dot_dimension_numbers<[1], [0], [0], [1], [0, 0, 1, 1], [], []>} : vector<20x20xf32>, vector<20x160xf32>, vector<20x160xf32> -> vector<20x160xf32>
    %96 = arith.maximumf %93, %95 : vector<20x160xf32>
    %c0_96 = arith.constant 0 : index
    %c0_97 = arith.constant 0 : index
    %c0_98 = arith.constant 0 : index
    %97 = vector.load %arg13[%c0_96, %c0_97, %c0_98] : memref<5x2x20xf32, #tpu.memory_space<vmem>>, vector<1x2x20xf32>
    %98 = vector.shape_cast %97 : vector<1x2x20xf32> to vector<2x20xf32>
    %cst_99 = arith.constant dense<0.000000e+00> : vector<2x160xf32>
    %99 = tpu.matmul %98, %96, %cst_99 {dimension_numbers = #tpu.dot_dimension_numbers<[1], [0], [0], [1], [0, 0, 1, 1], [], []>} : vector<2x20xf32>, vector<20x160xf32>, vector<2x160xf32> -> vector<2x160xf32>
    %c0_100 = arith.constant 0 : index
    %c0_101 = arith.constant 0 : index
    %c0_102 = arith.constant 0 : index
    %100 = vector.load %arg12[%c0_100, %c0_101, %c0_102] : memref<5x160x120xf32, #tpu.memory_space<vmem>>, vector<1x160x120xf32>
    %101 = vector.shape_cast %100 : vector<1x160x120xf32> to vector<160x120xf32>
    %cst_103 = arith.constant dense<0.000000e+00> : vector<2x120xf32>
    %102 = tpu.matmul %99, %101, %cst_103 {dimension_numbers = #tpu.dot_dimension_numbers<[1], [0], [0], [1], [0, 0, 1, 1], [], []>} : vector<2x160xf32>, vector<160x120xf32>, vector<2x120xf32> -> vector<2x120xf32>
    %c1_104 = arith.constant 1 : index
    %c0_105 = arith.constant 0 : index
    %c0_106 = arith.constant 0 : index
    %103 = vector.load %arg13[%c1_104, %c0_105, %c0_106] : memref<5x2x20xf32, #tpu.memory_space<vmem>>, vector<1x2x20xf32>
    %104 = vector.shape_cast %103 : vector<1x2x20xf32> to vector<2x20xf32>
    %cst_107 = arith.constant dense<0.000000e+00> : vector<2x160xf32>
    %105 = tpu.matmul %104, %96, %cst_107 {dimension_numbers = #tpu.dot_dimension_numbers<[1], [0], [0], [1], [0, 0, 1, 1], [], []>} : vector<2x20xf32>, vector<20x160xf32>, vector<2x160xf32> -> vector<2x160xf32>
    %c1_108 = arith.constant 1 : index
    %c0_109 = arith.constant 0 : index
    %c0_110 = arith.constant 0 : index
    %106 = vector.load %arg12[%c1_108, %c0_109, %c0_110] : memref<5x160x120xf32, #tpu.memory_space<vmem>>, vector<1x160x120xf32>
    %107 = vector.shape_cast %106 : vector<1x160x120xf32> to vector<160x120xf32>
    %cst_111 = arith.constant dense<0.000000e+00> : vector<2x120xf32>
    %108 = tpu.matmul %105, %107, %cst_111 {dimension_numbers = #tpu.dot_dimension_numbers<[1], [0], [0], [1], [0, 0, 1, 1], [], []>} : vector<2x160xf32>, vector<160x120xf32>, vector<2x120xf32> -> vector<2x120xf32>
    %109 = arith.addf %102, %108 : vector<2x120xf32>
    %c2_112 = arith.constant 2 : index
    %c0_113 = arith.constant 0 : index
    %c0_114 = arith.constant 0 : index
    %110 = vector.load %arg13[%c2_112, %c0_113, %c0_114] : memref<5x2x20xf32, #tpu.memory_space<vmem>>, vector<1x2x20xf32>
    %111 = vector.shape_cast %110 : vector<1x2x20xf32> to vector<2x20xf32>
    %cst_115 = arith.constant dense<0.000000e+00> : vector<2x160xf32>
    %112 = tpu.matmul %111, %96, %cst_115 {dimension_numbers = #tpu.dot_dimension_numbers<[1], [0], [0], [1], [0, 0, 1, 1], [], []>} : vector<2x20xf32>, vector<20x160xf32>, vector<2x160xf32> -> vector<2x160xf32>
    %c2_116 = arith.constant 2 : index
    %c0_117 = arith.constant 0 : index
    %c0_118 = arith.constant 0 : index
    %113 = vector.load %arg12[%c2_116, %c0_117, %c0_118] : memref<5x160x120xf32, #tpu.memory_space<vmem>>, vector<1x160x120xf32>
    %114 = vector.shape_cast %113 : vector<1x160x120xf32> to vector<160x120xf32>
    %cst_119 = arith.constant dense<0.000000e+00> : vector<2x120xf32>
    %115 = tpu.matmul %112, %114, %cst_119 {dimension_numbers = #tpu.dot_dimension_numbers<[1], [0], [0], [1], [0, 0, 1, 1], [], []>} : vector<2x160xf32>, vector<160x120xf32>, vector<2x120xf32> -> vector<2x120xf32>
    %116 = arith.addf %109, %115 : vector<2x120xf32>
    %c3_120 = arith.constant 3 : index
    %c0_121 = arith.constant 0 : index
    %c0_122 = arith.constant 0 : index
    %117 = vector.load %arg13[%c3_120, %c0_121, %c0_122] : memref<5x2x20xf32, #tpu.memory_space<vmem>>, vector<1x2x20xf32>
    %118 = vector.shape_cast %117 : vector<1x2x20xf32> to vector<2x20xf32>
    %cst_123 = arith.constant dense<0.000000e+00> : vector<2x160xf32>
    %119 = tpu.matmul %118, %96, %cst_123 {dimension_numbers = #tpu.dot_dimension_numbers<[1], [0], [0], [1], [0, 0, 1, 1], [], []>} : vector<2x20xf32>, vector<20x160xf32>, vector<2x160xf32> -> vector<2x160xf32>
    %c3_124 = arith.constant 3 : index
    %c0_125 = arith.constant 0 : index
    %c0_126 = arith.constant 0 : index
    %120 = vector.load %arg12[%c3_124, %c0_125, %c0_126] : memref<5x160x120xf32, #tpu.memory_space<vmem>>, vector<1x160x120xf32>
    %121 = vector.shape_cast %120 : vector<1x160x120xf32> to vector<160x120xf32>
    %cst_127 = arith.constant dense<0.000000e+00> : vector<2x120xf32>
    %122 = tpu.matmul %119, %121, %cst_127 {dimension_numbers = #tpu.dot_dimension_numbers<[1], [0], [0], [1], [0, 0, 1, 1], [], []>} : vector<2x160xf32>, vector<160x120xf32>, vector<2x120xf32> -> vector<2x120xf32>
    %123 = arith.addf %116, %122 : vector<2x120xf32>
    %c4_128 = arith.constant 4 : index
    %c0_129 = arith.constant 0 : index
    %c0_130 = arith.constant 0 : index
    %124 = vector.load %arg13[%c4_128, %c0_129, %c0_130] : memref<5x2x20xf32, #tpu.memory_space<vmem>>, vector<1x2x20xf32>
    %125 = vector.shape_cast %124 : vector<1x2x20xf32> to vector<2x20xf32>
    %cst_131 = arith.constant dense<0.000000e+00> : vector<2x160xf32>
    %126 = tpu.matmul %125, %96, %cst_131 {dimension_numbers = #tpu.dot_dimension_numbers<[1], [0], [0], [1], [0, 0, 1, 1], [], []>} : vector<2x20xf32>, vector<20x160xf32>, vector<2x160xf32> -> vector<2x160xf32>
    %c4_132 = arith.constant 4 : index
    %c0_133 = arith.constant 0 : index
    %c0_134 = arith.constant 0 : index
    %127 = vector.load %arg12[%c4_132, %c0_133, %c0_134] : memref<5x160x120xf32, #tpu.memory_space<vmem>>, vector<1x160x120xf32>
    %128 = vector.shape_cast %127 : vector<1x160x120xf32> to vector<160x120xf32>
    %cst_135 = arith.constant dense<0.000000e+00> : vector<2x120xf32>
    %129 = tpu.matmul %126, %128, %cst_135 {dimension_numbers = #tpu.dot_dimension_numbers<[1], [0], [0], [1], [0, 0, 1, 1], [], []>} : vector<2x160xf32>, vector<160x120xf32>, vector<2x120xf32> -> vector<2x120xf32>
    %130 = arith.addf %123, %129 : vector<2x120xf32>
    %c0_136 = arith.constant 0 : index
    %c0_137 = arith.constant 0 : index
    %131 = vector.load %arg14[%c0_136, %c0_137] : memref<1x120xf32, #tpu.memory_space<vmem>>, vector<1x120xf32>
    %132 = vector.broadcast %131 : vector<1x120xf32> to vector<2x120xf32>
    %133 = arith.addf %130, %132 : vector<2x120xf32>
    %cst_138 = arith.constant 0.000000e+00 : f32
    %134 = vector.broadcast %cst_138 : f32 to vector<2x120xf32>
    %135 = arith.cmpf ogt, %133, %134 : vector<2x120xf32>
    %cst_139 = arith.constant 0.00999999977 : f32
    %136 = vector.broadcast %cst_139 : f32 to vector<2x120xf32>
    %137 = arith.mulf %136, %133 : vector<2x120xf32>
    %138 = arith.select %135, %133, %137 : vector<2x120xi1>, vector<2x120xf32>
    %c0_140 = arith.constant 0 : index
    %c0_141 = arith.constant 0 : index
    %139 = vector.load %arg15[%c0_140, %c0_141] : memref<120x84xf32, #tpu.memory_space<vmem>>, vector<120x84xf32>
    %cst_142 = arith.constant dense<0.000000e+00> : vector<2x84xf32>
    %140 = tpu.matmul %138, %139, %cst_142 {dimension_numbers = #tpu.dot_dimension_numbers<[1], [0], [0], [1], [0, 0, 1, 1], [], []>} : vector<2x120xf32>, vector<120x84xf32>, vector<2x84xf32> -> vector<2x84xf32>
    %c0_143 = arith.constant 0 : index
    %c0_144 = arith.constant 0 : index
    %141 = vector.load %arg16[%c0_143, %c0_144] : memref<1x84xf32, #tpu.memory_space<vmem>>, vector<1x84xf32>
    %142 = vector.broadcast %141 : vector<1x84xf32> to vector<2x84xf32>
    %143 = arith.addf %140, %142 : vector<2x84xf32>
    %cst_145 = arith.constant 0.000000e+00 : f32
    %144 = vector.broadcast %cst_145 : f32 to vector<2x84xf32>
    %145 = arith.cmpf ogt, %143, %144 : vector<2x84xf32>
    %cst_146 = arith.constant 0.00999999977 : f32
    %146 = vector.broadcast %cst_146 : f32 to vector<2x84xf32>
    %147 = arith.mulf %146, %143 : vector<2x84xf32>
    %148 = arith.select %145, %143, %147 : vector<2x84xi1>, vector<2x84xf32>
    %c0_147 = arith.constant 0 : index
    %c0_148 = arith.constant 0 : index
    %149 = vector.load %arg17[%c0_147, %c0_148] : memref<84x10xf32, #tpu.memory_space<vmem>>, vector<84x10xf32>
    %cst_149 = arith.constant dense<0.000000e+00> : vector<2x10xf32>
    %150 = tpu.matmul %148, %149, %cst_149 {dimension_numbers = #tpu.dot_dimension_numbers<[1], [0], [0], [1], [0, 0, 1, 1], [], []>} : vector<2x84xf32>, vector<84x10xf32>, vector<2x10xf32> -> vector<2x10xf32>
    %c0_150 = arith.constant 0 : index
    %c0_151 = arith.constant 0 : index
    %151 = vector.load %arg18[%c0_150, %c0_151] : memref<1x10xf32, #tpu.memory_space<vmem>>, vector<1x10xf32>
    %152 = vector.broadcast %151 : vector<1x10xf32> to vector<2x10xf32>
    %153 = arith.addf %150, %152 : vector<2x10xf32>
    %c0_152 = arith.constant 0 : index
    %c0_153 = arith.constant 0 : index
    %154 = vector.load %arg19[%c0_152, %c0_153] : memref<2x10xf32, #tpu.memory_space<vmem>>, vector<2x10xf32>
    tpu.vector_store %arg19[%c0_152, %c0_153], %153 {strides = array<i32>} : memref<2x10xf32, #tpu.memory_space<vmem>>, vector<2x10xf32>,
    return
  }
  func.func @transform_0(%arg0: i32) -> (i32, i32) {
    %c0_i32 = arith.constant 0 : i32
    %c0_i32_0 = arith.constant 0 : i32
    %c0_i32_1 = arith.constant 0 : i32
    return %c0_i32, %c0_i32_0 : i32, i32
  }
  func.func @transform_1(%arg0: i32) -> (i32, i32, i32) {
    %c0_i32 = arith.constant 0 : i32
    %c0_i32_0 = arith.constant 0 : i32
    %c0_i32_1 = arith.constant 0 : i32
    %c0_i32_2 = arith.constant 0 : i32
    return %c0_i32, %c0_i32_0, %c0_i32_1 : i32, i32, i32
  }
  func.func @transform_2(%arg0: i32) -> (i32, i32, i32) {
    %c0_i32 = arith.constant 0 : i32
    %c0_i32_0 = arith.constant 0 : i32
    %c0_i32_1 = arith.constant 0 : i32
    %c0_i32_2 = arith.constant 0 : i32
    return %c0_i32, %c0_i32_0, %c0_i32_1 : i32, i32, i32
  }
  func.func @transform_3(%arg0: i32) -> (i32, i32) {
    %c0_i32 = arith.constant 0 : i32
    %c0_i32_0 = arith.constant 0 : i32
    %c0_i32_1 = arith.constant 0 : i32
    return %c0_i32, %c0_i32_0 : i32, i32
  }
  func.func @transform_4(%arg0: i32) -> (i32, i32) {
    %c0_i32 = arith.constant 0 : i32
    %c0_i32_0 = arith.constant 0 : i32
    %c0_i32_1 = arith.constant 0 : i32
    return %c0_i32, %c0_i32_0 : i32, i32
  }
  func.func @transform_5(%arg0: i32) -> (i32, i32) {
    %c0_i32 = arith.constant 0 : i32
    %c0_i32_0 = arith.constant 0 : i32
    %c0_i32_1 = arith.constant 0 : i32
    return %c0_i32, %c0_i32_0 : i32, i32
  }
  func.func @transform_6(%arg0: i32) -> (i32, i32, i32) {
    %c0_i32 = arith.constant 0 : i32
    %c0_i32_0 = arith.constant 0 : i32
    %c0_i32_1 = arith.constant 0 : i32
    %c0_i32_2 = arith.constant 0 : i32
    return %c0_i32, %c0_i32_0, %c0_i32_1 : i32, i32, i32
  }
  func.func @transform_7(%arg0: i32) -> (i32, i32, i32) {
    %c0_i32 = arith.constant 0 : i32
    %c0_i32_0 = arith.constant 0 : i32
    %c0_i32_1 = arith.constant 0 : i32
    %c0_i32_2 = arith.constant 0 : i32
    return %c0_i32, %c0_i32_0, %c0_i32_1 : i32, i32, i32
  }
  func.func @transform_8(%arg0: i32) -> (i32, i32) {
    %c0_i32 = arith.constant 0 : i32
    %c0_i32_0 = arith.constant 0 : i32
    %c0_i32_1 = arith.constant 0 : i32
    return %c0_i32, %c0_i32_0 : i32, i32
  }
  func.func @transform_9(%arg0: i32) -> (i32, i32) {
    %c0_i32 = arith.constant 0 : i32
    %c0_i32_0 = arith.constant 0 : i32
    %c0_i32_1 = arith.constant 0 : i32
    return %c0_i32, %c0_i32_0 : i32, i32
  }
  func.func @transform_10(%arg0: i32) -> (i32, i32) {
    %c0_i32 = arith.constant 0 : i32
    %c0_i32_0 = arith.constant 0 : i32
    %c0_i32_1 = arith.constant 0 : i32
    return %c0_i32, %c0_i32_0 : i32, i32
  }
  func.func @transform_11(%arg0: i32) -> (i32, i32, i32) {
    %c0_i32 = arith.constant 0 : i32
    %c0_i32_0 = arith.constant 0 : i32
    %c0_i32_1 = arith.constant 0 : i32
    %c0_i32_2 = arith.constant 0 : i32
    return %c0_i32, %c0_i32_0, %c0_i32_1 : i32, i32, i32
  }
  func.func @transform_12(%arg0: i32) -> (i32, i32, i32) {
    %c0_i32 = arith.constant 0 : i32
    %c0_i32_0 = arith.constant 0 : i32
    %c0_i32_1 = arith.constant 0 : i32
    %c0_i32_2 = arith.constant 0 : i32
    return %c0_i32, %c0_i32_0, %c0_i32_1 : i32, i32, i32
  }
  func.func @transform_13(%arg0: i32) -> (i32, i32) {
    %c0_i32 = arith.constant 0 : i32
    %c0_i32_0 = arith.constant 0 : i32
    %c0_i32_1 = arith.constant 0 : i32
    return %c0_i32, %c0_i32_0 : i32, i32
  }
  func.func @transform_14(%arg0: i32) -> (i32, i32) {
    %c0_i32 = arith.constant 0 : i32
    %c0_i32_0 = arith.constant 0 : i32
    %c0_i32_1 = arith.constant 0 : i32
    return %c0_i32, %c0_i32_0 : i32, i32
  }
  func.func @transform_15(%arg0: i32) -> (i32, i32) {
    %c0_i32 = arith.constant 0 : i32
    %c0_i32_0 = arith.constant 0 : i32
    %c0_i32_1 = arith.constant 0 : i32
    return %c0_i32, %c0_i32_0 : i32, i32
  }
  func.func @transform_16(%arg0: i32) -> (i32, i32) {
    %c0_i32 = arith.constant 0 : i32
    %c0_i32_0 = arith.constant 0 : i32
    %c0_i32_1 = arith.constant 0 : i32
    return %c0_i32, %c0_i32_0 : i32, i32
  }
  func.func @transform_17(%arg0: i32) -> (i32, i32) {
    %c0_i32 = arith.constant 0 : i32
    %c0_i32_0 = arith.constant 0 : i32
    %c0_i32_1 = arith.constant 0 : i32
    return %c0_i32, %c0_i32_0 : i32, i32
  }
  func.func @transform_18(%arg0: i32) -> (i32, i32) {
    %c0_i32 = arith.constant 0 : i32
    %c0_i32_0 = arith.constant 0 : i32
    %c0_i32_1 = arith.constant 0 : i32
    return %c0_i32, %c0_i32_0 : i32, i32
  }
}

</mosaic_0001>

<bundles_post_ra>
// kernel: lenet5_forward.1
= control target key start
LH: loop header
LB: loop body
LE: loop exit
PB: predicated region body
PF: predicated region fallthrough
CT: control target
= control target key end

     0   :  { %s8799_s0 = inlined_call_operand.vmem [shape: f32[64,96], index: 0, kind: input, shape index: {}]   ;;  %s8800_s1 = inlined_call_operand.vmem [shape: f32[5,96,168], index: 1, kind: input, shape index: {}]   ;;  %s8801_s2 = inlined_call_operand.vmem [shape: f32[5,56,64], index: 2, kind: input, shape index: {}]   ;;  %s8802_s3 = inlined_call_operand.vmem [shape: f32[1,168], index: 3, kind: input, shape index: {}]   ;;  %s8803_s4 = inlined_call_operand.vmem [shape: f32[168,168], index: 4, kind: input, shape index: {}]   ;;  %s8804_s5 = inlined_call_operand.vmem [shape: f32[56,56], index: 5, kind: input, shape index: {}]   ;;  %s8805_s6 = inlined_call_operand.vmem [shape: f32[5,168,160], index: 6, kind: input, shape index: {}]   ;;  %s8806_s7 = inlined_call_operand.vmem [shape: f32[5,20,56], index: 7, kind: input, shape index: {}]   ;;  %s8807_s8 = inlined_call_operand.vmem [shape: f32[1,160], index: 8, kind: input, shape index: {}]   ;;  %s8808_s9 = inlined_call_operand.vmem [shape: f32[160,160], index: 9, kind: input, shape index: {}]   ;;  %s8809_s10 = inlined_call_operand.vmem [shape: f32[20,20], index: 10, kind: input, shape index: {}]   ;;  %s8810_s11 = inlined_call_operand.vmem [shape: f32[5,160,120], index: 11, kind: input, shape index: {}]   ;;  %s8811_s12 = inlined_call_operand.vmem [shape: f32[5,2,20], index: 12, kind: input, shape index: {}]   ;;  %s8812_s13 = inlined_call_operand.vmem [shape: f32[1,120], index: 13, kind: input, shape index: {}]   ;;  %s8813_s14 = inlined_call_operand.vmem [shape: f32[120,84], index: 14, kind: input, shape index: {}]   ;;  %s8814_s15 = inlined_call_operand.vmem [shape: f32[1,84], index: 15, kind: input, shape index: {}]   ;;  %s8815_s16 = inlined_call_operand.vmem [shape: f32[84,10], index: 16, kind: input, shape index: {}]   ;;  %s8816_s17 = inlined_call_operand.vmem [shape: f32[1,10], index: 17, kind: input, shape index: {}]   ;;  %s8817_s18 = inlined_call_operand.hbm [shape: f32[2,10], index: 18, kind: output, shape index: {}]  }
   0x1   :  { %8821 = sst [smem:[#allocation5_spill]] %s8799_s0 }
   0x2   :  { %8822 = sst [smem:[#allocation6_spill]] %s8800_s1 }
   0x3   :  { %8823 = sst [smem:[#allocation7_spill]] %s8801_s2 }
   0x4   :  { %s8824_s29 = sld [smem:[#allocation6_spill]]  ;;  %v6053_v7 = vmov 0.0   ;;  %s8825_s25 = sld [smem:[#allocation5_spill]]  ;;  %vm92_vm0 = vcmask 785408  }
   0x5   :  { %326 = vmatprep.mubr.f32.mxu1 %v6053_v7  ;;  %181 = vmatprep.mubr.f32.mxu0 %v6053_v7 }
   0xa   :  { %v4545_v0 = vld [vmem:[%s8824_s29 + $0xc8] sm:$0xff]  ;;  %v4547_v1 = vld [vmem:[%s8824_s29 + $0xd8] sm:$0xff]  ;;  %v4544_v2 = vld [vmem:[%s8824_s29 + $0xc0] sm:$0xff] }
   0xb   :  { %v5207_v3 = vpack.c.bf16 %v4547_v1, %v4545_v0  ;;  %v4546_v4 = vld [vmem:[%s8824_s29 + $0xd0] sm:$0xff]  ;;  %v4549_v5 = vld [vmem:[%s8824_s29 + $0xe8] sm:$0xff]  ;;  %v4551_v6 = vld [vmem:[%s8824_s29 + $0xf8] sm:$0xff] }
   0xc   :  { %v5209_v8 = vpack.c.bf16 %v4546_v4, %v4544_v2  ;;  %v5211_v9 = vpack.c.bf16 %v4551_v6, %v4549_v5  ;;  %v4548_v10 = vld [vmem:[%s8824_s29 + $0xe0] sm:$0xff]  ;;  %v4550_v11 = vld [vmem:[%s8824_s29 + $0xf0] sm:$0xff]  ;;  %v4553_v12 = vld [vmem:[%s8824_s29 + $0x108] sm:$0xff] }
   0xd   :  { %5208 = vmatprep.subr.bf16.mxu1 %v5207_v3  ;;  %v4555_v13 = vld [vmem:[%s8824_s29 + $0x118] sm:$0xff]  ;;  %v5213_v14 = vpack.c.bf16 %v4550_v11, %v4548_v10  ;;  %v4552_v16 = vld [vmem:[%s8824_s29 + $0x100] sm:$0xff]  ;;  %v4554_v17 = vld [vmem:[%s8824_s29 + $0x110] sm:$0xff] }
   0xe   :  { %5210 = vmatpush1.bf16.msra.mxu1 %v5209_v8  ;;  %v5215_v15 = vpack.c.bf16 %v4555_v13, %v4553_v12  ;;  %v4557_v18 = vld [vmem:[%s8824_s29 + $0x128] sm:$0xff]  ;;  %v4559_v19 = vld [vmem:[%s8824_s29 + $0x138] sm:$0xff]  ;;  %v68_v23 = vld [vmem:[%s8824_s29] sm:$0xff]  ;;  %v5217_v25 = vpack.c.bf16 %v4554_v17, %v4552_v16 }
   0xf   :  { %5212 = vmatprep.subr.bf16.mxu1 %v5211_v9  ;;  %v69_v20 = vld [vmem:[%s8824_s29 + $0x8] sm:$0xff]  ;;  %v71_v21 = vld [vmem:[%s8824_s29 + $0x18] sm:$0xff]  ;;  %v70_v24 = vld [vmem:[%s8824_s29 + $0x10] sm:$0xff]  ;;  %v5219_v29 = vpack.c.bf16 %v4559_v19, %v4557_v18 }
  0x10   :  { %v5183_v22 = vpack.c.bf16 %v71_v21, %v69_v20  ;;  %v4556_v26 = vld [vmem:[%s8824_s29 + $0x120] sm:$0xff]  ;;  %v5185_v27 = vpack.c.bf16 %v70_v24, %v68_v23  ;;  %v73_v28 = vld [vmem:[%s8824_s29 + $0x28] sm:$0xff]  ;;  %v4558_v30 = vld [vmem:[%s8824_s29 + $0x130] sm:$0xff] }
  0x11   :  { %v4561_v31 = vld [vmem:[%s8824_s29 + $0x148] sm:$0xff]  ;;  %v75_v32 = vld [vmem:[%s8824_s29 + $0x38] sm:$0xff]  ;;  %v72_v35 = vld [vmem:[%s8824_s29 + $0x20] sm:$0xff]  ;;  %v5221_v41 = vpack.c.bf16 %v4558_v30, %v4556_v26 }
  0x12   :  { %5214 = vmatpush1.bf16.msra.mxu1 %v5213_v14  ;;  %5184 = vmatprep.subr.bf16.mxu0 %v5183_v22  ;;  %v4563_v33 = vld [vmem:[%s8824_s29 + $0x158] sm:$0xff]  ;;  %v5187_v34 = vpack.c.bf16 %v75_v32, %v73_v28  ;;  %v74_v36 = vld [vmem:[%s8824_s29 + $0x30] sm:$0xff]  ;;  %v77_v38 = vld [vmem:[%s8824_s29 + $0x48] sm:$0xff] }
  0x13   :  { %5216 = vmatprep.subr.bf16.mxu1 %v5215_v15  ;;  %5186 = vmatpush1.bf16.msra.mxu0 %v5185_v27  ;;  %v5189_v37 = vpack.c.bf16 %v74_v36, %v72_v35  ;;  %v79_v39 = vld [vmem:[%s8824_s29 + $0x58] sm:$0xff]  ;;  %v76_v40 = vld [vmem:[%s8824_s29 + $0x40] sm:$0xff]  ;;  %v78_v43 = vld [vmem:[%s8824_s29 + $0x50] sm:$0xff]  ;;  %v5223_v45 = vpack.c.bf16 %v4563_v33, %v4561_v31 }
  0x14   :  { %5188 = vmatprep.subr.bf16.mxu0 %v5187_v34  ;;  %v5191_v42 = vpack.c.bf16 %v79_v39, %v77_v38  ;;  %v81_v44 = vld [vmem:[%s8824_s29 + $0x68] sm:$0xff]  ;;  %v4560_v46 = vld [vmem:[%s8824_s29 + $0x140] sm:$0xff]  ;;  %v4562_v47 = vld [vmem:[%s8824_s29 + $0x150] sm:$0xff]  ;;  %v5193_v51 = vpack.c.bf16 %v78_v43, %v76_v40 }
  0x15   :  { %v83_v48 = vld [vmem:[%s8824_s29 + $0x78] sm:$0xff]  ;;  %v4565_v49 = vld [vmem:[%s8824_s29 + $0x168] sm:$0xff]  ;;  %v80_v53 = vld [vmem:[%s8824_s29 + $0x60] sm:$0xff]  ;;  %v5225_v55 = vpack.c.bf16 %v4562_v47, %v4560_v46 }
  0x16   :  { %5218 = vmatpush1.bf16.msra.mxu1 %v5217_v25  ;;  %v4567_v50 = vld [vmem:[%s8824_s29 + $0x178] sm:$0xff]  ;;  %v5195_v52 = vpack.c.bf16 %v83_v48, %v81_v44  ;;  %v82_v54 = vld [vmem:[%s8824_s29 + $0x70] sm:$0xff]  ;;  %v85_v56 = vld [vmem:[%s8824_s29 + $0x88] sm:$0xff] }
  0x17   :  { %5220 = vmatprep.subr.bf16.mxu1 %v5219_v29  ;;  %5190 = vmatpush1.bf16.msra.mxu0 %v5189_v37  ;;  %v87_v57 = vld [vmem:[%s8824_s29 + $0x98] sm:$0xff]  ;;  %v5227_v58 = vpack.c.bf16 %v4567_v50, %v4565_v49  ;;  %v4564_v59 = vld [vmem:[%s8824_s29 + $0x160] sm:$0xff]  ;;  %v4566_v60 = vld [vmem:[%s8824_s29 + $0x170] sm:$0xff]  ;;  %v5197_v61 = vpack.c.bf16 %v82_v54, %v80_v53 }
  0x18   :  { %5192 = vmatprep.subr.bf16.mxu0 %v5191_v42  ;;  %v4598_v62 = vld [vmem:[%s8824_s29 + $0x188] sm:$0xff]  ;;  %v4600_v63 = vld [vmem:[%s8824_s29 + $0x198] sm:$0xff]  ;;  %v5199_v0 = vpack.c.bf16 %v87_v57, %v85_v56  ;;  %v84_v1 = vld [vmem:[%s8824_s29 + $0x80] sm:$0xff]  ;;  %v5229_v3 = vpack.c.bf16 %v4566_v60, %v4564_v59 }
  0x19   :  { %v86_v2 = vld [vmem:[%s8824_s29 + $0x90] sm:$0xff]  ;;  %v89_v4 = vld [vmem:[%s8824_s29 + $0xa8] sm:$0xff]  ;;  %v91_v5 = vld [vmem:[%s8824_s29 + $0xb8] sm:$0xff]  ;;  %v5263_v6 = vpack.c.bf16 %v4600_v63, %v4598_v62 }
  0x1a   :  { %5222 = vmatpush1.bf16.msra.mxu1 %v5221_v41  ;;  %v4597_v8 = vld [vmem:[%s8824_s29 + $0x180] sm:$0xff]  ;;  %v4599_v9 = vld [vmem:[%s8824_s29 + $0x190] sm:$0xff]  ;;  %v5201_v10 = vpack.c.bf16 %v86_v2, %v84_v1  ;;  %v4602_v11 = vld [vmem:[%s8824_s29 + $0x1a8] sm:$0xff]  ;;  %v5203_v13 = vpack.c.bf16 %v91_v5, %v89_v4 }
  0x1b   :  { %5224 = vmatprep.subr.bf16.mxu1 %v5223_v45  ;;  %5194 = vmatpush1.bf16.msra.mxu0 %v5193_v51  ;;  %v4604_v12 = vld [vmem:[%s8824_s29 + $0x1b8] sm:$0xff]  ;;  %v88_v14 = vld [vmem:[%s8824_s29 + $0xa0] sm:$0xff]  ;;  %v90_v15 = vld [vmem:[%s8824_s29 + $0xb0] sm:$0xff]  ;;  %v5265_v17 = vpack.c.bf16 %v4599_v9, %v4597_v8 }
  0x1c   :  { %5196 = vmatprep.subr.bf16.mxu0 %v5195_v52  ;;  %v6319_v16 = vld [vmem:[%s8825_s25] sm:$0xff]  ;;  %v5267_v18 = vpack.c.bf16 %v4604_v12, %v4602_v11  ;;  %v4603_v20 = vld [vmem:[%s8824_s29 + $0x1b0] sm:$0xff]  ;;  %v5205_v21 = vpack.c.bf16 %v90_v15, %v88_v14  ;;  %v4606_v22 = vld [vmem:[%s8824_s29 + $0x1c8] sm:$0xff] }
  0x1d   :  { %v4601_v19 = vld [vmem:[%s8824_s29 + $0x1a0] sm:$0xff]  ;;  %v4608_v23 = vld [vmem:[%s8824_s29 + $0x1d8] sm:$0xff]  ;;  %v6339_v24 = vld [vmem:[%s8825_s25 + $0x8] sm:$0xff] }
  0x1e   :  { %5226 = vmatpush1.bf16.msra.mxu1 %v5225_v55  ;;  %v5269_v25 = vpack.c.bf16 %v4603_v20, %v4601_v19  ;;  %v5271_v26 = vpack.c.bf16 %v4608_v23, %v4606_v22  ;;  %v4605_v27 = vld [vmem:[%s8824_s29 + $0x1c0] sm:$0xff]  ;;  %v4607_v28 = vld [vmem:[%s8824_s29 + $0x1d0] sm:$0xff]  ;;  %v4610_v29 = vld [vmem:[%s8824_s29 + $0x1e8] sm:$0xff] }
  0x1f   :  { %5228 = vmatprep.subr.bf16.mxu1 %v5227_v58  ;;  %5198 = vmatpush1.bf16.msra.mxu0 %v5197_v61  ;;  %v4612_v30 = vld [vmem:[%s8824_s29 + $0x1f8] sm:$0xff]  ;;  %v6359_v31 = vld [vmem:[%s8825_s25 + $0x10] sm:$0xff]  ;;  %v5273_v32 = vpack.c.bf16 %v4607_v28, %v4605_v27  ;;  %v4609_v34 = vld [vmem:[%s8824_s29 + $0x1e0] sm:$0xff] }
  0x20   :  { %5200 = vmatprep.subr.bf16.mxu0 %v5199_v0  ;;  %v5275_v33 = vpack.c.bf16 %v4612_v30, %v4610_v29  ;;  %v4611_v35 = vld [vmem:[%s8824_s29 + $0x1f0] sm:$0xff]  ;;  %v4614_v36 = vld [vmem:[%s8824_s29 + $0x208] sm:$0xff]  ;;  %v4616_v37 = vld [vmem:[%s8824_s29 + $0x218] sm:$0xff] }
  0x21   :  { %v6382_v38 = vld [vmem:[%s8825_s25 + $0x18] sm:$0xff]  ;;  %v5277_v39 = vpack.c.bf16 %v4611_v35, %v4609_v34  ;;  %v5279_v40 = vpack.c.bf16 %v4616_v37, %v4614_v36  ;;  %v4613_v41 = vld [vmem:[%s8824_s29 + $0x200] sm:$0xff]  ;;  %v4615_v42 = vld [vmem:[%s8824_s29 + $0x210] sm:$0xff] }
  0x22   :  { %5230 = vmatpush1.bf16.msra.mxu1 %v5229_v3  ;;  %v4618_v43 = vld [vmem:[%s8824_s29 + $0x228] sm:$0xff]  ;;  %v4620_v44 = vld [vmem:[%s8824_s29 + $0x238] sm:$0xff]  ;;  %v6405_v45 = vld [vmem:[%s8825_s25 + $0x20] sm:$0xff]  ;;  %v5281_v46 = vpack.c.bf16 %v4615_v42, %v4613_v41 }
  0x23   :  { %5264 = vmatprep.subr.bf16.mxu1 %v5263_v6  ;;  %5202 = vmatpush1.bf16.msra.mxu0 %v5201_v10  ;;  %v5283_v47 = vpack.c.bf16 %v4620_v44, %v4618_v43  ;;  %v4617_v48 = vld [vmem:[%s8824_s29 + $0x220] sm:$0xff]  ;;  %v4619_v49 = vld [vmem:[%s8824_s29 + $0x230] sm:$0xff]  ;;  %v4644_v50 = vld [vmem:[%s8824_s29 + $0x248] sm:$0xff] }
  0x24   :  { %5204 = vmatprep.subr.bf16.mxu0 %v5203_v13  ;;  %v4646_v51 = vld [vmem:[%s8824_s29 + $0x258] sm:$0xff] }
  0x25   :  { %4568 = vmatmul.mubr.msk.f32.vlgmr.msra.gmra.mrb[0].mxu1 %vm92_vm0, %v6319_v16 }
  0x26   :  { %332 = vmatprep.mubr.f32.mxu1 %v6053_v7  ;;  %5266 = vmatpush1.bf16.msra.mxu1 %v5265_v17 }
  0x27   :  { %5268 = vmatprep.subr.bf16.mxu1 %v5267_v18  ;;  %5206 = vmatpush1.bf16.msra.mxu0 %v5205_v21 }
  0x29   :  { %4569 = vmatmul.mubr.msk.f32.gmra.mrb[2].mxu1 %vm92_vm0, %v6339_v24 }
  0x2a   :  { %338 = vmatprep.mubr.f32.mxu1 %v6053_v7  ;;  %5270 = vmatpush1.bf16.msra.mxu1 %v5269_v25 }
  0x2b   :  { %4536 = vmatmul.mubr.msk.f32.vlgmr.msra.gmra.mrb[0].mxu0 %vm92_vm0, %v6319_v16  ;;  %5272 = vmatprep.subr.bf16.mxu1 %v5271_v26 }
  0x2c   :  { %187 = vmatprep.mubr.f32.mxu0 %v6053_v7 }
  0x2d   :  { %4570 = vmatmul.mubr.msk.f32.gmra.mrb[4].mxu1 %vm92_vm0, %v6359_v31 }
  0x2e   :  { %344 = vmatprep.mubr.f32.mxu1 %v6053_v7  ;;  %5274 = vmatpush1.bf16.msra.mxu1 %v5273_v32 }
  0x2f   :  { %4537 = vmatmul.mubr.msk.f32.gmra.mrb[2].mxu0 %vm92_vm0, %v6339_v24  ;;  %5276 = vmatprep.subr.bf16.mxu1 %v5275_v33 }
  0x30   :  { %193 = vmatprep.mubr.f32.mxu0 %v6053_v7 }
  0x31   :  { %4571 = vmatmul.mubr.msk.f32.gmra.mrb[6].mxu1 %vm92_vm0, %v6382_v38 }
  0x32   :  { %350 = vmatprep.mubr.f32.mxu1 %v6053_v7  ;;  %5278 = vmatpush1.bf16.msra.mxu1 %v5277_v39 }
  0x33   :  { %4538 = vmatmul.mubr.msk.f32.gmra.mrb[4].mxu0 %vm92_vm0, %v6359_v31  ;;  %5280 = vmatprep.subr.bf16.mxu1 %v5279_v40 }
  0x34   :  { %199 = vmatprep.mubr.f32.mxu0 %v6053_v7 }
  0x35   :  { %23 = vsyncpa [#allocation3], 0  ;;  %4572 = vmatmul.mubr.msk.f32.gmra.mrb[8].mxu1 %vm92_vm0, %v6405_v45  ;;  %v6428_v52 = vld [vmem:[%s8825_s25 + $0x28] sm:$0xff]  ;;  %v5285_v53 = vpack.c.bf16 %v4619_v49, %v4617_v48  ;;  %v5303_v54 = vpack.c.bf16 %v4646_v51, %v4644_v50  ;;  %v6439_v55 = vld [vmem:[%s8825_s25 + $0x30] sm:$0xff]  ;;  %s8826_s2 = sld [smem:[#allocation7_spill]]  ;;  %vm383_vm1 = vcmask 523264  }
  0x36   :  { %356 = vmatprep.mubr.f32.mxu1 %v6053_v7  ;;  %5282 = vmatpush1.bf16.msra.mxu1 %v5281_v46  ;;  %v6450_v56 = vld [vmem:[%s8825_s25 + $0x38] sm:$0xff]  ;;  %v4643_v57 = vld [vmem:[%s8824_s29 + $0x240] sm:$0xff]  ;;  %v4645_v58 = vld [vmem:[%s8824_s29 + $0x250] sm:$0xff]  ;;  %vm1614_vm4 = vcmask 326656  }
  0x37   :  { %4539 = vmatmul.mubr.msk.f32.gmra.mrb[6].mxu0 %vm92_vm0, %v6382_v38  ;;  %5284 = vmatprep.subr.bf16.mxu1 %v5283_v47  ;;  %v4648_v59 = vld [vmem:[%s8824_s29 + $0x268] sm:$0xff]  ;;  %v4650_v60 = vld [vmem:[%s8824_s29 + $0x278] sm:$0xff]  ;;  %v5305_v61 = vpack.c.bf16 %v4645_v58, %v4643_v57  ;;  %v4647_v63 = vld [vmem:[%s8824_s29 + $0x260] sm:$0xff] }
  0x38   :  { %205 = vmatprep.mubr.f32.mxu0 %v6053_v7  ;;  %v5307_v62 = vpack.c.bf16 %v4650_v60, %v4648_v59  ;;  %v4649_v0 = vld [vmem:[%s8824_s29 + $0x270] sm:$0xff]  ;;  %v4652_v1 = vld [vmem:[%s8824_s29 + $0x288] sm:$0xff]  ;;  %v4654_v2 = vld [vmem:[%s8824_s29 + $0x298] sm:$0xff] }
  0x39   :  { %4573 = vmatmul.mubr.msk.f32.gmra.mrb[10].mxu1 %vm92_vm0, %v6428_v52  ;;  %v5309_v3 = vpack.c.bf16 %v4649_v0, %v4647_v63  ;;  %v5311_v4 = vpack.c.bf16 %v4654_v2, %v4652_v1  ;;  %v4651_v5 = vld [vmem:[%s8824_s29 + $0x280] sm:$0xff]  ;;  %v4653_v6 = vld [vmem:[%s8824_s29 + $0x290] sm:$0xff]  ;;  %v4656_v8 = vld [vmem:[%s8824_s29 + $0x2a8] sm:$0xff] }
  0x3a   :  { %362 = vmatprep.mubr.f32.mxu1 %v6053_v7  ;;  %5286 = vmatpush1.bf16.msra.mxu1 %v5285_v53  ;;  %v4658_v9 = vld [vmem:[%s8824_s29 + $0x2b8] sm:$0xff]  ;;  %v5313_v10 = vpack.c.bf16 %v4653_v6, %v4651_v5  ;;  %v4655_v12 = vld [vmem:[%s8824_s29 + $0x2a0] sm:$0xff]  ;;  %v4657_v13 = vld [vmem:[%s8824_s29 + $0x2b0] sm:$0xff] }
  0x3b   :  { %4540 = vmatmul.mubr.msk.f32.gmra.mrb[8].mxu0 %vm92_vm0, %v6405_v45  ;;  %5304 = vmatprep.subr.bf16.mxu1 %v5303_v54  ;;  %v5315_v11 = vpack.c.bf16 %v4658_v9, %v4656_v8  ;;  %v4660_v14 = vld [vmem:[%s8824_s29 + $0x2c8] sm:$0xff]  ;;  %v4662_v15 = vld [vmem:[%s8824_s29 + $0x2d8] sm:$0xff]  ;;  %v5317_v17 = vpack.c.bf16 %v4657_v13, %v4655_v12  ;;  %v4659_v19 = vld [vmem:[%s8824_s29 + $0x2c0] sm:$0xff] }
  0x3c   :  { %211 = vmatprep.mubr.f32.mxu0 %v6053_v7  ;;  %v5319_v18 = vpack.c.bf16 %v4662_v15, %v4660_v14  ;;  %v4661_v20 = vld [vmem:[%s8824_s29 + $0x2d0] sm:$0xff]  ;;  %v4664_v21 = vld [vmem:[%s8824_s29 + $0x2e8] sm:$0xff]  ;;  %v4666_v22 = vld [vmem:[%s8824_s29 + $0x2f8] sm:$0xff] }
  0x3d   :  { %4574 = vmatmul.mubr.msk.f32.gmra.mrb[12].mxu1 %vm92_vm0, %v6439_v55  ;;  %v5321_v23 = vpack.c.bf16 %v4661_v20, %v4659_v19  ;;  %v5323_v25 = vpack.c.bf16 %v4666_v22, %v4664_v21  ;;  %v4663_v26 = vld [vmem:[%s8824_s29 + $0x2e0] sm:$0xff]  ;;  %v4665_v27 = vld [vmem:[%s8824_s29 + $0x2f0] sm:$0xff]  ;;  %v4690_v28 = vld [vmem:[%s8824_s29 + $0x308] sm:$0xff] }
  0x3e   :  { %368 = vmatprep.mubr.f32.mxu1 %v6053_v7  ;;  %v4692_v29 = vld [vmem:[%s8824_s29 + $0x318] sm:$0xff]  ;;  %v5325_v30 = vpack.c.bf16 %v4665_v27, %v4663_v26  ;;  %v4689_v33 = vld [vmem:[%s8824_s29 + $0x300] sm:$0xff]  ;;  %v4691_v34 = vld [vmem:[%s8824_s29 + $0x310] sm:$0xff] }
  0x3f   :  { %4541 = vmatmul.mubr.msk.f32.gmra.mrb[10].mxu0 %vm92_vm0, %v6428_v52  ;;  %v5343_v32 = vpack.c.bf16 %v4692_v29, %v4690_v28  ;;  %v4694_v35 = vld [vmem:[%s8824_s29 + $0x328] sm:$0xff]  ;;  %v4696_v36 = vld [vmem:[%s8824_s29 + $0x338] sm:$0xff]  ;;  %v5345_v37 = vpack.c.bf16 %v4691_v34, %v4689_v33  ;;  %v4693_v40 = vld [vmem:[%s8824_s29 + $0x320] sm:$0xff] }
  0x40   :  { %217 = vmatprep.mubr.f32.mxu0 %v6053_v7  ;;  %v5347_v39 = vpack.c.bf16 %v4696_v36, %v4694_v35  ;;  %v4695_v41 = vld [vmem:[%s8824_s29 + $0x330] sm:$0xff]  ;;  %v4698_v42 = vld [vmem:[%s8824_s29 + $0x348] sm:$0xff]  ;;  %v4700_v43 = vld [vmem:[%s8824_s29 + $0x358] sm:$0xff] }
  0x41   :  { %4575 = vmatmul.mubr.msk.f32.gmra.mrb[14].mxu1 %vm92_vm0, %v6450_v56  ;;  %v5349_v44 = vpack.c.bf16 %v4695_v41, %v4693_v40  ;;  %v5351_v46 = vpack.c.bf16 %v4700_v43, %v4698_v42  ;;  %v4697_v47 = vld [vmem:[%s8824_s29 + $0x340] sm:$0xff]  ;;  %v4699_v48 = vld [vmem:[%s8824_s29 + $0x350] sm:$0xff]  ;;  %v4702_v49 = vld [vmem:[%s8824_s29 + $0x368] sm:$0xff] }
  0x42   :  { %729 = vmatprep.mubr.f32.mxu1 %v6053_v7  ;;  %v4704_v50 = vld [vmem:[%s8824_s29 + $0x378] sm:$0xff]  ;;  %v5353_v51 = vpack.c.bf16 %v4699_v48, %v4697_v47  ;;  %v4701_v54 = vld [vmem:[%s8824_s29 + $0x360] sm:$0xff]  ;;  %v4703_v57 = vld [vmem:[%s8824_s29 + $0x370] sm:$0xff] }
  0x43   :  { %4542 = vmatmul.mubr.msk.f32.gmra.mrb[12].mxu0 %vm92_vm0, %v6439_v55  ;;  %v5355_v53 = vpack.c.bf16 %v4704_v50, %v4702_v49  ;;  %v4706_v58 = vld [vmem:[%s8824_s29 + $0x388] sm:$0xff]  ;;  %v4708_v59 = vld [vmem:[%s8824_s29 + $0x398] sm:$0xff]  ;;  %v5357_v60 = vpack.c.bf16 %v4703_v57, %v4701_v54  ;;  %v4707_v63 = vld [vmem:[%s8824_s29 + $0x390] sm:$0xff] }
  0x44   :  { %223 = vmatprep.mubr.f32.mxu0 %v6053_v7  ;;  %v4710_v0 = vld [vmem:[%s8824_s29 + $0x3a8] sm:$0xff]  ;;  %v4712_v1 = vld [vmem:[%s8824_s29 + $0x3b8] sm:$0xff]  ;;  %v4711_v5 = vld [vmem:[%s8824_s29 + $0x3b0] sm:$0xff] }
  0x45   :  { %4621 = vmatmul.mubr.msk.f32.vlgmr.msra.gmra.mrb[16].mxu1 %vm92_vm0, %v6319_v16  ;;  %v4576_v50 = vld [vmem:[%s8826_s2 + $0x38] sm:$0xff] }
  0x46   :  { %735 = vmatprep.mubr.f32.mxu1 %v6053_v7  ;;  %5306 = vmatpush1.bf16.msra.mxu1 %v5305_v61  ;;  %v5359_v61 = vpack.c.bf16 %v4708_v59, %v4706_v58 }
  0x47   :  { %4543 = vmatmul.mubr.msk.f32.gmra.mrb[14].mxu0 %vm92_vm0, %v6450_v56  ;;  %5308 = vmatprep.subr.bf16.mxu1 %v5307_v62  ;;  %v4705_v62 = vld [vmem:[%s8824_s29 + $0x380] sm:$0xff] }
  0x48   :  { %469 = vmatprep.mubr.f32.mxu0 %v6053_v7  ;;  %v5361_v2 = vpack.c.bf16 %v4707_v63, %v4705_v62 }
  0x49   :  { %4622 = vmatmul.mubr.msk.f32.gmra.mrb[18].mxu1 %vm92_vm0, %v6339_v24 }
  0x4a   :  { %741 = vmatprep.mubr.f32.mxu1 %v6053_v7  ;;  %5310 = vmatpush1.bf16.msra.mxu1 %v5309_v3  ;;  %v5363_v3 = vpack.c.bf16 %v4712_v1, %v4710_v0  ;;  %v4578_v1 = vld [vmem:[%s8826_s2 + $0x48] sm:$0xff] }
  0x4b   :  { %5312 = vmatprep.subr.bf16.mxu1 %v5311_v4  ;;  %v4709_v4 = vld [vmem:[%s8824_s29 + $0x3a0] sm:$0xff] }
  0x4c   :  { %v5365_v6 = vpack.c.bf16 %v4711_v5, %v4709_v4  ;;  %v1573_v5 = vld [vmem:[%s8803_s4 + $0x8] sm:$0xff] }
  0x4d   :  { %4623 = vmatmul.mubr.msk.f32.gmra.mrb[20].mxu1 %vm92_vm0, %v6359_v31 }
  0x4e   :  { %747 = vmatprep.mubr.f32.mxu1 %v6053_v7  ;;  %5314 = vmatpush1.bf16.msra.mxu1 %v5313_v10 }
  0x4f   :  { %5316 = vmatprep.subr.bf16.mxu1 %v5315_v11 }
  0x51   :  { %4624 = vmatmul.mubr.msk.f32.gmra.mrb[22].mxu1 %vm92_vm0, %v6382_v38 }
  0x52   :  { %753 = vmatprep.mubr.f32.mxu1 %v6053_v7  ;;  %5318 = vmatpush1.bf16.msra.mxu1 %v5317_v17 }
  0x53   :  { %5320 = vmatprep.subr.bf16.mxu1 %v5319_v18 }
  0x55   :  { %4625 = vmatmul.mubr.msk.f32.gmra.mrb[24].mxu1 %vm92_vm0, %v6405_v45 }
  0x56   :  { %759 = vmatprep.mubr.f32.mxu1 %v6053_v7  ;;  %5322 = vmatpush1.bf16.msra.mxu1 %v5321_v23 }
  0x57   :  { %5324 = vmatprep.subr.bf16.mxu1 %v5323_v25 }
  0x59   :  { %4626 = vmatmul.mubr.msk.f32.gmra.mrb[26].mxu1 %vm92_vm0, %v6428_v52 }
  0x5a   :  { %765 = vmatprep.mubr.f32.mxu1 %v6053_v7  ;;  %5326 = vmatpush1.bf16.msra.mxu1 %v5325_v30 }
  0x5b   :  { %5344 = vmatprep.subr.bf16.mxu1 %v5343_v32 }
  0x5d   :  { %4627 = vmatmul.mubr.msk.f32.gmra.mrb[28].mxu1 %vm92_vm0, %v6439_v55 }
  0x5e   :  { %771 = vmatprep.mubr.f32.mxu1 %v6053_v7 }
  0x61   :  { %4628 = vmatmul.mubr.msk.f32.gmra.mrb[30].mxu1 %vm92_vm0, %v6450_v56 }
  0x62   :  { %1017 = vmatprep.mubr.f32.mxu1 %v6053_v7 }
  0x65   :  { %4667 = vmatmul.mubr.msk.f32.vlgmr.msra.gmra.mrb[32].mxu1 %vm92_vm0, %v6319_v16 }
  0x66   :  { %1023 = vmatprep.mubr.f32.mxu1 %v6053_v7  ;;  %5346 = vmatpush1.bf16.msra.mxu1 %v5345_v37 }
  0x67   :  { %5348 = vmatprep.subr.bf16.mxu1 %v5347_v39 }
  0x69   :  { %4668 = vmatmul.mubr.msk.f32.gmra.mrb[34].mxu1 %vm92_vm0, %v6339_v24 }
  0x6a   :  { %1029 = vmatprep.mubr.f32.mxu1 %v6053_v7  ;;  %5350 = vmatpush1.bf16.msra.mxu1 %v5349_v44 }
  0x6b   :  { %5352 = vmatprep.subr.bf16.mxu1 %v5351_v46 }
  0x6d   :  { %4669 = vmatmul.mubr.msk.f32.gmra.mrb[36].mxu1 %vm92_vm0, %v6359_v31 }
  0x6e   :  { %1035 = vmatprep.mubr.f32.mxu1 %v6053_v7  ;;  %5354 = vmatpush1.bf16.msra.mxu1 %v5353_v51 }
  0x6f   :  { %5356 = vmatprep.subr.bf16.mxu1 %v5355_v53 }
  0x71   :  { %4670 = vmatmul.mubr.msk.f32.gmra.mrb[38].mxu1 %vm92_vm0, %v6382_v38 }
  0x72   :  { %1041 = vmatprep.mubr.f32.mxu1 %v6053_v7  ;;  %5358 = vmatpush1.bf16.msra.mxu1 %v5357_v60  ;;  %v4577_v60 = vld [vmem:[%s8826_s2 + $0x40] sm:$0xff] }
  0x73   :  { %5360 = vmatprep.subr.bf16.mxu1 %v5359_v61 }
  0x75   :  { %4671 = vmatmul.mubr.msk.f32.gmra.mrb[40].mxu1 %vm92_vm0, %v6405_v45 }
  0x76   :  { %1047 = vmatprep.mubr.f32.mxu1 %v6053_v7  ;;  %5362 = vmatpush1.bf16.msra.mxu1 %v5361_v2 }
  0x77   :  { %5364 = vmatprep.subr.bf16.mxu1 %v5363_v3  ;;  %v4579_v3 = vld [vmem:[%s8826_s2 + $0x50] sm:$0xff] }
  0x79   :  { %4672 = vmatmul.mubr.msk.f32.gmra.mrb[42].mxu1 %vm92_vm0, %v6428_v52 }
  0x7a   :  { %1053 = vmatprep.mubr.f32.mxu1 %v6053_v7  ;;  %5366 = vmatpush1.bf16.msra.mxu1 %v5365_v6  ;;  %v1575_v6 = vld [vmem:[%s8803_s4 + $0x18] sm:$0xff] }
  0x7d   :  { %4673 = vmatmul.mubr.msk.f32.gmra.mrb[44].mxu1 %vm92_vm0, %v6439_v55 }
  0x7e   :  { %1059 = vmatprep.mubr.f32.mxu1 %v6053_v7 }
  0x81   :  { %4674 = vmatmul.mubr.msk.f32.gmra.mrb[46].mxu1 %vm92_vm0, %v6450_v56 }
  0x82   :  { %1305 = vmatprep.mubr.f32.mxu1 %v6053_v7 }
  0x85   :  { %4713 = vmatmul.mubr.msk.f32.vlgmr.msra.gmra.mrb[48].mxu1 %vm92_vm0, %v6319_v16 }
  0x86   :  { %1311 = vmatprep.mubr.f32.mxu1 %v6053_v7 }
  0x89   :  { %4714 = vmatmul.mubr.msk.f32.gmra.mrb[50].mxu1 %vm92_vm0, %v6339_v24 }
  0x8a   :  { %1317 = vmatprep.mubr.f32.mxu1 %v6053_v7 }
  0x8d   :  { %4715 = vmatmul.mubr.msk.f32.gmra.mrb[52].mxu1 %vm92_vm0, %v6359_v31 }
  0x8e   :  { %1323 = vmatprep.mubr.f32.mxu1 %v6053_v7 }
  0x91   :  { %4716 = vmatmul.mubr.msk.f32.gmra.mrb[54].mxu1 %vm92_vm0, %v6382_v38 }
  0x92   :  { %1329 = vmatprep.mubr.f32.mxu1 %v6053_v7 }
  0x95   :  { %4717 = vmatmul.mubr.msk.f32.gmra.mrb[56].mxu1 %vm92_vm0, %v6405_v45 }
  0x96   :  { %1335 = vmatprep.mubr.f32.mxu1 %v6053_v7 }
  0x99   :  { %4718 = vmatmul.mubr.msk.f32.gmra.mrb[58].mxu1 %vm92_vm0, %v6428_v52 }
  0x9a   :  { %1341 = vmatprep.mubr.f32.mxu1 %v6053_v7 }
  0x9d   :  { %4719 = vmatmul.mubr.msk.f32.gmra.mrb[60].mxu1 %vm92_vm0, %v6439_v55 }
  0x9e   :  { %1347 = vmatprep.mubr.f32.mxu1 %v6053_v7 }
  0xa1   :  { %4720 = vmatmul.mubr.msk.f32.gmra.mrb[62].mxu1 %vm92_vm0, %v6450_v56 }
  0xf8   :  { %v328_v16 = vpop.f32.mrb[0].mxu1 }
  0xf9   :  { %v330_v24 = vpop.f32.mrb[1].mxu1 }
  0xfc   :  { %v334_v31 = vpop.f32.mrb[2].mxu1 }
  0xfd   :  { %v5233_v38 = vpack.c.bf16 %v334_v31, %v328_v16  ;;  %v336_v45 = vpop.f32.mrb[3].mxu1  ;;  %v1572_v16 = vld [vmem:[%s8803_s4] sm:$0xff] }
  0xfe   :  { %v5231_v8 = vpack.c.bf16 %v336_v45, %v330_v24  ;;  %v183_v9 = vpop.f32.mrb[0].mxu0  ;;  %v1574_v45 = vld [vmem:[%s8803_s4 + $0x10] sm:$0xff] }
  0xff   :  { %v185_v10 = vpop.f32.mrb[1].mxu0 }
 0x100   :  { %v340_v11 = vpop.f32.mrb[4].mxu1  ;;  %5232 = vmatprep.subr.bf16.mxu0 %v5231_v8  ;;  %v1577_v8 = vld [vmem:[%s8803_s4 + $0x28] sm:$0xff] }
 0x101   :  { %v342_v52 = vpop.f32.mrb[5].mxu1  ;;  %5234 = vmatpush1.bf16.msra.mxu0 %v5233_v38  ;;  %v5383_v38 = vpack.c.bf16 %v1575_v6, %v1573_v5  ;;  %v231_v6 = vld [vmem:[%s8826_s2 + $0x8] sm:$0xff] }
 0x102   :  { %v189_v12 = vpop.f32.mrb[2].mxu0 }
 0x103   :  { %v5249_v13 = vpack.c.bf16 %v189_v12, %v183_v9  ;;  %v191_v55 = vpop.f32.mrb[3].mxu0  ;;  %v1579_v9 = vld [vmem:[%s8803_s4 + $0x38] sm:$0xff]  ;;  %v1576_v12 = vld [vmem:[%s8803_s4 + $0x20] sm:$0xff]  ;;  %5384 = vmatprep.subr.bf16.mxu1 %v5383_v38 }
 0x104   :  { %v346_v14 = vpop.f32.mrb[6].mxu1  ;;  %v5247_v15 = vpack.c.bf16 %v191_v55, %v185_v10  ;;  %v1581_v55 = vld [vmem:[%s8803_s4 + $0x48] sm:$0xff]  ;;  %v1596_v38 = vld [vmem:[%s8803_s4 + $0xc0] sm:$0xff] }
 0x105   :  { %v5237_v17 = vpack.c.bf16 %v346_v14, %v340_v11  ;;  %v348_v18 = vpop.f32.mrb[7].mxu1  ;;  %v5385_v11 = vpack.c.bf16 %v1574_v45, %v1572_v16  ;;  %v1583_v14 = vld [vmem:[%s8803_s4 + $0x58] sm:$0xff]  ;;  %v1598_v45 = vld [vmem:[%s8803_s4 + $0xd0] sm:$0xff] }
 0x106   :  { %v5235_v56 = vpack.c.bf16 %v348_v18, %v342_v52  ;;  %v195_v19 = vpop.f32.mrb[4].mxu0  ;;  %v5387_v52 = vpack.c.bf16 %v1579_v9, %v1577_v8  ;;  %v4580_v18 = vld [vmem:[%s8826_s2 + $0x58] sm:$0xff]  ;;  %v5409_v9 = vpack.c.bf16 %v1598_v45, %v1596_v38 }
 0x107   :  { %v197_v20 = vpop.f32.mrb[5].mxu0  ;;  %5386 = vmatpush1.bf16.msra.mxu1 %v5385_v11  ;;  %v1600_v11 = vld [vmem:[%s8803_s4 + $0xe0] sm:$0xff] }
 0x108   :  { %v352_v21 = vpop.f32.mrb[8].mxu1  ;;  %5236 = vmatprep.subr.bf16.mxu0 %v5235_v56  ;;  %5388 = vmatprep.subr.bf16.mxu1 %v5387_v52  ;;  %v1602_v52 = vld [vmem:[%s8803_s4 + $0xf0] sm:$0xff] }
 0x109   :  { %v354_v22 = vpop.f32.mrb[9].mxu1  ;;  %5238 = vmatpush1.bf16.msra.mxu0 %v5237_v17 }
 0x10a   :  { %v201_v23 = vpop.f32.mrb[6].mxu0 }
 0x10b   :  { %v5253_v25 = vpack.c.bf16 %v201_v23, %v195_v19  ;;  %v203_v26 = vpop.f32.mrb[7].mxu0  ;;  %v5391_v19 = vpack.c.bf16 %v1583_v14, %v1581_v55  ;;  %v1587_v23 = vld [vmem:[%s8803_s4 + $0x78] sm:$0xff]  ;;  %v5413_v55 = vpack.c.bf16 %v1602_v52, %v1600_v11 }
 0x10c   :  { %v358_v27 = vpop.f32.mrb[10].mxu1  ;;  %v5251_v28 = vpack.c.bf16 %v203_v26, %v197_v20  ;;  %v1580_v20 = vld [vmem:[%s8803_s4 + $0x40] sm:$0xff]  ;;  %v233_v14 = vld [vmem:[%s8826_s2 + $0x18] sm:$0xff] }
 0x10d   :  { %v5241_v29 = vpack.c.bf16 %v358_v27, %v352_v21  ;;  %v360_v30 = vpop.f32.mrb[11].mxu1  ;;  %v1582_v21 = vld [vmem:[%s8803_s4 + $0x50] sm:$0xff]  ;;  %v4581_v27 = vld [vmem:[%s8826_s2 + $0x60] sm:$0xff]  ;;  %v4677_v11 = vld [vmem:[%s8826_s2 + $0xb8] sm:$0xff] }
 0x10e   :  { %v5239_v32 = vpack.c.bf16 %v360_v30, %v354_v22  ;;  %v207_v33 = vpop.f32.mrb[8].mxu0  ;;  %v1585_v22 = vld [vmem:[%s8803_s4 + $0x68] sm:$0xff]  ;;  %v5393_v26 = vpack.c.bf16 %v1582_v21, %v1580_v20  ;;  %v234_v21 = vld [vmem:[%s8826_s2 + $0x20] sm:$0xff] }
 0x10f   :  { %v209_v34 = vpop.f32.mrb[9].mxu0  ;;  %v5395_v30 = vpack.c.bf16 %v1587_v23, %v1585_v22 }
 0x110   :  { %v364_v35 = vpop.f32.mrb[12].mxu1  ;;  %5240 = vmatprep.subr.bf16.mxu0 %v5239_v32  ;;  %v1584_v32 = vld [vmem:[%s8803_s4 + $0x60] sm:$0xff] }
 0x111   :  { %v366_v36 = vpop.f32.mrb[13].mxu1  ;;  %5242 = vmatpush1.bf16.msra.mxu0 %v5241_v29 }
 0x112   :  { %v213_v37 = vpop.f32.mrb[10].mxu0 }
 0x113   :  { %v5257_v39 = vpack.c.bf16 %v213_v37, %v207_v33  ;;  %v215_v40 = vpop.f32.mrb[11].mxu0  ;;  %v1586_v33 = vld [vmem:[%s8803_s4 + $0x70] sm:$0xff] }
 0x114   :  { %v370_v41 = vpop.f32.mrb[14].mxu1  ;;  %v5255_v42 = vpack.c.bf16 %v215_v40, %v209_v34  ;;  %v4582_v40 = vld [vmem:[%s8826_s2 + $0x68] sm:$0xff] }
 0x115   :  { %v5245_v43 = vpack.c.bf16 %v370_v41, %v364_v35  ;;  %v372_v44 = vpop.f32.mrb[15].mxu1  ;;  %v1589_v35 = vld [vmem:[%s8803_s4 + $0x88] sm:$0xff] }
 0x116   :  { %v5243_v46 = vpack.c.bf16 %v372_v44, %v366_v36  ;;  %v219_v47 = vpop.f32.mrb[12].mxu0  ;;  %v1591_v36 = vld [vmem:[%s8803_s4 + $0x98] sm:$0xff]  ;;  %v1590_v44 = vld [vmem:[%s8803_s4 + $0x90] sm:$0xff] }
 0x117   :  { %v221_v48 = vpop.f32.mrb[13].mxu0 }
 0x118   :  { %5244 = vmatprep.subr.bf16.mxu0 %v5243_v46  ;;  %v6673_v49 = vpop.f32.mrb[16].mxu1  ;;  %v1593_v46 = vld [vmem:[%s8803_s4 + $0xa8] sm:$0xff] }
 0x119   :  { %5246 = vmatpush1.bf16.msra.mxu0 %v5245_v43  ;;  %v733_v51 = vpop.f32.mrb[17].mxu1  ;;  %v1588_v43 = vld [vmem:[%s8803_s4 + $0x80] sm:$0xff] }
 0x11a   :  { %5248 = vmatprep.subr.bf16.mxu0 %v5247_v15  ;;  %v225_v53 = vpop.f32.mrb[14].mxu0 }
 0x11b   :  { %v5261_v54 = vpack.c.bf16 %v225_v53, %v219_v47  ;;  %v227_v57 = vpop.f32.mrb[15].mxu0  ;;  %v1595_v47 = vld [vmem:[%s8803_s4 + $0xb8] sm:$0xff] }
 0x11c   :  { %4583 = vmatmul.mubr.msk.f32.vlgmr.msra.gmra.mrb[16].mxu0 %vm383_vm1, %v4576_v50  ;;  %v5259_v58 = vpack.c.bf16 %v227_v57, %v221_v48  ;;  %v6679_v59 = vpop.f32.mrb[18].mxu1  ;;  %v5401_v50 = vpack.c.bf16 %v1590_v44, %v1588_v43  ;;  %v1592_v57 = vld [vmem:[%s8803_s4 + $0xa0] sm:$0xff] }
 0x11d   :  { %5250 = vmatpush1.bf16.msra.mxu0 %v5249_v13  ;;  %475 = vmatprep.mubr.f32.mxu0 %v6053_v7  ;;  %v5289_v61 = vpack.c.bf16 %v6679_v59, %v6673_v49  ;;  %v739_v62 = vpop.f32.mrb[19].mxu1  ;;  %v1578_v13 = vld [vmem:[%s8803_s4 + $0x30] sm:$0xff]  ;;  %v1601_v59 = vld [vmem:[%s8803_s4 + $0xe8] sm:$0xff] }
 0x11e   :  { %5252 = vmatprep.subr.bf16.mxu0 %v5251_v28  ;;  %v5287_v63 = vpack.c.bf16 %v739_v62, %v733_v51  ;;  %v5389_v17 = vpack.c.bf16 %v1578_v13, %v1576_v12  ;;  %v230_v51 = vld [vmem:[%s8826_s2] sm:$0xff]  ;;  %v5403_v62 = vpack.c.bf16 %v1595_v47, %v1593_v46  ;;  %v1607_v12 = vld [vmem:[%s8803_s4 + $0x118] sm:$0xff] }
 0x11f   :  { %v4631_v46 = vld [vmem:[%s8826_s2 + $0x80] sm:$0xff] }
 0x120   :  { %4584 = vmatmul.mubr.msk.f32.gmra.mrb[18].mxu0 %vm383_vm1, %v4577_v60  ;;  %v6688_v0 = vpop.f32.mrb[20].mxu1  ;;  %5390 = vmatpush1.bf16.msra.mxu1 %v5389_v17 }
 0x121   :  { %5254 = vmatpush1.bf16.msra.mxu0 %v5253_v25  ;;  %481 = vmatprep.mubr.f32.mxu0 %v6053_v7  ;;  %v6694_v2 = vpop.f32.mrb[21].mxu1 }
 0x122   :  { %5256 = vmatprep.subr.bf16.mxu0 %v5255_v42  ;;  %5392 = vmatprep.subr.bf16.mxu1 %v5391_v19  ;;  %v5399_v42 = vpack.c.bf16 %v1591_v36, %v1589_v35  ;;  %v4629_v36 = vld [vmem:[%s8826_s2 + $0x70] sm:$0xff] }
 0x124   :  { %4585 = vmatmul.mubr.msk.f32.gmra.mrb[20].mxu0 %vm383_vm1, %v4578_v1  ;;  %v6700_v4 = vpop.f32.mrb[22].mxu1  ;;  %5394 = vmatpush1.bf16.msra.mxu1 %v5393_v26  ;;  %v1599_v1 = vld [vmem:[%s8803_s4 + $0xd8] sm:$0xff] }
 0x125   :  { %5258 = vmatpush1.bf16.msra.mxu0 %v5257_v39  ;;  %487 = vmatprep.mubr.f32.mxu0 %v6053_v7  ;;  %v5293_v24 = vpack.c.bf16 %v6700_v4, %v6688_v0  ;;  %v6714_v31 = vpop.f32.mrb[23].mxu1  ;;  %v5397_v39 = vpack.c.bf16 %v1586_v33, %v1584_v32 }
 0x126   :  { %5260 = vmatprep.subr.bf16.mxu0 %v5259_v58  ;;  %v5291_v10 = vpack.c.bf16 %v6714_v31, %v6694_v2  ;;  %5396 = vmatprep.subr.bf16.mxu1 %v5395_v30  ;;  %v1594_v58 = vld [vmem:[%s8803_s4 + $0xb0] sm:$0xff] }
 0x127   :  { %v5405_v5 = vpack.c.bf16 %v1594_v58, %v1592_v57  ;;  %v232_v2 = vld [vmem:[%s8826_s2 + $0x10] sm:$0xff] }
 0x128   :  { %4586 = vmatmul.mubr.msk.f32.gmra.mrb[22].mxu0 %vm383_vm1, %v4579_v3  ;;  %v6740_v15 = vpop.f32.mrb[24].mxu1  ;;  %5398 = vmatpush1.bf16.msra.mxu1 %v5397_v39  ;;  %v236_v30 = vld [vmem:[%s8826_s2 + $0x30] sm:$0xff] }
 0x129   :  { %5262 = vmatpush1.bf16.msra.mxu0 %v5261_v54  ;;  %493 = vmatprep.mubr.f32.mxu0 %v6053_v7  ;;  %v6746_v56 = vpop.f32.mrb[25].mxu1  ;;  %v4633_v58 = vld [vmem:[%s8826_s2 + $0x90] sm:$0xff] }
 0x12a   :  { %5288 = vmatprep.subr.bf16.mxu0 %v5287_v63  ;;  %5400 = vmatprep.subr.bf16.mxu1 %v5399_v42  ;;  %v1597_v63 = vld [vmem:[%s8803_s4 + $0xc8] sm:$0xff] }
 0x12b   :  { %v5407_v49 = vpack.c.bf16 %v1599_v1, %v1597_v63  ;;  %v4634_v63 = vld [vmem:[%s8826_s2 + $0x98] sm:$0xff] }
 0x12c   :  { %4587 = vmatmul.mubr.msk.f32.gmra.mrb[24].mxu0 %vm383_vm1, %v4580_v18  ;;  %v6761_v25 = vpop.f32.mrb[26].mxu1  ;;  %5402 = vmatpush1.bf16.msra.mxu1 %v5401_v50  ;;  %v1604_v18 = vld [vmem:[%s8803_s4 + $0x100] sm:$0xff]  ;;  %v4632_v50 = vld [vmem:[%s8826_s2 + $0x88] sm:$0xff] }
 0x12d   :  { %499 = vmatprep.mubr.f32.mxu0 %v6053_v7  ;;  %v5297_v28 = vpack.c.bf16 %v6761_v25, %v6740_v15  ;;  %v763_v29 = vpop.f32.mrb[27].mxu1  ;;  %5404 = vmatprep.subr.bf16.mxu1 %v5403_v62 }
 0x12e   :  { %v5295_v34 = vpack.c.bf16 %v763_v29, %v6746_v56  ;;  %v1606_v56 = vld [vmem:[%s8803_s4 + $0x110] sm:$0xff] }
 0x12f   :  { %v5417_v20 = vpack.c.bf16 %v1606_v56, %v1604_v18  ;;  %v4723_v18 = vld [vmem:[%s8826_s2 + $0xf0] sm:$0xff]  ;;  %v4724_v56 = vld [vmem:[%s8826_s2 + $0xf8] sm:$0xff] }
 0x130   :  { %4588 = vmatmul.mubr.msk.f32.gmra.mrb[26].mxu0 %vm383_vm1, %v4581_v27  ;;  %v6783_v37 = vpop.f32.mrb[28].mxu1  ;;  %5406 = vmatpush1.bf16.msra.mxu1 %v5405_v5  ;;  %v235_v27 = vld [vmem:[%s8826_s2 + $0x28] sm:$0xff] }
 0x131   :  { %505 = vmatprep.mubr.f32.mxu0 %v6053_v7  ;;  %v6789_v41 = vpop.f32.mrb[29].mxu1  ;;  %5408 = vmatprep.subr.bf16.mxu1 %v5407_v49  ;;  %v4675_v49 = vld [vmem:[%s8826_s2 + $0xa8] sm:$0xff] }
 0x134   :  { %4589 = vmatmul.mubr.msk.f32.gmra.mrb[28].mxu0 %vm383_vm1, %v4582_v40  ;;  %v6804_v48 = vpop.f32.mrb[30].mxu1  ;;  %5410 = vmatpush1.bf16.msra.mxu1 %v5409_v9  ;;  %v4630_v40 = vld [vmem:[%s8826_s2 + $0x78] sm:$0xff] }
 0x135   :  { %597 = vmatprep.mubr.f32.mxu0 %v6053_v7  ;;  %v5301_v53 = vpack.c.bf16 %v6804_v48, %v6783_v37  ;;  %v775_v54 = vpop.f32.mrb[31].mxu1 }
 0x136   :  { %v5299_v60 = vpack.c.bf16 %v775_v54, %v6789_v41 }
 0x138   :  { %4590 = vmatmul.mubr.msk.f32.vlgmr.msra.gmra.mrb[16].mxu0 %vm383_vm1, %v230_v51  ;;  %v6826_v3 = vpop.f32.mrb[32].mxu1 }
 0x139   :  { %5290 = vmatpush1.bf16.msra.mxu0 %v5289_v61  ;;  %603 = vmatprep.mubr.f32.mxu0 %v6053_v7  ;;  %v1021_v16 = vpop.f32.mrb[33].mxu1  ;;  %v1603_v61 = vld [vmem:[%s8803_s4 + $0xf8] sm:$0xff] }
 0x13a   :  { %5292 = vmatprep.subr.bf16.mxu0 %v5291_v10  ;;  %v5411_v4 = vpack.c.bf16 %v1603_v61, %v1601_v59 }
 0x13c   :  { %4591 = vmatmul.mubr.msk.f32.gmra.mrb[18].mxu0 %vm383_vm1, %v231_v6  ;;  %v1025_v8 = vpop.f32.mrb[34].mxu1  ;;  %5412 = vmatprep.subr.bf16.mxu1 %v5411_v4 }
 0x13d   :  { %5294 = vmatpush1.bf16.msra.mxu0 %v5293_v24  ;;  %609 = vmatprep.mubr.f32.mxu0 %v6053_v7  ;;  %v5329_v31 = vpack.c.bf16 %v1025_v8, %v6826_v3  ;;  %v1027_v10 = vpop.f32.mrb[35].mxu1  ;;  %v1605_v24 = vld [vmem:[%s8803_s4 + $0x108] sm:$0xff] }
 0x13e   :  { %5296 = vmatprep.subr.bf16.mxu0 %v5295_v34  ;;  %v5327_v0 = vpack.c.bf16 %v1027_v10, %v1021_v16  ;;  %v5415_v19 = vpack.c.bf16 %v1607_v12, %v1605_v24  ;;  %5414 = vmatpush1.bf16.msra.mxu1 %v5413_v55  ;;  %v4635_v16 = vld [vmem:[%s8826_s2 + $0xa0] sm:$0xff]  ;;  %v4679_v12 = vld [vmem:[%s8826_s2 + $0xc8] sm:$0xff]  ;;  %v4681_v55 = vld [vmem:[%s8826_s2 + $0xd8] sm:$0xff] }
 0x13f   :  { %v4678_v24 = vld [vmem:[%s8826_s2 + $0xc0] sm:$0xff] }
 0x140   :  { %4592 = vmatmul.mubr.msk.f32.gmra.mrb[20].mxu0 %vm383_vm1, %v232_v2  ;;  %v1031_v13 = vpop.f32.mrb[36].mxu1  ;;  %5416 = vmatprep.subr.bf16.mxu1 %v5415_v19  ;;  %v4676_v2 = vld [vmem:[%s8826_s2 + $0xb0] sm:$0xff]  ;;  %v4725_v19 = vld [vmem:[%s8826_s2 + $0x100] sm:$0xff] }
 0x141   :  { %5298 = vmatpush1.bf16.msra.mxu0 %v5297_v28  ;;  %615 = vmatprep.mubr.f32.mxu0 %v6053_v7  ;;  %v1033_v17 = vpop.f32.mrb[37].mxu1 }
 0x142   :  { %5300 = vmatprep.subr.bf16.mxu0 %v5299_v60  ;;  %5418 = vmatpush1.bf16.msra.mxu1 %v5417_v20  ;;  %v4727_v20 = vld [vmem:[%s8826_s2 + $0x110] sm:$0xff] }
 0x144   :  { %4593 = vmatmul.mubr.msk.f32.gmra.mrb[22].mxu0 %vm383_vm1, %v233_v14  ;;  %v1037_v15 = vpop.f32.mrb[38].mxu1  ;;  %v4721_v14 = vld [vmem:[%s8826_s2 + $0xe0] sm:$0xff] }
 0x145   :  { %5302 = vmatpush1.bf16.msra.mxu0 %v5301_v53  ;;  %621 = vmatprep.mubr.f32.mxu0 %v6053_v7  ;;  %v5333_v22 = vpack.c.bf16 %v1037_v15, %v1031_v13  ;;  %v1039_v23 = vpop.f32.mrb[39].mxu1  ;;  %v4680_v13 = vld [vmem:[%s8826_s2 + $0xd0] sm:$0xff]  ;;  %v4726_v15 = vld [vmem:[%s8826_s2 + $0x108] sm:$0xff] }
 0x146   :  { %5328 = vmatprep.subr.bf16.mxu0 %v5327_v0  ;;  %v5331_v25 = vpack.c.bf16 %v1039_v23, %v1033_v17  ;;  %v4722_v17 = vld [vmem:[%s8826_s2 + $0xe8] sm:$0xff] }
 0x148   :  { %4594 = vmatmul.mubr.msk.f32.gmra.mrb[24].mxu0 %vm383_vm1, %v234_v21  ;;  %v1043_v26 = vpop.f32.mrb[40].mxu1  ;;  %v1609_v21 = vld [vmem:[%s8803_s4 + $0x128] sm:$0xff] }
 0x149   :  { %627 = vmatprep.mubr.f32.mxu0 %v6053_v7  ;;  %v1045_v28 = vpop.f32.mrb[41].mxu1 }
 0x14c   :  { %4595 = vmatmul.mubr.msk.f32.gmra.mrb[26].mxu0 %vm383_vm1, %v235_v27  ;;  %v1049_v29 = vpop.f32.mrb[42].mxu1 }
 0x14d   :  { %633 = vmatprep.mubr.f32.mxu0 %v6053_v7  ;;  %v5337_v32 = vpack.c.bf16 %v1049_v29, %v1043_v26  ;;  %v1051_v33 = vpop.f32.mrb[43].mxu1  ;;  %v1610_v26 = vld [vmem:[%s8803_s4 + $0x130] sm:$0xff]  ;;  %v1612_v29 = vld [vmem:[%s8803_s4 + $0x140] sm:$0xff] }
 0x14e   :  { %v5335_v34 = vpack.c.bf16 %v1051_v33, %v1045_v28  ;;  %v1613_v28 = vld [vmem:[%s8803_s4 + $0x148] sm:$0xff] }
 0x150   :  { %4596 = vmatmul.mubr.msk.f32.gmra.mrb[28].mxu0 %vm383_vm1, %v236_v30  ;;  %v1055_v35 = vpop.f32.mrb[44].mxu1  ;;  %v1506_v30 = vlaneseq }
 0x151   :  { %871 = vmatprep.mubr.f32.mxu0 %v6053_v7  ;;  %v1057_v37 = vpop.f32.mrb[45].mxu1 }
 0x154   :  { %4636 = vmatmul.mubr.msk.f32.vlgmr.msra.gmra.mrb[16].mxu0 %vm383_vm1, %v4629_v36  ;;  %v1061_v39 = vpop.f32.mrb[46].mxu1 }
 0x155   :  { %5330 = vmatpush1.bf16.msra.mxu0 %v5329_v31  ;;  %877 = vmatprep.mubr.f32.mxu0 %v6053_v7  ;;  %v5341_v41 = vpack.c.bf16 %v1061_v39, %v1055_v35  ;;  %v1063_v42 = vpop.f32.mrb[47].mxu1 }
 0x156   :  { %5332 = vmatprep.subr.bf16.mxu0 %v5331_v25  ;;  %v5339_v43 = vpack.c.bf16 %v1063_v42, %v1057_v37  ;;  %v1608_v25 = vld [vmem:[%s8803_s4 + $0x120] sm:$0xff] }
 0x157   :  { %v5421_v27 = vpack.c.bf16 %v1610_v26, %v1608_v25 }
 0x158   :  { %4637 = vmatmul.mubr.msk.f32.gmra.mrb[18].mxu0 %vm383_vm1, %v4630_v40  ;;  %v1307_v44 = vpop.f32.mrb[48].mxu1 }
 0x159   :  { %5334 = vmatpush1.bf16.msra.mxu0 %v5333_v22  ;;  %883 = vmatprep.mubr.f32.mxu0 %v6053_v7  ;;  %v1309_v47 = vpop.f32.mrb[49].mxu1  ;;  %v1611_v22 = vld [vmem:[%s8803_s4 + $0x138] sm:$0xff]  ;;  %s6056_s4 = smov [#allocation2]  }
 0x15a   :  { %5336 = vmatprep.subr.bf16.mxu0 %v5335_v34  ;;  %v5419_v23 = vpack.c.bf16 %v1611_v22, %v1609_v21  ;;  %v1504_v34 = vld [vmem:[%s8802_s3] sm:$0x3] }
 0x15c   :  { %4638 = vmatmul.mubr.msk.f32.gmra.mrb[20].mxu0 %vm383_vm1, %v4631_v46  ;;  %v1313_v48 = vpop.f32.mrb[50].mxu1  ;;  %5420 = vmatprep.subr.bf16.mxu1 %v5419_v23 }
 0x15d   :  { %5338 = vmatpush1.bf16.msra.mxu0 %v5337_v32  ;;  %889 = vmatprep.mubr.f32.mxu0 %v6053_v7  ;;  %v5369_v51 = vpack.c.bf16 %v1313_v48, %v1307_v44  ;;  %v1315_v53 = vpop.f32.mrb[51].mxu1  ;;  %v7024_v32 = vshrl.u32 %v1506_v30, 7  ;;  %v1908_v30 = vld [vmem:[%s8805_s6 + $0x8] sm:$0xff] }
 0x15e   :  { %5340 = vmatprep.subr.bf16.mxu0 %v5339_v43  ;;  %v5367_v54 = vpack.c.bf16 %v1315_v53, %v1309_v47  ;;  %5422 = vmatpush1.bf16.msra.mxu1 %v5421_v27 }
 0x15f   :  { %1676 = vmatprep.subr.mxu1 %v1613_v28  ;;  %v1508_v33 = vsub.s32 0, %v7024_v32  ;;  %v1512_v35 = vsub.s32 1, %v7024_v32 }
 0x160   :  { %4639 = vmatmul.mubr.msk.f32.gmra.mrb[22].mxu0 %vm383_vm1, %v4632_v50  ;;  %v1319_v57 = vpop.f32.mrb[52].mxu1 }
 0x161   :  { %895 = vmatprep.mubr.f32.mxu0 %v6053_v7  ;;  %5342 = vmatpush1.bf16.msra.mxu0 %v5341_v41  ;;  %v1321_v60 = vpop.f32.mrb[53].mxu1  ;;  %v7033_v36 = vrot.slane %v1504_v34, %v1508_v33  ;;  %v7037_v37 = vrot.slane %v1504_v34, %v1512_v35  ;;  %v1910_v34 = vld [vmem:[%s8805_s6 + $0x18] sm:$0xff] }
 0x162   :  { %5368 = vmatprep.subr.bf16.mxu0 %v5367_v54  ;;  %1677 = vmatpush1.msra.mxu1 %v1612_v29 }
 0x164   :  { %4640 = vmatmul.mubr.msk.f32.gmra.mrb[24].mxu0 %vm383_vm1, %v4633_v58  ;;  %v1325_v62 = vpop.f32.mrb[54].mxu1 }
 0x165   :  { %901 = vmatprep.mubr.f32.mxu0 %v6053_v7  ;;  %v5373_v1 = vpack.c.bf16 %v1325_v62, %v1319_v57  ;;  %v1327_v3 = vpop.f32.mrb[55].mxu1 }
 0x166   :  { %v5371_v5 = vpack.c.bf16 %v1327_v3, %v1321_v60 }
 0x168   :  { %4641 = vmatmul.mubr.msk.f32.gmra.mrb[26].mxu0 %vm383_vm1, %v4634_v63  ;;  %v1331_v6 = vpop.f32.mrb[56].mxu1 }
 0x169   :  { %907 = vmatprep.mubr.f32.mxu0 %v6053_v7  ;;  %v1333_v38 = vpop.f32.mrb[57].mxu1 }
 0x16c   :  { %4642 = vmatmul.mubr.msk.f32.gmra.mrb[28].mxu0 %vm383_vm1, %v4635_v16  ;;  %v1337_v45 = vpop.f32.mrb[58].mxu1 }
 0x16d   :  { %1159 = vmatprep.mubr.f32.mxu0 %v6053_v7  ;;  %v5377_v59 = vpack.c.bf16 %v1337_v45, %v1331_v6  ;;  %v1339_v61 = vpop.f32.mrb[59].mxu1 }
 0x16e   :  { %v5375_v8 = vpack.c.bf16 %v1339_v61, %v1333_v38 }
 0x170   :  { %4682 = vmatmul.mubr.msk.f32.vlgmr.msra.gmra.mrb[16].mxu0 %vm383_vm1, %v4675_v49  ;;  %v1343_v9 = vpop.f32.mrb[60].mxu1 }
 0x171   :  { %5370 = vmatpush1.bf16.msra.mxu0 %v5369_v51  ;;  %1165 = vmatprep.mubr.f32.mxu0 %v6053_v7  ;;  %v1345_v31 = vpop.f32.mrb[61].mxu1 }
 0x172   :  { %5372 = vmatprep.subr.bf16.mxu0 %v5371_v5 }
 0x174   :  { %4683 = vmatmul.mubr.msk.f32.gmra.mrb[18].mxu0 %vm383_vm1, %v4676_v2  ;;  %v1349_v10 = vpop.f32.mrb[62].mxu1 }
 0x175   :  { %5374 = vmatpush1.bf16.msra.mxu0 %v5373_v1  ;;  %1171 = vmatprep.mubr.f32.mxu0 %v6053_v7  ;;  %v5381_v52 = vpack.c.bf16 %v1349_v10, %v1343_v9  ;;  %v1351_v0 = vpop.f32.mrb[63].mxu1 }
 0x176   :  { %5376 = vmatprep.subr.bf16.mxu0 %v5375_v8  ;;  %v5379_v4 = vpack.c.bf16 %v1351_v0, %v1345_v31 }
 0x178   :  { %4684 = vmatmul.mubr.msk.f32.gmra.mrb[20].mxu0 %vm383_vm1, %v4677_v11 }
 0x179   :  { %1177 = vmatprep.mubr.f32.mxu0 %v6053_v7  ;;  %5378 = vmatpush1.bf16.msra.mxu0 %v5377_v59 }
 0x17a   :  { %5380 = vmatprep.subr.bf16.mxu0 %v5379_v4 }
 0x17c   :  { %4685 = vmatmul.mubr.msk.f32.gmra.mrb[22].mxu0 %vm383_vm1, %v4678_v24 }
 0x17d   :  { %1183 = vmatprep.mubr.f32.mxu0 %v6053_v7  ;;  %5382 = vmatpush1.bf16.msra.mxu0 %v5381_v52 }
 0x180   :  { %4686 = vmatmul.mubr.msk.f32.gmra.mrb[24].mxu0 %vm383_vm1, %v4679_v12 }
 0x181   :  { %1189 = vmatprep.mubr.f32.mxu0 %v6053_v7 }
 0x184   :  { %4687 = vmatmul.mubr.msk.f32.gmra.mrb[26].mxu0 %vm383_vm1, %v4680_v13 }
 0x185   :  { %1195 = vmatprep.mubr.f32.mxu0 %v6053_v7 }
 0x188   :  { %4688 = vmatmul.mubr.msk.f32.gmra.mrb[28].mxu0 %vm383_vm1, %v4681_v55 }
 0x189   :  { %1447 = vmatprep.mubr.f32.mxu0 %v6053_v7 }
 0x18c   :  { %4728 = vmatmul.mubr.msk.f32.vlgmr.msra.gmra.mrb[16].mxu0 %vm383_vm1, %v4721_v14 }
 0x18d   :  { %1453 = vmatprep.mubr.f32.mxu0 %v6053_v7 }
 0x190   :  { %4729 = vmatmul.mubr.msk.f32.gmra.mrb[18].mxu0 %vm383_vm1, %v4722_v17 }
 0x191   :  { %1459 = vmatprep.mubr.f32.mxu0 %v6053_v7 }
 0x194   :  { %4730 = vmatmul.mubr.msk.f32.gmra.mrb[20].mxu0 %vm383_vm1, %v4723_v18 }
 0x195   :  { %1465 = vmatprep.mubr.f32.mxu0 %v6053_v7 }
 0x198   :  { %4731 = vmatmul.mubr.msk.f32.gmra.mrb[22].mxu0 %vm383_vm1, %v4724_v56 }
 0x199   :  { %1471 = vmatprep.mubr.f32.mxu0 %v6053_v7 }
 0x19c   :  { %4732 = vmatmul.mubr.msk.f32.gmra.mrb[24].mxu0 %vm383_vm1, %v4725_v19 }
 0x19d   :  { %1477 = vmatprep.mubr.f32.mxu0 %v6053_v7 }
 0x1a0   :  { %4733 = vmatmul.mubr.msk.f32.gmra.mrb[26].mxu0 %vm383_vm1, %v4726_v15 }
 0x1a1   :  { %1483 = vmatprep.mubr.f32.mxu0 %v6053_v7 }
 0x1a4   :  { %4734 = vmatmul.mubr.msk.f32.gmra.mrb[28].mxu0 %vm383_vm1, %v4727_v20  ;;  %vm1764_vm1 = vcmask 457728  }
 0x25f   :  { %v1449_v39 = vpop.f32.mrb[16].mxu0 }
 0x260   :  { %v1516_v40 = vadd.f32 %v7033_v36, %v1449_v39  ;;  %v1451_v41 = vpop.f32.mrb[17].mxu0  ;;  %v1909_v39 = vld [vmem:[%s8805_s6 + $0x10] sm:$0xff] }
 0x261   :  { %v1517_v42 = vadd.f32 %v7037_v37, %v1451_v41  ;;  %v1912_v41 = vld [vmem:[%s8805_s6 + $0x28] sm:$0xff] }
 0x262   :  { %v1544_v43 = vmul.f32 0.01, %v1516_v40  ;;  %vm1530_vm2 = vcmp.gt.f32.partialorder %v1516_v40, 0.0 }
 0x263   :  { %vm1531_vm3 = vcmp.gt.f32.partialorder %v1517_v42, 0.0  ;;  %v1545_v44 = vmul.f32 0.01, %v1517_v42  ;;  %v1455_v46 = vpop.f32.mrb[18].mxu0 }
 0x264   :  { %v1518_v47 = vadd.f32 %v7033_v36, %v1455_v46  ;;  %v1457_v48 = vpop.f32.mrb[19].mxu0  ;;  %v7045_v53 = vsel %vm1530_vm2, %v1516_v40, %v1544_v43  ;;  %v1913_v46 = vld [vmem:[%s8805_s6 + $0x30] sm:$0xff] }
 0x265   :  { %v1519_v50 = vadd.f32 %v7037_v37, %v1457_v48  ;;  %v7043_v51 = vsel %vm1531_vm3, %v1517_v42, %v1545_v44  ;;  %v1914_v42 = vld [vmem:[%s8805_s6 + $0x38] sm:$0xff]  ;;  %v1911_v44 = vld [vmem:[%s8805_s6 + $0x20] sm:$0xff]  ;;  %v1916_v48 = vld [vmem:[%s8805_s6 + $0x48] sm:$0xff] }
 0x266   :  { %v1546_v54 = vmul.f32 0.01, %v1518_v47  ;;  %4735 = vmatprep.mubr.msk.f32.mxu1 %vm1614_vm4, %v7043_v51  ;;  %vm1532_vm6 = vcmp.gt.f32.partialorder %v1518_v47, 0.0  ;;  %v5439_v43 = vpack.c.bf16 %v1914_v42, %v1912_v41  ;;  %v1941_v41 = vld [vmem:[%s8805_s6 + $0x110] sm:$0xff]  ;;  %v1944_v42 = vld [vmem:[%s8805_s6 + $0x128] sm:$0xff] }
 0x267   :  { %vm1533_vm5 = vcmp.gt.f32.partialorder %v1519_v50, 0.0  ;;  %v1547_v57 = vmul.f32 0.01, %v1519_v50  ;;  %v1461_v58 = vpop.f32.mrb[20].mxu0  ;;  %1701 = vmatmul.mubr.f32.vlgmr.msra.gmra.mrb[64].mxu1 %v7045_v53 }
 0x268   :  { %v1520_v60 = vadd.f32 %v7033_v36, %v1461_v58  ;;  %v1463_v62 = vpop.f32.mrb[21].mxu0  ;;  %v7056_v5 = vsel %vm1532_vm6, %v1518_v47, %v1546_v54  ;;  %v5441_v47 = vpack.c.bf16 %v1913_v46, %v1911_v44  ;;  %v1917_v58 = vld [vmem:[%s8805_s6 + $0x50] sm:$0xff] }
 0x269   :  { %v1521_v63 = vadd.f32 %v7037_v37, %v1463_v62  ;;  %v7052_v1 = vsel %vm1533_vm5, %v1519_v50, %v1547_v57  ;;  %v1918_v50 = vld [vmem:[%s8805_s6 + $0x58] sm:$0xff]  ;;  %v1915_v57 = vld [vmem:[%s8805_s6 + $0x40] sm:$0xff] }
 0x26a   :  { %v1548_v3 = vmul.f32 0.01, %v1520_v60  ;;  %4736 = vmatprep.mubr.msk.f32.mxu1 %vm1614_vm4, %v7052_v1  ;;  %vm1534_vm8 = vcmp.gt.f32.partialorder %v1520_v60, 0.0  ;;  %v5443_v54 = vpack.c.bf16 %v1918_v50, %v1916_v48  ;;  %v5445_v62 = vpack.c.bf16 %v1917_v58, %v1915_v57 }
 0x26b   :  { %vm1535_vm7 = vcmp.gt.f32.partialorder %v1521_v63, 0.0  ;;  %v1549_v6 = vmul.f32 0.01, %v1521_v63  ;;  %v1467_v16 = vpop.f32.mrb[22].mxu0  ;;  %1707 = vmatmul.mubr.f32.gmra.mrb[66].mxu1 %v7056_v5 }
 0x26c   :  { %v1522_v38 = vadd.f32 %v7033_v36, %v1467_v16  ;;  %v1469_v45 = vpop.f32.mrb[23].mxu0  ;;  %v7065_v8 = vsel %vm1534_vm8, %v1520_v60, %v1548_v3  ;;  %v1920_v60 = vld [vmem:[%s8805_s6 + $0x68] sm:$0xff]  ;;  %v1921_v16 = vld [vmem:[%s8805_s6 + $0x70] sm:$0xff] }
 0x26d   :  { %v1523_v49 = vadd.f32 %v7037_v37, %v1469_v45  ;;  %v7061_v59 = vsel %vm1535_vm7, %v1521_v63, %v1549_v6  ;;  %v1922_v63 = vld [vmem:[%s8805_s6 + $0x78] sm:$0xff]  ;;  %v1919_v6 = vld [vmem:[%s8805_s6 + $0x60] sm:$0xff] }
 0x26e   :  { %v1550_v61 = vmul.f32 0.01, %v1522_v38  ;;  %4737 = vmatprep.mubr.msk.f32.mxu1 %vm1614_vm4, %v7061_v59  ;;  %vm1536_vm10 = vcmp.gt.f32.partialorder %v1522_v38, 0.0  ;;  %v5447_v3 = vpack.c.bf16 %v1922_v63, %v1920_v60  ;;  %v1926_v45 = vld [vmem:[%s8805_s6 + $0x98] sm:$0xff] }
 0x26f   :  { %vm1537_vm9 = vcmp.gt.f32.partialorder %v1523_v49, 0.0  ;;  %v1551_v9 = vmul.f32 0.01, %v1523_v49  ;;  %v1473_v2 = vpop.f32.mrb[24].mxu0  ;;  %1713 = vmatmul.mubr.f32.gmra.mrb[68].mxu1 %v7065_v8 }
 0x270   :  { %v1524_v31 = vadd.f32 %v7033_v36, %v1473_v2  ;;  %v1475_v10 = vpop.f32.mrb[25].mxu0  ;;  %v7074_v4 = vsel %vm1536_vm10, %v1522_v38, %v1550_v61  ;;  %v1924_v38 = vld [vmem:[%s8805_s6 + $0x88] sm:$0xff]  ;;  %v1925_v2 = vld [vmem:[%s8805_s6 + $0x90] sm:$0xff]  ;;  %vm3352_vm10 = vcmask 162816  }
 0x271   :  { %v1525_v11 = vadd.f32 %v7037_v37, %v1475_v10  ;;  %v7070_v52 = vsel %vm1537_vm9, %v1523_v49, %v1551_v9  ;;  %v5449_v49 = vpack.c.bf16 %v1921_v16, %v1919_v6  ;;  %v5451_v61 = vpack.c.bf16 %v1926_v45, %v1924_v38  ;;  %v1923_v9 = vld [vmem:[%s8805_s6 + $0x80] sm:$0xff]  ;;  %v1930_v10 = vld [vmem:[%s8805_s6 + $0xb8] sm:$0xff] }
 0x272   :  { %v1552_v0 = vmul.f32 0.01, %v1524_v31  ;;  %4738 = vmatprep.mubr.msk.f32.mxu1 %vm1614_vm4, %v7070_v52  ;;  %vm1538_vm12 = vcmp.gt.f32.partialorder %v1524_v31, 0.0  ;;  %vm3362_vm9 = vcmask 1043456  }
 0x273   :  { %vm1539_vm11 = vcmp.gt.f32.partialorder %v1525_v11, 0.0  ;;  %v1553_v24 = vmul.f32 0.01, %v1525_v11  ;;  %v1479_v12 = vpop.f32.mrb[26].mxu0  ;;  %1719 = vmatmul.mubr.f32.gmra.mrb[70].mxu1 %v7074_v4 }
 0x274   :  { %v1526_v13 = vadd.f32 %v7033_v36, %v1479_v12  ;;  %v1481_v55 = vpop.f32.mrb[27].mxu0  ;;  %v7083_v56 = vsel %vm1538_vm12, %v1524_v31, %v1552_v0  ;;  %v1928_v31 = vld [vmem:[%s8805_s6 + $0xa8] sm:$0xff]  ;;  %v1929_v12 = vld [vmem:[%s8805_s6 + $0xb0] sm:$0xff] }
 0x275   :  { %v1527_v14 = vadd.f32 %v7037_v37, %v1481_v55  ;;  %v7079_v17 = vsel %vm1539_vm11, %v1525_v11, %v1553_v24  ;;  %v5453_v11 = vpack.c.bf16 %v1925_v2, %v1923_v9  ;;  %v5455_v0 = vpack.c.bf16 %v1930_v10, %v1928_v31  ;;  %v1927_v24 = vld [vmem:[%s8805_s6 + $0xa0] sm:$0xff]  ;;  %v1934_v55 = vld [vmem:[%s8805_s6 + $0xd8] sm:$0xff] }
 0x276   :  { %v1554_v18 = vmul.f32 0.01, %v1526_v13  ;;  %4739 = vmatprep.mubr.msk.f32.mxu1 %vm1614_vm4, %v7079_v17  ;;  %vm1540_vm14 = vcmp.gt.f32.partialorder %v1526_v13, 0.0  ;;  %vm6055_vm11 = vmmov 0  }
 0x277   :  { %vm1541_vm13 = vcmp.gt.f32.partialorder %v1527_v14, 0.0  ;;  %v1555_v19 = vmul.f32 0.01, %v1527_v14  ;;  %v1485_v15 = vpop.f32.mrb[28].mxu0  ;;  %1725 = vmatmul.mubr.f32.gmra.mrb[72].mxu1 %v7083_v56 }
 0x278   :  { %v1528_v20 = vadd.f32 %v7033_v36, %v1485_v15  ;;  %v1487_v21 = vpop.f32.mrb[29].mxu0  ;;  %v7092_v26 = vsel %vm1540_vm14, %v1526_v13, %v1554_v18  ;;  %v5435_v36 = vpack.c.bf16 %v1910_v34, %v1908_v30  ;;  %v1932_v13 = vld [vmem:[%s8805_s6 + $0xc8] sm:$0xff]  ;;  %v1933_v15 = vld [vmem:[%s8805_s6 + $0xd0] sm:$0xff] }
 0x279   :  { %v1529_v22 = vadd.f32 %v7037_v37, %v1487_v21  ;;  %v7088_v23 = vsel %vm1541_vm13, %v1527_v14, %v1555_v19  ;;  %v1907_v37 = vld [vmem:[%s8805_s6] sm:$0xff]  ;;  %v5457_v14 = vpack.c.bf16 %v1929_v12, %v1927_v24  ;;  %v5459_v18 = vpack.c.bf16 %v1934_v55, %v1932_v13  ;;  %v1938_v21 = vld [vmem:[%s8805_s6 + $0xf8] sm:$0xff]  ;;  %v1937_v30 = vld [vmem:[%s8805_s6 + $0xf0] sm:$0xff] }
 0x27a   :  { %v1556_v25 = vmul.f32 0.01, %v1528_v20  ;;  %4740 = vmatprep.mubr.msk.f32.mxu1 %vm1614_vm4, %v7088_v23  ;;  %vm1542_vm0 = vcmp.gt.f32.partialorder %v1528_v20, 0.0  ;;  %v5437_v40 = vpack.c.bf16 %v1909_v39, %v1907_v37  ;;  %5436 = vmatprep.subr.bf16.mxu0 %v5435_v36  ;;  %v1931_v19 = vld [vmem:[%s8805_s6 + $0xc0] sm:$0xff]  ;;  %v1940_v34 = vld [vmem:[%s8805_s6 + $0x108] sm:$0xff]  ;;  %v1942_v36 = vld [vmem:[%s8805_s6 + $0x118] sm:$0xff] }
 0x27b   :  { %vm1543_vm15 = vcmp.gt.f32.partialorder %v1529_v22, 0.0  ;;  %v1557_v27 = vmul.f32 0.01, %v1529_v22  ;;  %1731 = vmatmul.mubr.f32.gmra.mrb[74].mxu1 %v7092_v26  ;;  %v5467_v39 = vpack.c.bf16 %v1942_v36, %v1940_v34  ;;  %v4758_v13 = vld [vmem:[%s8805_s6 + $0x160] sm:$0xff]  ;;  %v4761_v55 = vld [vmem:[%s8805_s6 + $0x178] sm:$0xff]  ;;  %v4764_v36 = vld [vmem:[%s8805_s6 + $0x190] sm:$0xff] }
 0x27c   :  { %v7099_v29 = vsel %vm1542_vm0, %v1528_v20, %v1556_v25  ;;  %5438 = vmatpush1.bf16.msra.mxu0 %v5437_v40  ;;  %v1936_v20 = vld [vmem:[%s8805_s6 + $0xe8] sm:$0xff]  ;;  %v1939_v40 = vld [vmem:[%s8805_s6 + $0x100] sm:$0xff]  ;;  %vm4348_vm13 = vcmask 982016   ;;  %vm4520_vm0 = vcmask 74752  }
 0x27d   :  { %v7095_v28 = vsel %vm1543_vm15, %v1529_v22, %v1557_v27  ;;  %5440 = vmatprep.subr.bf16.mxu0 %v5439_v43  ;;  %v5461_v22 = vpack.c.bf16 %v1933_v15, %v1931_v19  ;;  %v5463_v25 = vpack.c.bf16 %v1938_v21, %v1936_v20  ;;  %v1935_v27 = vld [vmem:[%s8805_s6 + $0xe0] sm:$0xff]  ;;  %v1946_v43 = vld [vmem:[%s8805_s6 + $0x138] sm:$0xff]  ;;  %v5469_v44 = vpack.c.bf16 %v1941_v41, %v1939_v40  ;;  %v4760_v21 = vld [vmem:[%s8805_s6 + $0x170] sm:$0xff] }
 0x27e   :  { %4741 = vmatprep.mubr.msk.f32.mxu1 %vm1614_vm4, %v7095_v28  ;;  %v5465_v37 = vpack.c.bf16 %v1937_v30, %v1935_v27  ;;  %v5471_v46 = vpack.c.bf16 %v1946_v43, %v1944_v42  ;;  %v1757_v19 = vld [vmem:[%s8804_s5] sm:$0xff]  ;;  %v1758_v27 = vld [vmem:[%s8804_s5 + $0x8] sm:$0xff]  ;;  %v1759_v41 = vld [vmem:[%s8804_s5 + $0x10] sm:$0xff]  ;;  %vm4443_vm15 = vcmask 687104  }
 0x27f   :  { %1737 = vmatmul.mubr.f32.gmra.mrb[76].mxu1 %v7099_v29  ;;  %v4771_v40 = vld [vmem:[%s8805_s6 + $0x1c8] sm:$0xff] }
 0x280   :  { %1850 = vmatprep.mubr.f32.mxu1 %v6053_v7  ;;  %5442 = vmatpush1.bf16.msra.mxu0 %v5441_v47 }
 0x281   :  { %5444 = vmatprep.subr.bf16.mxu0 %v5443_v54 }
 0x284   :  { %5446 = vmatpush1.bf16.msra.mxu0 %v5445_v62 }
 0x285   :  { %5448 = vmatprep.subr.bf16.mxu0 %v5447_v3 }
 0x288   :  { %5450 = vmatpush1.bf16.msra.mxu0 %v5449_v49 }
 0x289   :  { %5452 = vmatprep.subr.bf16.mxu0 %v5451_v61 }
 0x28c   :  { %5454 = vmatpush1.bf16.msra.mxu0 %v5453_v11 }
 0x28d   :  { %5456 = vmatprep.subr.bf16.mxu0 %v5455_v0 }
 0x290   :  { %5458 = vmatpush1.bf16.msra.mxu0 %v5457_v14  ;;  %v4763_v14 = vld [vmem:[%s8805_s6 + $0x188] sm:$0xff] }
 0x291   :  { %5460 = vmatprep.subr.bf16.mxu0 %v5459_v18  ;;  %v5479_v20 = vpack.c.bf16 %v4763_v14, %v4761_v55 }
 0x294   :  { %5462 = vmatpush1.bf16.msra.mxu0 %v5461_v22  ;;  %v4762_v22 = vld [vmem:[%s8805_s6 + $0x180] sm:$0xff] }
 0x295   :  { %5464 = vmatprep.subr.bf16.mxu0 %v5463_v25  ;;  %v4767_v25 = vld [vmem:[%s8805_s6 + $0x1a8] sm:$0xff]  ;;  %v5481_v30 = vpack.c.bf16 %v4762_v22, %v4760_v21 }
 0x298   :  { %5466 = vmatpush1.bf16.msra.mxu0 %v5465_v37  ;;  %v4766_v37 = vld [vmem:[%s8805_s6 + $0x1a0] sm:$0xff] }
 0x299   :  { %5468 = vmatprep.subr.bf16.mxu0 %v5467_v39  ;;  %v4769_v39 = vld [vmem:[%s8805_s6 + $0x1b8] sm:$0xff]  ;;  %v5485_v42 = vpack.c.bf16 %v4766_v37, %v4764_v36  ;;  %v4792_v37 = vld [vmem:[%s8805_s6 + $0x270] sm:$0xff] }
 0x29a   :  { %v5487_v43 = vpack.c.bf16 %v4771_v40, %v4769_v39  ;;  %v4794_v39 = vld [vmem:[%s8805_s6 + $0x280] sm:$0xff] }
 0x29b   :  { %v5513_v40 = vpack.c.bf16 %v4794_v39, %v4792_v37  ;;  %v4830_v39 = vld [vmem:[%s8805_s6 + $0x320] sm:$0xff] }
 0x29c   :  { %5470 = vmatpush1.bf16.msra.mxu0 %v5469_v44  ;;  %v4768_v44 = vld [vmem:[%s8805_s6 + $0x1b0] sm:$0xff] }
 0x29d   :  { %5472 = vmatprep.subr.bf16.mxu0 %v5471_v46  ;;  %v4770_v46 = vld [vmem:[%s8805_s6 + $0x1c0] sm:$0xff] }
 0x33a   :  { %v1702_v47 = vpop.f32.mrb[64].mxu1 }
 0x33b   :  { %v1704_v48 = vpop.f32.mrb[65].mxu1  ;;  %v7227_v62 = vmax.f32 %v7045_v53, %v1702_v47  ;;  %v4773_v47 = vld [vmem:[%s8805_s6 + $0x1d8] sm:$0xff] }
 0x33c   :  { %v7221_v58 = vmax.f32 %v7043_v51, %v1704_v48  ;;  %v4775_v48 = vld [vmem:[%s8805_s6 + $0x1e8] sm:$0xff] }
 0x33e   :  { %v1708_v50 = vpop.f32.mrb[66].mxu1 }
 0x33f   :  { %v7218_v54 = vmax.f32 %v7056_v5, %v1708_v50  ;;  %v1710_v57 = vpop.f32.mrb[67].mxu1  ;;  %v1760_v50 = vld [vmem:[%s8804_s5 + $0x18] sm:$0xff] }
 0x340   :  { %v7224_v60 = vmax.f32 %v7052_v1, %v1710_v57  ;;  %v5489_v57 = vpack.c.bf16 %v4770_v46, %v4768_v44  ;;  %v4797_v44 = vld [vmem:[%s8805_s6 + $0x298] sm:$0xff]  ;;  %v1948_v46 = vld [vmem:[%s8805_s6 + $0x148] sm:$0xff] }
 0x341   :  { %v5425_v6 = vpack.c.bf16 %v7218_v54, %v7227_v62 }
 0x342   :  { %v5423_v63 = vpack.c.bf16 %v7224_v60, %v7221_v58  ;;  %v1714_v3 = vpop.f32.mrb[68].mxu1 }
 0x343   :  { %v1716_v16 = vpop.f32.mrb[69].mxu1  ;;  %v7243_v45 = vmax.f32 %v7065_v8, %v1714_v3  ;;  %v4772_v3 = vld [vmem:[%s8805_s6 + $0x1d0] sm:$0xff] }
 0x344   :  { %5424 = vmatprep.subr.bf16.mxu1 %v5423_v63  ;;  %v7237_v1 = vmax.f32 %v7061_v59, %v1716_v16  ;;  %v5491_v63 = vpack.c.bf16 %v4775_v48, %v4773_v47  ;;  %v4777_v16 = vld [vmem:[%s8805_s6 + $0x1f8] sm:$0xff]  ;;  %v4796_v47 = vld [vmem:[%s8805_s6 + $0x290] sm:$0xff]  ;;  %v4815_v48 = vld [vmem:[%s8805_s6 + $0x2a8] sm:$0xff] }
 0x345   :  { %5426 = vmatpush1.bf16.msra.mxu1 %v5425_v6  ;;  %v4774_v6 = vld [vmem:[%s8805_s6 + $0x1e0] sm:$0xff] }
 0x346   :  { %v1720_v5 = vpop.f32.mrb[70].mxu1 }
 0x347   :  { %v7234_v51 = vmax.f32 %v7074_v4, %v1720_v5  ;;  %v1722_v38 = vpop.f32.mrb[71].mxu1  ;;  %v4779_v5 = vld [vmem:[%s8805_s6 + $0x208] sm:$0xff] }
 0x348   :  { %v7240_v53 = vmax.f32 %v7070_v52, %v1722_v38  ;;  %v1761_v38 = vld [vmem:[%s8804_s5 + $0x20] sm:$0xff] }
 0x349   :  { %v5429_v9 = vpack.c.bf16 %v7234_v51, %v7243_v45 }
 0x34a   :  { %v5427_v49 = vpack.c.bf16 %v7240_v53, %v7237_v1  ;;  %v1726_v61 = vpop.f32.mrb[72].mxu1 }
 0x34b   :  { %v1728_v2 = vpop.f32.mrb[73].mxu1  ;;  %v7259_v10 = vmax.f32 %v7083_v56, %v1726_v61  ;;  %v4756_v56 = vld [vmem:[%s8805_s6 + $0x150] sm:$0xff]  ;;  %v5495_v61 = vpack.c.bf16 %v4779_v5, %v4777_v16  ;;  %v4819_v5 = vld [vmem:[%s8805_s6 + $0x2c8] sm:$0xff] }
 0x34c   :  { %5428 = vmatprep.subr.bf16.mxu1 %v5427_v49  ;;  %v7253_v52 = vmax.f32 %v7079_v17, %v1728_v2  ;;  %v4759_v17 = vld [vmem:[%s8805_s6 + $0x168] sm:$0xff]  ;;  %v5477_v15 = vpack.c.bf16 %v4758_v13, %v4756_v56  ;;  %v5493_v49 = vpack.c.bf16 %v4774_v6, %v4772_v3  ;;  %v4778_v2 = vld [vmem:[%s8805_s6 + $0x200] sm:$0xff]  ;;  %v1763_v13 = vld [vmem:[%s8804_s5 + $0x30] sm:$0xff] }
 0x34d   :  { %5430 = vmatpush1.bf16.msra.mxu1 %v5429_v9  ;;  %v4776_v9 = vld [vmem:[%s8805_s6 + $0x1f0] sm:$0xff]  ;;  %v4787_v56 = vld [vmem:[%s8805_s6 + $0x248] sm:$0xff]  ;;  %v4814_v3 = vld [vmem:[%s8805_s6 + $0x2a0] sm:$0xff] }
 0x34e   :  { %v1732_v4 = vpop.f32.mrb[74].mxu1  ;;  %v4816_v6 = vld [vmem:[%s8805_s6 + $0x2b0] sm:$0xff] }
 0x34f   :  { %v7250_v59 = vmax.f32 %v7092_v26, %v1732_v4  ;;  %v1734_v31 = vpop.f32.mrb[75].mxu1  ;;  %v4757_v26 = vld [vmem:[%s8805_s6 + $0x158] sm:$0xff] }
 0x350   :  { %v7256_v8 = vmax.f32 %v7088_v23, %v1734_v31  ;;  %v4781_v4 = vld [vmem:[%s8805_s6 + $0x218] sm:$0xff]  ;;  %v4783_v31 = vld [vmem:[%s8805_s6 + $0x228] sm:$0xff] }
 0x351   :  { %v5433_v24 = vpack.c.bf16 %v7250_v59, %v7259_v10 }
 0x352   :  { %v5431_v11 = vpack.c.bf16 %v7256_v8, %v7253_v52  ;;  %v1738_v0 = vpop.f32.mrb[76].mxu1 }
 0x353   :  { %v1740_v12 = vpop.f32.mrb[77].mxu1  ;;  %v7288_v18 = vmax.f32 %v7099_v29, %v1738_v0  ;;  %v4765_v29 = vld [vmem:[%s8805_s6 + $0x198] sm:$0xff]  ;;  %v5497_v0 = vpack.c.bf16 %v4778_v2, %v4776_v9  ;;  %v5541_v9 = vpack.c.bf16 %v4816_v6, %v4814_v3 }
 0x354   :  { %v7272_v23 = vmax.f32 %v7095_v28, %v1740_v12  ;;  %5432 = vmatprep.subr.bf16.mxu1 %v5431_v11  ;;  %v5475_v28 = vpack.c.bf16 %v4759_v17, %v4757_v26  ;;  %v5483_v34 = vpack.c.bf16 %v4767_v25, %v4765_v29  ;;  %v1762_v11 = vld [vmem:[%s8804_s5 + $0x28] sm:$0xff]  ;;  %v4780_v12 = vld [vmem:[%s8805_s6 + $0x210] sm:$0xff]  ;;  %v4782_v26 = vld [vmem:[%s8805_s6 + $0x220] sm:$0xff] }
 0x355   :  { %5434 = vmatpush1.bf16.msra.mxu1 %v5433_v24  ;;  %v5499_v24 = vpack.c.bf16 %v4783_v31, %v4781_v4  ;;  %v4785_v17 = vld [vmem:[%s8805_s6 + $0x238] sm:$0xff]  ;;  %v5501_v55 = vpack.c.bf16 %v4782_v26, %v4780_v12  ;;  %v4788_v29 = vld [vmem:[%s8805_s6 + $0x250] sm:$0xff]  ;;  %v4790_v25 = vld [vmem:[%s8805_s6 + $0x260] sm:$0xff] }
 0x356   :  { %1798 = vmatprep.subr.mxu1 %v7272_v23  ;;  %v5503_v14 = vpack.c.bf16 %v4787_v56, %v4785_v17  ;;  %v4818_v31 = vld [vmem:[%s8805_s6 + $0x2c0] sm:$0xff] }
 0x359   :  { %1799 = vmatpush1.msra.mxu1 %v7288_v18 }
 0x35a   :  { %4742 = vmatmul.mubr.msk.f32.vlgmr.msra.gmra.mrb[78].mxu1 %vm1764_vm1, %v1757_v19  ;;  %5476 = vmatprep.subr.bf16.mxu1 %v5475_v28  ;;  %v4784_v28 = vld [vmem:[%s8805_s6 + $0x230] sm:$0xff]  ;;  %v4786_v19 = vld [vmem:[%s8805_s6 + $0x240] sm:$0xff] }
 0x35b   :  { %1856 = vmatprep.mubr.f32.mxu1 %v6053_v7  ;;  %5478 = vmatpush1.bf16.msra.mxu1 %v5477_v15  ;;  %v4789_v15 = vld [vmem:[%s8805_s6 + $0x258] sm:$0xff]  ;;  %v5505_v21 = vpack.c.bf16 %v4786_v19, %v4784_v28 }
 0x35c   :  { %5480 = vmatprep.subr.bf16.mxu1 %v5479_v20  ;;  %v4791_v20 = vld [vmem:[%s8805_s6 + $0x268] sm:$0xff] }
 0x35d   :  { %v5507_v22 = vpack.c.bf16 %v4791_v20, %v4789_v15 }
 0x35e   :  { %4743 = vmatmul.mubr.msk.f32.gmra.mrb[80].mxu1 %vm1764_vm1, %v1758_v27  ;;  %v4793_v27 = vld [vmem:[%s8805_s6 + $0x278] sm:$0xff] }
 0x35f   :  { %1862 = vmatprep.mubr.f32.mxu1 %v6053_v7  ;;  %5482 = vmatpush1.bf16.msra.mxu1 %v5481_v30  ;;  %v4795_v30 = vld [vmem:[%s8805_s6 + $0x288] sm:$0xff] }
 0x360   :  { %5484 = vmatprep.subr.bf16.mxu1 %v5483_v34  ;;  %v5509_v34 = vpack.c.bf16 %v4790_v25, %v4788_v29  ;;  %v5511_v36 = vpack.c.bf16 %v4795_v30, %v4793_v27  ;;  %v4828_v29 = vld [vmem:[%s8805_s6 + $0x310] sm:$0xff] }
 0x362   :  { %4744 = vmatmul.mubr.msk.f32.gmra.mrb[82].mxu1 %vm1764_vm1, %v1759_v41  ;;  %v1943_v41 = vld [vmem:[%s8805_s6 + $0x120] sm:$0xff] }
 0x363   :  { %1868 = vmatprep.mubr.f32.mxu1 %v6053_v7  ;;  %5486 = vmatpush1.bf16.msra.mxu1 %v5485_v42  ;;  %v1945_v42 = vld [vmem:[%s8805_s6 + $0x130] sm:$0xff] }
 0x364   :  { %5488 = vmatprep.subr.bf16.mxu1 %v5487_v43  ;;  %v5473_v43 = vpack.c.bf16 %v1945_v42, %v1943_v41 }
 0x366   :  { %4745 = vmatmul.mubr.msk.f32.gmra.mrb[84].mxu1 %vm1764_vm1, %v1760_v50  ;;  %5474 = vmatpush1.bf16.msra.mxu0 %v5473_v43  ;;  %v4817_v50 = vld [vmem:[%s8805_s6 + $0x2b8] sm:$0xff] }
 0x367   :  { %1874 = vmatprep.mubr.f32.mxu1 %v6053_v7  ;;  %5490 = vmatpush1.bf16.msra.mxu1 %v5489_v57  ;;  %v1947_v57 = vld [vmem:[%s8805_s6 + $0x140] sm:$0xff] }
 0x368   :  { %5492 = vmatprep.subr.bf16.mxu1 %v5491_v63  ;;  %2010 = vmatprep.subr.mxu0 %v1948_v46  ;;  %v5539_v63 = vpack.c.bf16 %v4817_v50, %v4815_v48  ;;  %v4834_v48 = vld [vmem:[%s8805_s6 + $0x340] sm:$0xff]  ;;  %v4836_v50 = vld [vmem:[%s8805_s6 + $0x350] sm:$0xff] }
 0x369   :  { %v5561_v6 = vpack.c.bf16 %v4836_v50, %v4834_v48 }
 0x36a   :  { %4746 = vmatmul.mubr.msk.f32.gmra.mrb[86].mxu1 %vm1764_vm1, %v1761_v38  ;;  %2011 = vmatpush1.msra.mxu0 %v1947_v57  ;;  %v4821_v38 = vld [vmem:[%s8805_s6 + $0x2d8] sm:$0xff] }
 0x36b   :  { %1880 = vmatprep.mubr.f32.mxu1 %v6053_v7  ;;  %5494 = vmatpush1.bf16.msra.mxu1 %v5493_v49  ;;  %v5543_v4 = vpack.c.bf16 %v4821_v38, %v4819_v5  ;;  %v4838_v38 = vld [vmem:[%s8805_s6 + $0x360] sm:$0xff] }
 0x36c   :  { %5496 = vmatprep.subr.bf16.mxu1 %v5495_v61 }
 0x36e   :  { %4747 = vmatmul.mubr.msk.f32.gmra.mrb[88].mxu1 %vm1764_vm1, %v1762_v11  ;;  %v4820_v11 = vld [vmem:[%s8805_s6 + $0x2d0] sm:$0xff] }
 0x36f   :  { %1886 = vmatprep.mubr.f32.mxu1 %v6053_v7  ;;  %5498 = vmatpush1.bf16.msra.mxu1 %v5497_v0  ;;  %v5545_v26 = vpack.c.bf16 %v4820_v11, %v4818_v31 }
 0x370   :  { %5500 = vmatprep.subr.bf16.mxu1 %v5499_v24 }
 0x372   :  { %4748 = vmatmul.mubr.msk.f32.gmra.mrb[90].mxu1 %vm1764_vm1, %v1763_v13  ;;  %v4822_v13 = vld [vmem:[%s8805_s6 + $0x2e0] sm:$0xff] }
 0x373   :  { %5502 = vmatpush1.bf16.msra.mxu1 %v5501_v55  ;;  %v4824_v55 = vld [vmem:[%s8805_s6 + $0x2f0] sm:$0xff] }
 0x374   :  { %5504 = vmatprep.subr.bf16.mxu1 %v5503_v14  ;;  %v5549_v15 = vpack.c.bf16 %v4824_v55, %v4822_v13  ;;  %v4846_v13 = vld [vmem:[%s8805_s6 + $0x3a0] sm:$0xff]  ;;  %v4848_v55 = vld [vmem:[%s8805_s6 + $0x3b0] sm:$0xff] }
 0x377   :  { %5506 = vmatpush1.bf16.msra.mxu1 %v5505_v21 }
 0x378   :  { %5508 = vmatprep.subr.bf16.mxu1 %v5507_v22  ;;  %v4826_v22 = vld [vmem:[%s8805_s6 + $0x300] sm:$0xff] }
 0x37b   :  { %5510 = vmatpush1.bf16.msra.mxu1 %v5509_v34  ;;  %v5553_v34 = vpack.c.bf16 %v4828_v29, %v4826_v22  ;;  %v4855_v29 = vld [vmem:[%s8805_s6 + $0x3e8] sm:$0xff] }
 0x37c   :  { %5512 = vmatprep.subr.bf16.mxu1 %v5511_v36 }
 0x37f   :  { %5514 = vmatpush1.bf16.msra.mxu1 %v5513_v40  ;;  %v4832_v40 = vld [vmem:[%s8805_s6 + $0x330] sm:$0xff] }
 0x380   :  { %2163 = vmatprep.subr.mxu1 %v4797_v44  ;;  %v5557_v44 = vpack.c.bf16 %v4832_v40, %v4830_v39  ;;  %v4854_v39 = vld [vmem:[%s8805_s6 + $0x3e0] sm:$0xff] }
 0x383   :  { %2164 = vmatpush1.msra.mxu1 %v4796_v47 }
 0x384   :  { %5540 = vmatprep.subr.bf16.mxu1 %v5539_v63 }
 0x42d   :  { %v1852_v16 = vpop.f32.mrb[78].mxu1 }
 0x42e   :  { %v1854_v49 = vpop.f32.mrb[79].mxu1  ;;  %v7467_v2 = vmax.f32 %v7227_v62, %v1852_v16  ;;  %v4825_v62 = vld [vmem:[%s8805_s6 + $0x2f8] sm:$0xff] }
 0x42f   :  { %v7464_v61 = vmax.f32 %v7221_v58, %v1854_v49  ;;  %v4823_v58 = vld [vmem:[%s8805_s6 + $0x2e8] sm:$0xff]  ;;  %v4840_v49 = vld [vmem:[%s8805_s6 + $0x370] sm:$0xff] }
 0x430   :  { %v5547_v56 = vpack.c.bf16 %v4825_v62, %v4823_v58  ;;  %v5565_v11 = vpack.c.bf16 %v4840_v49, %v4838_v38  ;;  %v4842_v62 = vld [vmem:[%s8805_s6 + $0x380] sm:$0xff]  ;;  %v4938_v49 = vld [vmem:[%s8805_s6 + $0x5b0] sm:$0xff] }
 0x431   :  { %v1858_v0 = vpop.f32.mrb[80].mxu1  ;;  %4749 = vmatprep.mubr.msk.f32.mxu0 %vm1614_vm4, %v7464_v61  ;;  %4798 = vmatprep.mubr.msk.f32.mxu1 %vm1614_vm4, %v7464_v61  ;;  %v4936_v38 = vld [vmem:[%s8805_s6 + $0x5a0] sm:$0xff] }
 0x432   :  { %v1860_v24 = vpop.f32.mrb[81].mxu1  ;;  %2035 = vmatmul.mubr.f32.vlgmr.msra.gmra.mrb[30].mxu0 %v7467_v2  ;;  %2188 = vmatmul.mubr.f32.vlgmr.msra.gmra.mrb[92].mxu1 %v7467_v2  ;;  %v7491_v17 = vmax.f32 %v7218_v54, %v1858_v0  ;;  %v4827_v54 = vld [vmem:[%s8805_s6 + $0x308] sm:$0xff] }
 0x433   :  { %v7488_v12 = vmax.f32 %v7224_v60, %v1860_v24  ;;  %5542 = vmatpush1.bf16.msra.mxu1 %v5541_v9  ;;  %v4829_v60 = vld [vmem:[%s8805_s6 + $0x318] sm:$0xff]  ;;  %v4844_v24 = vld [vmem:[%s8805_s6 + $0x390] sm:$0xff] }
 0x434   :  { %5544 = vmatprep.subr.bf16.mxu1 %v5543_v4  ;;  %v5551_v21 = vpack.c.bf16 %v4829_v60, %v4827_v54  ;;  %v4853_v54 = vld [vmem:[%s8805_s6 + $0x3d8] sm:$0xff]  ;;  %v5573_v60 = vpack.c.bf16 %v4848_v55, %v4846_v13  ;;  %v4949_v13 = vld [vmem:[%s8805_s6 + $0x608] sm:$0xff] }
 0x435   :  { %v1864_v14 = vpop.f32.mrb[82].mxu1  ;;  %4750 = vmatprep.mubr.msk.f32.mxu0 %vm1614_vm4, %v7488_v12  ;;  %4799 = vmatprep.mubr.msk.f32.mxu1 %vm1614_vm4, %v7488_v12  ;;  %v4951_v55 = vld [vmem:[%s8805_s6 + $0x618] sm:$0xff] }
 0x436   :  { %v1866_v28 = vpop.f32.mrb[83].mxu1  ;;  %2041 = vmatmul.mubr.f32.gmra.mrb[32].mxu0 %v7491_v17  ;;  %2194 = vmatmul.mubr.f32.gmra.mrb[94].mxu1 %v7491_v17  ;;  %v7515_v20 = vmax.f32 %v7243_v45, %v1864_v14  ;;  %v4833_v45 = vld [vmem:[%s8805_s6 + $0x338] sm:$0xff]  ;;  %v4851_v14 = vld [vmem:[%s8805_s6 + $0x3c8] sm:$0xff] }
 0x437   :  { %v7512_v19 = vmax.f32 %v7237_v1, %v1866_v28  ;;  %5546 = vmatpush1.bf16.msra.mxu1 %v5545_v26  ;;  %v4831_v1 = vld [vmem:[%s8805_s6 + $0x328] sm:$0xff]  ;;  %v5569_v26 = vpack.c.bf16 %v4844_v24, %v4842_v62  ;;  %v5575_v28 = vpack.c.bf16 %v4853_v54, %v4851_v14  ;;  %v4947_v24 = vld [vmem:[%s8805_s6 + $0x5f8] sm:$0xff]  ;;  %v5667_v54 = vpack.c.bf16 %v4951_v55, %v4949_v13 }
 0x438   :  { %5548 = vmatprep.subr.bf16.mxu1 %v5547_v56  ;;  %v5555_v37 = vpack.c.bf16 %v4833_v45, %v4831_v1  ;;  %v4927_v1 = vld [vmem:[%s8805_s6 + $0x558] sm:$0xff]  ;;  %v4924_v45 = vld [vmem:[%s8805_s6 + $0x540] sm:$0xff]  ;;  %v4945_v62 = vld [vmem:[%s8805_s6 + $0x5e8] sm:$0xff] }
 0x439   :  { %v1870_v25 = vpop.f32.mrb[84].mxu1  ;;  %4751 = vmatprep.mubr.msk.f32.mxu0 %vm1614_vm4, %v7512_v19  ;;  %4800 = vmatprep.mubr.msk.f32.mxu1 %vm1614_vm4, %v7512_v19 }
 0x43a   :  { %v1872_v27 = vpop.f32.mrb[85].mxu1  ;;  %2047 = vmatmul.mubr.f32.gmra.mrb[34].mxu0 %v7515_v20  ;;  %2200 = vmatmul.mubr.f32.gmra.mrb[96].mxu1 %v7515_v20  ;;  %v7539_v36 = vmax.f32 %v7234_v51, %v1870_v25  ;;  %v4835_v51 = vld [vmem:[%s8805_s6 + $0x348] sm:$0xff] }
 0x43b   :  { %v7536_v30 = vmax.f32 %v7240_v53, %v1872_v27  ;;  %5550 = vmatpush1.bf16.msra.mxu1 %v5549_v15  ;;  %v4837_v53 = vld [vmem:[%s8805_s6 + $0x358] sm:$0xff]  ;;  %v4850_v15 = vld [vmem:[%s8805_s6 + $0x3c0] sm:$0xff]  ;;  %v4925_v25 = vld [vmem:[%s8805_s6 + $0x548] sm:$0xff] }
 0x43c   :  { %5552 = vmatprep.subr.bf16.mxu1 %v5551_v21  ;;  %v5559_v47 = vpack.c.bf16 %v4837_v53, %v4835_v51  ;;  %v4852_v21 = vld [vmem:[%s8805_s6 + $0x3d0] sm:$0xff]  ;;  %v5643_v40 = vpack.c.bf16 %v4927_v1, %v4925_v25  ;;  %v4928_v53 = vld [vmem:[%s8805_s6 + $0x560] sm:$0xff] }
 0x43d   :  { %v1876_v41 = vpop.f32.mrb[86].mxu1  ;;  %4752 = vmatprep.mubr.msk.f32.mxu0 %vm1614_vm4, %v7536_v30  ;;  %4801 = vmatprep.mubr.msk.f32.mxu1 %vm1614_vm4, %v7536_v30  ;;  %v5577_v22 = vpack.c.bf16 %v4852_v21, %v4850_v15  ;;  %v4926_v27 = vld [vmem:[%s8805_s6 + $0x550] sm:$0xff]  ;;  %v4953_v15 = vld [vmem:[%s8805_s6 + $0x628] sm:$0xff]  ;;  %v4955_v21 = vld [vmem:[%s8805_s6 + $0x638] sm:$0xff] }
 0x43e   :  { %v1878_v42 = vpop.f32.mrb[87].mxu1  ;;  %2053 = vmatmul.mubr.f32.gmra.mrb[36].mxu0 %v7539_v36  ;;  %2206 = vmatmul.mubr.f32.gmra.mrb[98].mxu1 %v7539_v36  ;;  %v7563_v46 = vmax.f32 %v7259_v10, %v1876_v41  ;;  %v4841_v10 = vld [vmem:[%s8805_s6 + $0x378] sm:$0xff]  ;;  %v5645_v41 = vpack.c.bf16 %v4926_v27, %v4924_v45  ;;  %v4952_v25 = vld [vmem:[%s8805_s6 + $0x620] sm:$0xff]  ;;  %v4954_v1 = vld [vmem:[%s8805_s6 + $0x630] sm:$0xff] }
 0x43f   :  { %v7560_v43 = vmax.f32 %v7253_v52, %v1878_v42  ;;  %5554 = vmatpush1.bf16.msra.mxu1 %v5553_v34  ;;  %v4839_v52 = vld [vmem:[%s8805_s6 + $0x368] sm:$0xff]  ;;  %v4930_v42 = vld [vmem:[%s8805_s6 + $0x570] sm:$0xff]  ;;  %v4959_v27 = vld [vmem:[%s8805_s6 + $0x658] sm:$0xff] }
 0x440   :  { %5556 = vmatprep.subr.bf16.mxu1 %v5555_v37  ;;  %v5563_v5 = vpack.c.bf16 %v4841_v10, %v4839_v52  ;;  %v4929_v34 = vld [vmem:[%s8805_s6 + $0x568] sm:$0xff]  ;;  %v4931_v37 = vld [vmem:[%s8805_s6 + $0x578] sm:$0xff]  ;;  %v5649_v48 = vpack.c.bf16 %v4930_v42, %v4928_v53  ;;  %v4934_v52 = vld [vmem:[%s8805_s6 + $0x590] sm:$0xff] }
 0x441   :  { %v1882_v57 = vpop.f32.mrb[88].mxu1  ;;  %4753 = vmatprep.mubr.msk.f32.mxu0 %vm1614_vm4, %v7560_v43  ;;  %4802 = vmatprep.mubr.msk.f32.mxu1 %vm1614_vm4, %v7560_v43  ;;  %v5647_v51 = vpack.c.bf16 %v4931_v37, %v4929_v34  ;;  %v4937_v10 = vld [vmem:[%s8805_s6 + $0x5a8] sm:$0xff]  ;;  %v5673_v34 = vpack.c.bf16 %v4954_v1, %v4952_v25 }
 0x442   :  { %v1884_v63 = vpop.f32.mrb[89].mxu1  ;;  %2059 = vmatmul.mubr.f32.gmra.mrb[38].mxu0 %v7563_v46  ;;  %2212 = vmatmul.mubr.f32.gmra.mrb[100].mxu1 %v7563_v46  ;;  %v7587_v16 = vmax.f32 %v7250_v59, %v1882_v57  ;;  %v4843_v59 = vld [vmem:[%s8805_s6 + $0x388] sm:$0xff]  ;;  %v4932_v57 = vld [vmem:[%s8805_s6 + $0x580] sm:$0xff] }
 0x443   :  { %v7584_v3 = vmax.f32 %v7256_v8, %v1884_v63  ;;  %5558 = vmatpush1.bf16.msra.mxu1 %v5557_v44  ;;  %v4845_v8 = vld [vmem:[%s8805_s6 + $0x398] sm:$0xff]  ;;  %v4933_v44 = vld [vmem:[%s8805_s6 + $0x588] sm:$0xff] }
 0x444   :  { %5560 = vmatprep.subr.bf16.mxu1 %v5559_v47  ;;  %v5567_v58 = vpack.c.bf16 %v4845_v8, %v4843_v59  ;;  %v4935_v47 = vld [vmem:[%s8805_s6 + $0x598] sm:$0xff]  ;;  %v5657_v8 = vpack.c.bf16 %v4938_v49, %v4936_v38  ;;  %v4957_v45 = vld [vmem:[%s8805_s6 + $0x648] sm:$0xff] }
 0x445   :  { %v1888_v9 = vpop.f32.mrb[90].mxu1  ;;  %4754 = vmatprep.mubr.msk.f32.mxu0 %vm1614_vm4, %v7584_v3  ;;  %4803 = vmatprep.mubr.msk.f32.mxu1 %vm1614_vm4, %v7584_v3  ;;  %v5651_v50 = vpack.c.bf16 %v4935_v47, %v4933_v44  ;;  %v4939_v63 = vld [vmem:[%s8805_s6 + $0x5b8] sm:$0xff]  ;;  %v5675_v37 = vpack.c.bf16 %v4959_v27, %v4957_v45  ;;  %v4960_v44 = vld [vmem:[%s8805_s6 + $0x660] sm:$0xff]  ;;  %v4962_v47 = vld [vmem:[%s8805_s6 + $0x670] sm:$0xff] }
 0x446   :  { %v1890_v4 = vpop.f32.mrb[91].mxu1  ;;  %2065 = vmatmul.mubr.f32.gmra.mrb[40].mxu0 %v7587_v16  ;;  %2218 = vmatmul.mubr.f32.gmra.mrb[102].mxu1 %v7587_v16  ;;  %v7611_v0 = vmax.f32 %v7288_v18, %v1888_v9  ;;  %v4849_v18 = vld [vmem:[%s8805_s6 + $0x3b8] sm:$0xff]  ;;  %v4941_v9 = vld [vmem:[%s8805_s6 + $0x5c8] sm:$0xff] }
 0x447   :  { %v7608_v31 = vmax.f32 %v7272_v23, %v1890_v4  ;;  %5562 = vmatpush1.bf16.msra.mxu1 %v5561_v6  ;;  %v4847_v23 = vld [vmem:[%s8805_s6 + $0x3a8] sm:$0xff]  ;;  %v5653_v6 = vpack.c.bf16 %v4934_v52, %v4932_v57  ;;  %v4943_v59 = vld [vmem:[%s8805_s6 + $0x5d8] sm:$0xff]  ;;  %v4964_v57 = vld [vmem:[%s8805_s6 + $0x680] sm:$0xff] }
 0x448   :  { %5564 = vmatprep.subr.bf16.mxu1 %v5563_v5  ;;  %v5571_v56 = vpack.c.bf16 %v4849_v18, %v4847_v23  ;;  %v5655_v5 = vpack.c.bf16 %v4939_v63, %v4937_v10  ;;  %v5659_v4 = vpack.c.bf16 %v4943_v59, %v4941_v9  ;;  %v5663_v18 = vpack.c.bf16 %v4947_v24, %v4945_v62 }
 0x449   :  { %4755 = vmatprep.mubr.msk.f32.mxu0 %vm1614_vm4, %v7608_v31  ;;  %4804 = vmatprep.mubr.msk.f32.mxu1 %vm1614_vm4, %v7608_v31 }
 0x44a   :  { %2071 = vmatmul.mubr.f32.gmra.mrb[42].mxu0 %v7611_v0  ;;  %2224 = vmatmul.mubr.f32.gmra.mrb[104].mxu1 %v7611_v0 }
 0x44b   :  { %5566 = vmatpush1.bf16.msra.mxu1 %v5565_v11  ;;  %4856 = vmatprep.mubr.msk.f32.mxu1 %vm1614_vm4, %v7464_v61  ;;  %v4940_v11 = vld [vmem:[%s8805_s6 + $0x5c0] sm:$0xff] }
 0x44c   :  { %5568 = vmatprep.subr.bf16.mxu1 %v5567_v58  ;;  %2307 = vmatprep.mubr.f32.mxu0 %v6053_v7  ;;  %v4942_v58 = vld [vmem:[%s8805_s6 + $0x5d0] sm:$0xff] }
 0x44d   :  { %v5661_v23 = vpack.c.bf16 %v4942_v58, %v4940_v11 }
 0x44f   :  { %5570 = vmatpush1.bf16.msra.mxu1 %v5569_v26  ;;  %v4944_v26 = vld [vmem:[%s8805_s6 + $0x5e0] sm:$0xff] }
 0x450   :  { %5572 = vmatprep.subr.bf16.mxu1 %v5571_v56  ;;  %v4946_v56 = vld [vmem:[%s8805_s6 + $0x5f0] sm:$0xff] }
 0x451   :  { %v5665_v14 = vpack.c.bf16 %v4946_v56, %v4944_v26 }
 0x453   :  { %5574 = vmatpush1.bf16.msra.mxu1 %v5573_v60  ;;  %v4948_v60 = vld [vmem:[%s8805_s6 + $0x600] sm:$0xff] }
 0x454   :  { %5576 = vmatprep.subr.bf16.mxu1 %v5575_v28  ;;  %v4950_v28 = vld [vmem:[%s8805_s6 + $0x610] sm:$0xff] }
 0x457   :  { %5578 = vmatpush1.bf16.msra.mxu1 %v5577_v22  ;;  %v5669_v22 = vpack.c.bf16 %v4950_v28, %v4948_v60 }
 0x458   :  { %2501 = vmatprep.subr.mxu1 %v4855_v29  ;;  %v5671_v29 = vpack.c.bf16 %v4955_v21, %v4953_v15 }
 0x45b   :  { %2502 = vmatpush1.msra.mxu1 %v4854_v39  ;;  %v4956_v39 = vld [vmem:[%s8805_s6 + $0x640] sm:$0xff] }
 0x45c   :  { %2526 = vmatmul.mubr.f32.vlgmr.msra.gmra.mrb[106].mxu1 %v7467_v2  ;;  %5644 = vmatprep.subr.bf16.mxu1 %v5643_v40  ;;  %v4958_v40 = vld [vmem:[%s8805_s6 + $0x650] sm:$0xff] }
 0x45d   :  { %4857 = vmatprep.mubr.msk.f32.mxu1 %vm1614_vm4, %v7488_v12  ;;  %5646 = vmatpush1.bf16.msra.mxu1 %v5645_v41  ;;  %v4961_v41 = vld [vmem:[%s8805_s6 + $0x668] sm:$0xff]  ;;  %v5677_v53 = vpack.c.bf16 %v4958_v40, %v4956_v39 }
 0x45e   :  { %5648 = vmatprep.subr.bf16.mxu1 %v5647_v51  ;;  %v4963_v51 = vld [vmem:[%s8805_s6 + $0x678] sm:$0xff] }
 0x45f   :  { %v5679_v42 = vpack.c.bf16 %v4963_v51, %v4961_v41 }
 0x460   :  { %2532 = vmatmul.mubr.f32.gmra.mrb[108].mxu1 %v7491_v17 }
 0x461   :  { %4858 = vmatprep.mubr.msk.f32.mxu1 %vm1614_vm4, %v7512_v19  ;;  %5650 = vmatpush1.bf16.msra.mxu1 %v5649_v48  ;;  %v5681_v48 = vpack.c.bf16 %v4962_v47, %v4960_v44  ;;  %v4806_v44 = vld [vmem:[%s8806_s7 + $0x20] sm:$0xff]  ;;  %v4807_v47 = vld [vmem:[%s8806_s7 + $0x28] sm:$0xf] }
 0x462   :  { %5652 = vmatprep.subr.bf16.mxu1 %v5651_v50  ;;  %v4965_v50 = vld [vmem:[%s8805_s6 + $0x688] sm:$0xff] }
 0x464   :  { %2538 = vmatmul.mubr.f32.gmra.mrb[110].mxu1 %v7515_v20 }
 0x465   :  { %4859 = vmatprep.mubr.msk.f32.mxu1 %vm1614_vm4, %v7536_v30  ;;  %5654 = vmatpush1.bf16.msra.mxu1 %v5653_v6 }
 0x466   :  { %5656 = vmatprep.subr.bf16.mxu1 %v5655_v5 }
 0x468   :  { %2544 = vmatmul.mubr.f32.gmra.mrb[112].mxu1 %v7539_v36 }
 0x469   :  { %4860 = vmatprep.mubr.msk.f32.mxu1 %vm1614_vm4, %v7560_v43  ;;  %5658 = vmatpush1.bf16.msra.mxu1 %v5657_v8 }
 0x46a   :  { %5660 = vmatprep.subr.bf16.mxu1 %v5659_v4 }
 0x46c   :  { %2550 = vmatmul.mubr.f32.gmra.mrb[114].mxu1 %v7563_v46 }
 0x46d   :  { %4861 = vmatprep.mubr.msk.f32.mxu1 %vm1614_vm4, %v7584_v3  ;;  %5662 = vmatpush1.bf16.msra.mxu1 %v5661_v23 }
 0x46e   :  { %5664 = vmatprep.subr.bf16.mxu1 %v5663_v18 }
 0x470   :  { %2556 = vmatmul.mubr.f32.gmra.mrb[116].mxu1 %v7587_v16 }
 0x471   :  { %4862 = vmatprep.mubr.msk.f32.mxu1 %vm1614_vm4, %v7608_v31  ;;  %5666 = vmatpush1.bf16.msra.mxu1 %v5665_v14 }
 0x472   :  { %5668 = vmatprep.subr.bf16.mxu1 %v5667_v54 }
 0x474   :  { %2562 = vmatmul.mubr.f32.gmra.mrb[118].mxu1 %v7611_v0 }
 0x475   :  { %5670 = vmatpush1.bf16.msra.mxu1 %v5669_v22  ;;  %4966 = vmatprep.mubr.msk.f32.mxu1 %vm1614_vm4, %v7464_v61 }
 0x476   :  { %5672 = vmatprep.subr.bf16.mxu1 %v5671_v29 }
 0x479   :  { %5674 = vmatpush1.bf16.msra.mxu1 %v5673_v34 }
 0x47a   :  { %5676 = vmatprep.subr.bf16.mxu1 %v5675_v37 }
 0x47d   :  { %5678 = vmatpush1.bf16.msra.mxu1 %v5677_v53 }
 0x47e   :  { %5680 = vmatprep.subr.bf16.mxu1 %v5679_v42  ;;  %v4805_v42 = vld [vmem:[%s8806_s7 + $0x18] sm:$0xff] }
 0x481   :  { %5682 = vmatpush1.bf16.msra.mxu1 %v5681_v48  ;;  %v2077_v48 = vld [vmem:[%s8806_s7] sm:$0xff] }
 0x482   :  { %3005 = vmatprep.subr.mxu1 %v4965_v50 }
 0x485   :  { %3006 = vmatpush1.msra.mxu1 %v4964_v57 }
 0x486   :  { %3030 = vmatmul.mubr.f32.vlgmr.msra.gmra.mrb[120].mxu1 %v7467_v2 }
 0x487   :  { %4967 = vmatprep.mubr.msk.f32.mxu1 %vm1614_vm4, %v7488_v12 }
 0x48a   :  { %3036 = vmatmul.mubr.f32.gmra.mrb[122].mxu1 %v7491_v17 }
 0x48b   :  { %4968 = vmatprep.mubr.msk.f32.mxu1 %vm1614_vm4, %v7512_v19 }
 0x48e   :  { %3042 = vmatmul.mubr.f32.gmra.mrb[124].mxu1 %v7515_v20 }
 0x48f   :  { %4969 = vmatprep.mubr.msk.f32.mxu1 %vm1614_vm4, %v7536_v30 }
 0x492   :  { %3048 = vmatmul.mubr.f32.gmra.mrb[126].mxu1 %v7539_v36 }
 0x493   :  { %4970 = vmatprep.mubr.msk.f32.mxu1 %vm1614_vm4, %v7560_v43 }
 0x496   :  { %3054 = vmatmul.mubr.f32.gmra.mrb[128].mxu1 %v7563_v46 }
 0x497   :  { %4971 = vmatprep.mubr.msk.f32.mxu1 %vm1614_vm4, %v7584_v3 }
 0x49a   :  { %3060 = vmatmul.mubr.f32.gmra.mrb[130].mxu1 %v7587_v16 }
 0x49b   :  { %4972 = vmatprep.mubr.msk.f32.mxu1 %vm1614_vm4, %v7608_v31 }
 0x49e   :  { %3066 = vmatmul.mubr.f32.gmra.mrb[132].mxu1 %v7611_v0 }
 0x505   :  { %v2036_v52 = vpop.f32.mrb[30].mxu0  ;;  %v2189_v10 = vpop.f32.mrb[92].mxu1 }
 0x506   :  { %v2038_v63 = vpop.f32.mrb[31].mxu0  ;;  %v2191_v6 = vpop.f32.mrb[93].mxu1 }
 0x509   :  { %v2042_v5 = vpop.f32.mrb[32].mxu0  ;;  %v2195_v38 = vpop.f32.mrb[94].mxu1 }
 0x50a   :  { %v5529_v49 = vpack.c.bf16 %v2042_v5, %v2036_v52  ;;  %v5517_v9 = vpack.c.bf16 %v2195_v38, %v2189_v10  ;;  %v2044_v59 = vpop.f32.mrb[33].mxu0  ;;  %v2197_v8 = vpop.f32.mrb[95].mxu1  ;;  %v2078_v52 = vld [vmem:[%s8806_s7 + $0x8] sm:$0xff]  ;;  %v2079_v38 = vld [vmem:[%s8806_s7 + $0x10] sm:$0xf] }
 0x50b   :  { %v5527_v4 = vpack.c.bf16 %v2044_v59, %v2038_v63  ;;  %v5515_v11 = vpack.c.bf16 %v2197_v8, %v2191_v6 }
 0x50d   :  { %v2048_v58 = vpop.f32.mrb[34].mxu0  ;;  %v2201_v62 = vpop.f32.mrb[96].mxu1  ;;  %5516 = vmatprep.subr.bf16.mxu0 %v5515_v11 }
 0x50e   :  { %v2050_v24 = vpop.f32.mrb[35].mxu0  ;;  %v2203_v23 = vpop.f32.mrb[97].mxu1  ;;  %5518 = vmatpush1.bf16.msra.mxu0 %v5517_v9 }
 0x511   :  { %v2054_v18 = vpop.f32.mrb[36].mxu0  ;;  %v2207_v26 = vpop.f32.mrb[98].mxu1 }
 0x512   :  { %v5533_v56 = vpack.c.bf16 %v2054_v18, %v2048_v58  ;;  %v5521_v13 = vpack.c.bf16 %v2207_v26, %v2201_v62  ;;  %v2056_v55 = vpop.f32.mrb[37].mxu0  ;;  %v2209_v14 = vpop.f32.mrb[99].mxu1 }
 0x513   :  { %v5531_v54 = vpack.c.bf16 %v2056_v55, %v2050_v24  ;;  %v5519_v60 = vpack.c.bf16 %v2209_v14, %v2203_v23  ;;  %v4869_v14 = vld [vmem:[%s8805_s6 + $0x3f0] sm:$0xff] }
 0x515   :  { %v2060_v28 = vpop.f32.mrb[38].mxu0  ;;  %v2213_v15 = vpop.f32.mrb[100].mxu1  ;;  %5520 = vmatprep.subr.bf16.mxu0 %v5519_v60 }
 0x516   :  { %v2062_v21 = vpop.f32.mrb[39].mxu0  ;;  %v2215_v22 = vpop.f32.mrb[101].mxu1  ;;  %5522 = vmatpush1.bf16.msra.mxu0 %v5521_v13  ;;  %v4872_v13 = vld [vmem:[%s8805_s6 + $0x408] sm:$0xff] }
 0x519   :  { %v2066_v29 = vpop.f32.mrb[40].mxu0  ;;  %v2219_v25 = vpop.f32.mrb[102].mxu1 }
 0x51a   :  { %v5537_v1 = vpack.c.bf16 %v2066_v29, %v2060_v28  ;;  %v5525_v45 = vpack.c.bf16 %v2219_v25, %v2213_v15  ;;  %v2068_v27 = vpop.f32.mrb[41].mxu0  ;;  %v2221_v34 = vpop.f32.mrb[103].mxu1  ;;  %v4874_v28 = vld [vmem:[%s8805_s6 + $0x418] sm:$0xff]  ;;  %v4876_v15 = vld [vmem:[%s8805_s6 + $0x428] sm:$0xff] }
 0x51b   :  { %v5535_v37 = vpack.c.bf16 %v2068_v27, %v2062_v21  ;;  %v5523_v39 = vpack.c.bf16 %v2221_v34, %v2215_v22  ;;  %v4863_v22 = vld [vmem:[%s8806_s7 + $0x30] sm:$0xff]  ;;  %v5595_v25 = vpack.c.bf16 %v4876_v15, %v4874_v28  ;;  %v4878_v27 = vld [vmem:[%s8805_s6 + $0x438] sm:$0xff]  ;;  %v4880_v34 = vld [vmem:[%s8805_s6 + $0x448] sm:$0xff] }
 0x51c   :  { %v4900_v28 = vld [vmem:[%s8805_s6 + $0x4e8] sm:$0xff] }
 0x51d   :  { %v2072_v40 = vpop.f32.mrb[42].mxu0  ;;  %v2225_v41 = vpop.f32.mrb[104].mxu1  ;;  %5524 = vmatprep.subr.bf16.mxu0 %v5523_v39 }
 0x51e   :  { %v2074_v51 = vpop.f32.mrb[43].mxu0  ;;  %v2227_v53 = vpop.f32.mrb[105].mxu1  ;;  %5526 = vmatpush1.bf16.msra.mxu0 %v5525_v45  ;;  %v4875_v45 = vld [vmem:[%s8805_s6 + $0x420] sm:$0xff] }
 0x51f   :  { %2255 = vmatprep.subr.mxu0 %v2227_v53  ;;  %v4882_v53 = vld [vmem:[%s8805_s6 + $0x458] sm:$0xff] }
 0x522   :  { %2256 = vmatpush1.msra.mxu0 %v2225_v41  ;;  %v4877_v41 = vld [vmem:[%s8805_s6 + $0x430] sm:$0xff] }
 0x523   :  { %5528 = vmatprep.subr.bf16.mxu0 %v5527_v4  ;;  %4808 = vmatmul.mubr.msk.f32.vlgmr.msra.gmra.mrb[44].mxu0 %vm1764_vm1, %v4805_v42  ;;  %v4884_v42 = vld [vmem:[%s8805_s6 + $0x468] sm:$0xff] }
 0x524   :  { %5530 = vmatpush1.bf16.msra.mxu0 %v5529_v49  ;;  %2313 = vmatprep.mubr.f32.mxu0 %v6053_v7 }
 0x525   :  { %5532 = vmatprep.subr.bf16.mxu0 %v5531_v54  ;;  %v4871_v54 = vld [vmem:[%s8805_s6 + $0x400] sm:$0xff] }
 0x526   :  { %v5593_v29 = vpack.c.bf16 %v4871_v54, %v4869_v14  ;;  %v4893_v14 = vld [vmem:[%s8805_s6 + $0x4b0] sm:$0xff]  ;;  %v4895_v54 = vld [vmem:[%s8805_s6 + $0x4c0] sm:$0xff] }
 0x527   :  { %4809 = vmatmul.mubr.msk.f32.gmra.mrb[46].mxu0 %vm1764_vm1, %v4806_v44  ;;  %v4865_v44 = vld [vmem:[%s8806_s7 + $0x40] sm:$0xf] }
 0x528   :  { %5534 = vmatpush1.bf16.msra.mxu0 %v5533_v56  ;;  %2319 = vmatprep.mubr.f32.mxu0 %v6053_v7  ;;  %v4870_v56 = vld [vmem:[%s8805_s6 + $0x3f8] sm:$0xff] }
 0x529   :  { %5536 = vmatprep.subr.bf16.mxu0 %v5535_v37  ;;  %v5591_v21 = vpack.c.bf16 %v4872_v13, %v4870_v56  ;;  %v4864_v37 = vld [vmem:[%s8806_s7 + $0x38] sm:$0xff] }
 0x52b   :  { %4810 = vmatmul.mubr.msk.f32.gmra.mrb[48].mxu0 %vm1764_vm1, %v4807_v47 }
 0x52c   :  { %5538 = vmatpush1.bf16.msra.mxu0 %v5537_v1  ;;  %2399 = vmatprep.mubr.f32.mxu0 %v6053_v7  ;;  %v4873_v1 = vld [vmem:[%s8805_s6 + $0x410] sm:$0xff] }
 0x52d   :  { %2347 = vmatprep.subr.mxu0 %v2074_v51  ;;  %v5597_v39 = vpack.c.bf16 %v4875_v45, %v4873_v1  ;;  %v4879_v51 = vld [vmem:[%s8805_s6 + $0x440] sm:$0xff]  ;;  %v4902_v45 = vld [vmem:[%s8805_s6 + $0x4f8] sm:$0xff] }
 0x52e   :  { %v5601_v47 = vpack.c.bf16 %v4879_v51, %v4877_v41  ;;  %v4899_v1 = vld [vmem:[%s8805_s6 + $0x4e0] sm:$0xff] }
 0x52f   :  { %v2527_v50 = vpop.f32.mrb[106].mxu1 }
 0x530   :  { %v2529_v57 = vpop.f32.mrb[107].mxu1  ;;  %2348 = vmatpush1.msra.mxu0 %v2072_v40  ;;  %v5599_v40 = vpack.c.bf16 %v4880_v34, %v4878_v27  ;;  %v4904_v27 = vld [vmem:[%s8805_s6 + $0x508] sm:$0xff] }
 0x531   :  { %4811 = vmatmul.mubr.msk.f32.vlgmr.msra.gmra.mrb[44].mxu0 %vm1764_vm1, %v2077_v48  ;;  %v5603_v48 = vpack.c.bf16 %v4884_v42, %v4882_v53  ;;  %v5623_v51 = vpack.c.bf16 %v4904_v27, %v4902_v45  ;;  %v4901_v53 = vld [vmem:[%s8805_s6 + $0x4f0] sm:$0xff]  ;;  %v4903_v42 = vld [vmem:[%s8805_s6 + $0x500] sm:$0xff] }
 0x532   :  { %2405 = vmatprep.mubr.f32.mxu0 %v6053_v7 }
 0x533   :  { %v2533_v10 = vpop.f32.mrb[108].mxu1 }
 0x534   :  { %v5581_v63 = vpack.c.bf16 %v2533_v10, %v2527_v50  ;;  %v2535_v6 = vpop.f32.mrb[109].mxu1  ;;  %v4881_v50 = vld [vmem:[%s8805_s6 + $0x450] sm:$0xff]  ;;  %v4888_v10 = vld [vmem:[%s8805_s6 + $0x488] sm:$0xff] }
 0x535   :  { %v5579_v5 = vpack.c.bf16 %v2535_v6, %v2529_v57  ;;  %4812 = vmatmul.mubr.msk.f32.gmra.mrb[46].mxu0 %vm1764_vm1, %v2078_v52  ;;  %v4883_v57 = vld [vmem:[%s8805_s6 + $0x460] sm:$0xff]  ;;  %v4886_v52 = vld [vmem:[%s8805_s6 + $0x478] sm:$0xff] }
 0x536   :  { %2411 = vmatprep.mubr.f32.mxu0 %v6053_v7  ;;  %v5607_v6 = vpack.c.bf16 %v4888_v10, %v4886_v52  ;;  %v4905_v10 = vld [vmem:[%s8805_s6 + $0x510] sm:$0xff] }
 0x537   :  { %v2539_v49 = vpop.f32.mrb[110].mxu1  ;;  %5580 = vmatprep.subr.bf16.mxu0 %v5579_v5  ;;  %v4885_v5 = vld [vmem:[%s8805_s6 + $0x470] sm:$0xff] }
 0x538   :  { %v2541_v9 = vpop.f32.mrb[111].mxu1  ;;  %5582 = vmatpush1.bf16.msra.mxu0 %v5581_v63  ;;  %v5605_v63 = vpack.c.bf16 %v4883_v57, %v4881_v50  ;;  %v5625_v57 = vpack.c.bf16 %v4903_v42, %v4901_v53  ;;  %v3231_v53 = vld [vmem:[%s8808_s9 + $0xa8] sm:$0xff]  ;;  %v3233_v42 = vld [vmem:[%s8808_s9 + $0xb8] sm:$0xff] }
 0x539   :  { %4813 = vmatmul.mubr.msk.f32.gmra.mrb[48].mxu0 %vm1764_vm1, %v2079_v38  ;;  %v4887_v38 = vld [vmem:[%s8805_s6 + $0x480] sm:$0xff] }
 0x53a   :  { %2645 = vmatprep.mubr.f32.mxu0 %v6053_v7 }
 0x53b   :  { %v2545_v59 = vpop.f32.mrb[112].mxu1 }
 0x53c   :  { %v5585_v8 = vpack.c.bf16 %v2545_v59, %v2539_v49  ;;  %v2547_v4 = vpop.f32.mrb[113].mxu1  ;;  %v4890_v49 = vld [vmem:[%s8805_s6 + $0x498] sm:$0xff] }
 0x53d   :  { %v5583_v11 = vpack.c.bf16 %v2547_v4, %v2541_v9  ;;  %v4892_v9 = vld [vmem:[%s8805_s6 + $0x4a8] sm:$0xff] }
 0x53e   :  { %v5611_v4 = vpack.c.bf16 %v4892_v9, %v4890_v49 }
 0x53f   :  { %v2551_v58 = vpop.f32.mrb[114].mxu1  ;;  %5584 = vmatprep.subr.bf16.mxu0 %v5583_v11  ;;  %v4889_v11 = vld [vmem:[%s8805_s6 + $0x490] sm:$0xff] }
 0x540   :  { %v2553_v62 = vpop.f32.mrb[115].mxu1  ;;  %5586 = vmatpush1.bf16.msra.mxu0 %v5585_v8  ;;  %v5609_v8 = vpack.c.bf16 %v4887_v38, %v4885_v5 }
 0x543   :  { %v2557_v24 = vpop.f32.mrb[116].mxu1 }
 0x544   :  { %v5589_v23 = vpack.c.bf16 %v2557_v24, %v2551_v58  ;;  %v2559_v18 = vpop.f32.mrb[117].mxu1  ;;  %v4891_v58 = vld [vmem:[%s8805_s6 + $0x4a0] sm:$0xff]  ;;  %v4896_v24 = vld [vmem:[%s8805_s6 + $0x4c8] sm:$0xff] }
 0x545   :  { %v5587_v26 = vpack.c.bf16 %v2559_v18, %v2553_v62  ;;  %v4894_v62 = vld [vmem:[%s8805_s6 + $0x4b8] sm:$0xff]  ;;  %v5613_v56 = vpack.c.bf16 %v4891_v58, %v4889_v11  ;;  %v4909_v58 = vld [vmem:[%s8805_s6 + $0x530] sm:$0xff] }
 0x547   :  { %v2563_v55 = vpop.f32.mrb[118].mxu1  ;;  %5588 = vmatprep.subr.bf16.mxu0 %v5587_v26 }
 0x548   :  { %v2565_v60 = vpop.f32.mrb[119].mxu1  ;;  %5590 = vmatpush1.bf16.msra.mxu0 %v5589_v23 }
 0x549   :  { %2593 = vmatprep.subr.mxu0 %v2565_v60  ;;  %v4898_v60 = vld [vmem:[%s8805_s6 + $0x4d8] sm:$0xff] }
 0x54c   :  { %2594 = vmatpush1.msra.mxu0 %v2563_v55  ;;  %v5615_v55 = vpack.c.bf16 %v4896_v24, %v4894_v62 }
 0x54d   :  { %4866 = vmatmul.mubr.msk.f32.vlgmr.msra.gmra.mrb[44].mxu0 %vm1764_vm1, %v4863_v22  ;;  %5592 = vmatprep.subr.bf16.mxu0 %v5591_v21  ;;  %v5617_v22 = vpack.c.bf16 %v4895_v54, %v4893_v14  ;;  %v3223_v14 = vld [vmem:[%s8808_s9 + $0x68] sm:$0xff]  ;;  %v3225_v54 = vld [vmem:[%s8808_s9 + $0x78] sm:$0xff] }
 0x54e   :  { %5594 = vmatpush1.bf16.msra.mxu0 %v5593_v29  ;;  %2651 = vmatprep.mubr.f32.mxu0 %v6053_v7  ;;  %v5619_v29 = vpack.c.bf16 %v4900_v28, %v4898_v60  ;;  %v5707_v28 = vpack.c.bf16 %v3225_v54, %v3223_v14 }
 0x54f   :  { %5596 = vmatprep.subr.bf16.mxu0 %v5595_v25  ;;  %v4897_v25 = vld [vmem:[%s8805_s6 + $0x4d0] sm:$0xff] }
 0x551   :  { %4867 = vmatmul.mubr.msk.f32.gmra.mrb[46].mxu0 %vm1764_vm1, %v4864_v37 }
 0x552   :  { %5598 = vmatpush1.bf16.msra.mxu0 %v5597_v39  ;;  %2657 = vmatprep.mubr.f32.mxu0 %v6053_v7 }
 0x553   :  { %5600 = vmatprep.subr.bf16.mxu0 %v5599_v40  ;;  %v5621_v40 = vpack.c.bf16 %v4899_v1, %v4897_v25  ;;  %v3227_v25 = vld [vmem:[%s8808_s9 + $0x88] sm:$0xff]  ;;  %v3229_v1 = vld [vmem:[%s8808_s9 + $0x98] sm:$0xff] }
 0x554   :  { %v5711_v27 = vpack.c.bf16 %v3229_v1, %v3227_v25 }
 0x555   :  { %4868 = vmatmul.mubr.msk.f32.gmra.mrb[48].mxu0 %vm1764_vm1, %v4865_v44  ;;  %v4906_v44 = vld [vmem:[%s8805_s6 + $0x518] sm:$0xff] }
 0x556   :  { %5602 = vmatpush1.bf16.msra.mxu0 %v5601_v47  ;;  %4911 = vmatprep.mubr.msk.f32.mxu0 %vm1614_vm4, %v7464_v61  ;;  %v4908_v47 = vld [vmem:[%s8805_s6 + $0x528] sm:$0xff] }
 0x557   :  { %5604 = vmatprep.subr.bf16.mxu0 %v5603_v48  ;;  %v5627_v52 = vpack.c.bf16 %v4908_v47, %v4906_v44  ;;  %v5715_v47 = vpack.c.bf16 %v3233_v42, %v3231_v53  ;;  %v4919_v53 = vld [vmem:[%s8806_s7 + $0x50] sm:$0xff] }
 0x559   :  { %v7936_v61 = vpop.f32.mrb[120].mxu1 }
 0x55a   :  { %5606 = vmatpush1.bf16.msra.mxu0 %v5605_v63  ;;  %v7938_v59 = vpop.f32.mrb[121].mxu1  ;;  %v4907_v63 = vld [vmem:[%s8805_s6 + $0x520] sm:$0xff] }
 0x55b   :  { %5608 = vmatprep.subr.bf16.mxu0 %v5607_v6  ;;  %v5629_v49 = vpack.c.bf16 %v4907_v63, %v4905_v10  ;;  %v3235_v10 = vld [vmem:[%s8808_s9 + $0xc8] sm:$0xff]  ;;  %v3237_v63 = vld [vmem:[%s8808_s9 + $0xd8] sm:$0xff] }
 0x55d   :  { %v7952_v23 = vpop.f32.mrb[122].mxu1 }
 0x55e   :  { %v5685_v18 = vpack.c.bf16 %v7952_v23, %v7936_v61  ;;  %5610 = vmatpush1.bf16.msra.mxu0 %v5609_v8  ;;  %v7956_v26 = vpop.f32.mrb[123].mxu1  ;;  %v4910_v8 = vld [vmem:[%s8805_s6 + $0x538] sm:$0xff]  ;;  %v4974_v23 = vld [vmem:[%s8806_s7 + $0x68] sm:$0xff] }
 0x55f   :  { %v5683_v13 = vpack.c.bf16 %v7956_v26, %v7938_v59  ;;  %5612 = vmatprep.subr.bf16.mxu0 %v5611_v4  ;;  %v4920_v61 = vld [vmem:[%s8806_s7 + $0x58] sm:$0xf]  ;;  %v4973_v59 = vld [vmem:[%s8806_s7 + $0x60] sm:$0xff]  ;;  %v3243_v26 = vld [vmem:[%s8808_s9 + $0x108] sm:$0xff] }
 0x561   :  { %v7972_v15 = vpop.f32.mrb[124].mxu1 }
 0x562   :  { %5614 = vmatpush1.bf16.msra.mxu0 %v5613_v56  ;;  %v7974_v21 = vpop.f32.mrb[125].mxu1  ;;  %v3218_v56 = vld [vmem:[%s8808_s9 + $0x40] sm:$0xff] }
 0x563   :  { %5616 = vmatprep.subr.bf16.mxu0 %v5615_v55  ;;  %v3220_v55 = vld [vmem:[%s8808_s9 + $0x50] sm:$0xff] }
 0x564   :  { %v5705_v60 = vpack.c.bf16 %v3220_v55, %v3218_v56 }
 0x565   :  { %v7988_v34 = vpop.f32.mrb[126].mxu1 }
 0x566   :  { %v5689_v37 = vpack.c.bf16 %v7988_v34, %v7972_v15  ;;  %5618 = vmatpush1.bf16.msra.mxu0 %v5617_v22  ;;  %v7992_v39 = vpop.f32.mrb[127].mxu1  ;;  %v3222_v22 = vld [vmem:[%s8808_s9 + $0x60] sm:$0xff]  ;;  %v3244_v34 = vld [vmem:[%s8808_s9 + $0x110] sm:$0xff] }
 0x567   :  { %v5687_v41 = vpack.c.bf16 %v7992_v39, %v7974_v21  ;;  %5620 = vmatprep.subr.bf16.mxu0 %v5619_v29  ;;  %v3224_v29 = vld [vmem:[%s8808_s9 + $0x70] sm:$0xff]  ;;  %v3242_v21 = vld [vmem:[%s8808_s9 + $0x100] sm:$0xff]  ;;  %v3247_v39 = vld [vmem:[%s8808_s9 + $0x128] sm:$0xff] }
 0x568   :  { %v5709_v45 = vpack.c.bf16 %v3224_v29, %v3222_v22 }
 0x569   :  { %v8008_v48 = vpop.f32.mrb[128].mxu1 }
 0x56a   :  { %5622 = vmatpush1.bf16.msra.mxu0 %v5621_v40  ;;  %v8010_v50 = vpop.f32.mrb[129].mxu1  ;;  %v3226_v40 = vld [vmem:[%s8808_s9 + $0x80] sm:$0xff] }
 0x56b   :  { %5624 = vmatprep.subr.bf16.mxu0 %v5623_v51  ;;  %v3228_v51 = vld [vmem:[%s8808_s9 + $0x90] sm:$0xff] }
 0x56c   :  { %v5713_v44 = vpack.c.bf16 %v3228_v51, %v3226_v40  ;;  %v4918_v51 = vld [vmem:[%s8806_s7 + $0x48] sm:$0xff] }
 0x56d   :  { %v8018_v6 = vpop.f32.mrb[130].mxu1 }
 0x56e   :  { %v5693_v5 = vpack.c.bf16 %v8018_v6, %v8008_v48  ;;  %5626 = vmatpush1.bf16.msra.mxu0 %v5625_v57  ;;  %v8022_v38 = vpop.f32.mrb[131].mxu1  ;;  %v3230_v57 = vld [vmem:[%s8808_s9 + $0xa0] sm:$0xff]  ;;  %v3248_v6 = vld [vmem:[%s8808_s9 + $0x130] sm:$0xff] }
 0x56f   :  { %v5691_v9 = vpack.c.bf16 %v8022_v38, %v8010_v50  ;;  %5628 = vmatprep.subr.bf16.mxu0 %v5627_v52  ;;  %v3232_v52 = vld [vmem:[%s8808_s9 + $0xb0] sm:$0xff]  ;;  %v3246_v50 = vld [vmem:[%s8808_s9 + $0x120] sm:$0xff] }
 0x570   :  { %v3174_v38 = vld [vmem:[%s8807_s8] sm:$0x3] }
 0x571   :  { %v8029_v4 = vpop.f32.mrb[132].mxu1 }
 0x572   :  { %5630 = vmatpush1.bf16.msra.mxu0 %v5629_v49  ;;  %v8031_v11 = vpop.f32.mrb[133].mxu1  ;;  %v5717_v49 = vpack.c.bf16 %v3232_v52, %v3230_v57 }
 0x573   :  { %2753 = vmatprep.subr.mxu0 %v4910_v8  ;;  %v5719_v8 = vpack.c.bf16 %v3237_v63, %v3235_v10 }
 0x576   :  { %2754 = vmatpush1.msra.mxu0 %v4909_v58  ;;  %v3234_v58 = vld [vmem:[%s8808_s9 + $0xc0] sm:$0xff] }
 0x577   :  { %2778 = vmatmul.mubr.f32.vlgmr.msra.gmra.mrb[50].mxu0 %v7467_v2  ;;  %v3211_v2 = vld [vmem:[%s8808_s9 + $0x8] sm:$0xff] }
 0x578   :  { %4912 = vmatprep.mubr.msk.f32.mxu0 %vm1614_vm4, %v7488_v12  ;;  %v3213_v12 = vld [vmem:[%s8808_s9 + $0x18] sm:$0xff] }
 0x57b   :  { %2784 = vmatmul.mubr.f32.gmra.mrb[52].mxu0 %v7491_v17  ;;  %v3210_v17 = vld [vmem:[%s8808_s9] sm:$0xff] }
 0x57c   :  { %4913 = vmatprep.mubr.msk.f32.mxu0 %vm1614_vm4, %v7512_v19  ;;  %v5695_v19 = vpack.c.bf16 %v3213_v12, %v3211_v2  ;;  %v3236_v2 = vld [vmem:[%s8808_s9 + $0xd0] sm:$0xff]  ;;  %v3239_v12 = vld [vmem:[%s8808_s9 + $0xe8] sm:$0xff] }
 0x57e   :  { %5696 = vmatprep.subr.bf16.mxu1 %v5695_v19  ;;  %v5721_v19 = vpack.c.bf16 %v3236_v2, %v3234_v58 }
 0x57f   :  { %2790 = vmatmul.mubr.f32.gmra.mrb[54].mxu0 %v7515_v20  ;;  %v3212_v20 = vld [vmem:[%s8808_s9 + $0x10] sm:$0xff] }
 0x580   :  { %4914 = vmatprep.mubr.msk.f32.mxu0 %vm1614_vm4, %v7536_v30  ;;  %v3215_v30 = vld [vmem:[%s8808_s9 + $0x28] sm:$0xff] }
 0x583   :  { %2796 = vmatmul.mubr.f32.gmra.mrb[56].mxu0 %v7539_v36  ;;  %v3217_v36 = vld [vmem:[%s8808_s9 + $0x38] sm:$0xff] }
 0x584   :  { %4915 = vmatprep.mubr.msk.f32.mxu0 %vm1614_vm4, %v7560_v43  ;;  %v5697_v43 = vpack.c.bf16 %v3212_v20, %v3210_v17  ;;  %v3241_v17 = vld [vmem:[%s8808_s9 + $0xf8] sm:$0xff] }
 0x585   :  { %v5723_v20 = vpack.c.bf16 %v3241_v17, %v3239_v12 }
 0x586   :  { %5698 = vmatpush1.bf16.msra.mxu1 %v5697_v43 }
 0x587   :  { %2802 = vmatmul.mubr.f32.gmra.mrb[58].mxu0 %v7563_v46  ;;  %v5699_v46 = vpack.c.bf16 %v3217_v36, %v3215_v30  ;;  %v3238_v30 = vld [vmem:[%s8808_s9 + $0xe0] sm:$0xff]  ;;  %v3240_v36 = vld [vmem:[%s8808_s9 + $0xf0] sm:$0xff] }
 0x588   :  { %4916 = vmatprep.mubr.msk.f32.mxu0 %vm1614_vm4, %v7584_v3  ;;  %v3214_v3 = vld [vmem:[%s8808_s9 + $0x20] sm:$0xff]  ;;  %v5725_v43 = vpack.c.bf16 %v3240_v36, %v3238_v30 }
 0x589   :  { %5700 = vmatprep.subr.bf16.mxu1 %v5699_v46 }
 0x58b   :  { %2808 = vmatmul.mubr.f32.gmra.mrb[60].mxu0 %v7587_v16  ;;  %v3216_v16 = vld [vmem:[%s8808_s9 + $0x30] sm:$0xff] }
 0x58c   :  { %4917 = vmatprep.mubr.msk.f32.mxu0 %vm1614_vm4, %v7608_v31  ;;  %v3219_v31 = vld [vmem:[%s8808_s9 + $0x48] sm:$0xff]  ;;  %v5701_v62 = vpack.c.bf16 %v3216_v16, %v3214_v3  ;;  %vm3250_vm4 = vcmask 261120  }
 0x58e   :  { %5702 = vmatpush1.bf16.msra.mxu1 %v5701_v62 }
 0x58f   :  { %2814 = vmatmul.mubr.f32.gmra.mrb[62].mxu0 %v7611_v0  ;;  %v3221_v0 = vld [vmem:[%s8808_s9 + $0x58] sm:$0xff] }
 0x590   :  { %2897 = vmatprep.mubr.f32.mxu0 %v6053_v7  ;;  %v5703_v24 = vpack.c.bf16 %v3221_v0, %v3219_v31 }
 0x592   :  { %5704 = vmatprep.subr.bf16.mxu1 %v5703_v24 }
 0x593   :  { %5706 = vmatpush1.bf16.msra.mxu1 %v5705_v60 }
 0x594   :  { %5708 = vmatprep.subr.bf16.mxu1 %v5707_v28 }
 0x597   :  { %5710 = vmatpush1.bf16.msra.mxu1 %v5709_v45 }
 0x598   :  { %5712 = vmatprep.subr.bf16.mxu1 %v5711_v27 }
 0x59b   :  { %5714 = vmatpush1.bf16.msra.mxu1 %v5713_v44 }
 0x59c   :  { %5716 = vmatprep.subr.bf16.mxu1 %v5715_v47 }
 0x59f   :  { %5718 = vmatpush1.bf16.msra.mxu1 %v5717_v49 }
 0x5a0   :  { %5720 = vmatprep.subr.bf16.mxu1 %v5719_v8 }
 0x5a3   :  { %5722 = vmatpush1.bf16.msra.mxu1 %v5721_v19 }
 0x5a4   :  { %5724 = vmatprep.subr.bf16.mxu1 %v5723_v20 }
 0x5a7   :  { %5726 = vmatpush1.bf16.msra.mxu1 %v5725_v43 }
 0x64a   :  { %v2779_v46 = vpop.f32.mrb[50].mxu0 }
 0x64b   :  { %v2781_v3 = vpop.f32.mrb[51].mxu0 }
 0x64e   :  { %v2785_v16 = vpop.f32.mrb[52].mxu0 }
 0x64f   :  { %v5633_v31 = vpack.c.bf16 %v2785_v16, %v2779_v46  ;;  %v2787_v0 = vpop.f32.mrb[53].mxu0  ;;  %v4994_v16 = vld [vmem:[%s8810_s11 + $0xa0] sm:$0xff] }
 0x650   :  { %v5631_v62 = vpack.c.bf16 %v2787_v0, %v2781_v3  ;;  %v4996_v0 = vld [vmem:[%s8810_s11 + $0xb0] sm:$0xff] }
 0x652   :  { %v2791_v24 = vpop.f32.mrb[54].mxu0  ;;  %5632 = vmatprep.subr.bf16.mxu0 %v5631_v62  ;;  %v6054_v62 = vmov 0.0|0.0  }
 0x653   :  { %v2793_v56 = vpop.f32.mrb[55].mxu0  ;;  %5634 = vmatpush1.bf16.msra.mxu0 %v5633_v31  ;;  %v4995_v31 = vld [vmem:[%s8810_s11 + $0xa8] sm:$0xff] }
 0x656   :  { %v2797_v55 = vpop.f32.mrb[56].mxu0 }
 0x657   :  { %v5637_v14 = vpack.c.bf16 %v2797_v55, %v2791_v24  ;;  %v2799_v54 = vpop.f32.mrb[57].mxu0  ;;  %v5748_v24 = vpack.c.bf16 %v4995_v31, %v4994_v16  ;;  %v3539_v16 = vld [vmem:[%s8810_s11] sm:$0xff]  ;;  %v3540_v31 = vld [vmem:[%s8810_s11 + $0x8] sm:$0xff] }
 0x658   :  { %v5635_v60 = vpack.c.bf16 %v2799_v54, %v2793_v56  ;;  %v4997_v56 = vld [vmem:[%s8810_s11 + $0xb8] sm:$0xff]  ;;  %v4999_v54 = vld [vmem:[%s8810_s11 + $0xc8] sm:$0xff] }
 0x659   :  { %v5751_v55 = vpack.c.bf16 %v4997_v56, %v4996_v0  ;;  %v4990_v0 = vld [vmem:[%s8811_s12 + $0x2] sm:$0x3]  ;;  %v3541_v56 = vld [vmem:[%s8810_s11 + $0x10] sm:$0xff] }
 0x65a   :  { %v2803_v28 = vpop.f32.mrb[58].mxu0  ;;  %5636 = vmatprep.subr.bf16.mxu0 %v5635_v60 }
 0x65b   :  { %v2805_v22 = vpop.f32.mrb[59].mxu0  ;;  %5638 = vmatpush1.bf16.msra.mxu0 %v5637_v14  ;;  %v4998_v14 = vld [vmem:[%s8810_s11 + $0xc0] sm:$0xff] }
 0x65c   :  { %v5754_v60 = vpack.c.bf16 %v4999_v54, %v4998_v14  ;;  %v3543_v54 = vld [vmem:[%s8810_s11 + $0x20] sm:$0xff] }
 0x65e   :  { %v2809_v29 = vpop.f32.mrb[60].mxu0 }
 0x65f   :  { %v5641_v25 = vpack.c.bf16 %v2809_v29, %v2803_v28  ;;  %v2811_v1 = vpop.f32.mrb[61].mxu0  ;;  %v5000_v28 = vld [vmem:[%s8810_s11 + $0xd0] sm:$0xff] }
 0x660   :  { %v5639_v45 = vpack.c.bf16 %v2811_v1, %v2805_v22  ;;  %v5001_v22 = vld [vmem:[%s8810_s11 + $0xd8] sm:$0xff]  ;;  %v5003_v1 = vld [vmem:[%s8810_s11 + $0xe8] sm:$0xff] }
 0x661   :  { %v5757_v29 = vpack.c.bf16 %v5001_v22, %v5000_v28  ;;  %v3545_v22 = vld [vmem:[%s8810_s11 + $0x30] sm:$0xff] }
 0x662   :  { %v2815_v27 = vpop.f32.mrb[62].mxu0  ;;  %5640 = vmatprep.subr.bf16.mxu0 %v5639_v45 }
 0x663   :  { %v2817_v40 = vpop.f32.mrb[63].mxu0  ;;  %5642 = vmatpush1.bf16.msra.mxu0 %v5641_v25  ;;  %v5002_v25 = vld [vmem:[%s8810_s11 + $0xe0] sm:$0xff] }
 0x664   :  { %2845 = vmatprep.subr.mxu0 %v2817_v40  ;;  %v5760_v45 = vpack.c.bf16 %v5003_v1, %v5002_v25  ;;  %v5005_v40 = vld [vmem:[%s8810_s11 + $0xf8] sm:$0xff]  ;;  %v3547_v1 = vld [vmem:[%s8810_s11 + $0x40] sm:$0xff] }
 0x667   :  { %2846 = vmatpush1.msra.mxu0 %v2815_v27  ;;  %v5004_v27 = vld [vmem:[%s8810_s11 + $0xf0] sm:$0xff] }
 0x668   :  { %5684 = vmatprep.subr.bf16.mxu0 %v5683_v13  ;;  %4921 = vmatmul.mubr.msk.f32.vlgmr.msra.gmra.mrb[44].mxu0 %vm1764_vm1, %v4918_v51  ;;  %v3245_v13 = vld [vmem:[%s8808_s9 + $0x118] sm:$0xff]  ;;  %v5763_v51 = vpack.c.bf16 %v5005_v40, %v5004_v27  ;;  %v3549_v40 = vld [vmem:[%s8810_s11 + $0x50] sm:$0xff] }
 0x669   :  { %5686 = vmatpush1.bf16.msra.mxu0 %v5685_v18  ;;  %2903 = vmatprep.mubr.f32.mxu0 %v6053_v7  ;;  %v4975_v18 = vld [vmem:[%s8806_s7 + $0x70] sm:$0xf]  ;;  %v5727_v15 = vpack.c.bf16 %v3245_v13, %v3243_v26 }
 0x66a   :  { %5688 = vmatprep.subr.bf16.mxu0 %v5687_v41  ;;  %v3249_v41 = vld [vmem:[%s8808_s9 + $0x138] sm:$0xff] }
 0x66b   :  { %5728 = vmatprep.subr.bf16.mxu1 %v5727_v15  ;;  %v5731_v48 = vpack.c.bf16 %v3249_v41, %v3247_v39 }
 0x66c   :  { %4922 = vmatmul.mubr.msk.f32.gmra.mrb[46].mxu0 %vm1764_vm1, %v4919_v53  ;;  %v5006_v53 = vld [vmem:[%s8810_s11 + $0x100] sm:$0xff] }
 0x66d   :  { %5690 = vmatpush1.bf16.msra.mxu0 %v5689_v37  ;;  %2909 = vmatprep.mubr.f32.mxu0 %v6053_v7  ;;  %v5729_v37 = vpack.c.bf16 %v3244_v34, %v3242_v21 }
 0x66e   :  { %5692 = vmatprep.subr.bf16.mxu0 %v5691_v9  ;;  %v3179_v9 = vrot.slane %v3174_v38, %v1508_v33 }
 0x66f   :  { %5730 = vmatpush1.bf16.msra.mxu1 %v5729_v37 }
 0x670   :  { %4923 = vmatmul.mubr.msk.f32.gmra.mrb[48].mxu0 %vm1764_vm1, %v4920_v61  ;;  %5732 = vmatprep.subr.bf16.mxu1 %v5731_v48  ;;  %v5007_v61 = vld [vmem:[%s8810_s11 + $0x108] sm:$0xff] }
 0x671   :  { %5694 = vmatpush1.bf16.msra.mxu0 %v5693_v5  ;;  %3149 = vmatprep.mubr.f32.mxu0 %v6053_v7  ;;  %v5733_v5 = vpack.c.bf16 %v3248_v6, %v3246_v50 }
 0x672   :  { %3097 = vmatprep.subr.mxu0 %v8031_v11 }
 0x673   :  { %5734 = vmatpush1.bf16.msra.mxu1 %v5733_v5 }
 0x674   :  { %5747 = vmatprep.subr.bf16.mxu1 %v6054_v62 }
 0x675   :  { %3098 = vmatpush1.msra.mxu0 %v8029_v4  ;;  %v3183_v4 = vrot.slane %v3174_v38, %v1512_v35  ;;  %v3349_v38 = vld [vmem:[%s8809_s10] sm:$0xff] }
 0x676   :  { %4976 = vmatmul.mubr.msk.f32.vlgmr.msra.gmra.mrb[44].mxu0 %vm1764_vm1, %v4973_v59  ;;  %v5766_v59 = vpack.c.bf16 %v5007_v61, %v5006_v53  ;;  %v3551_v61 = vld [vmem:[%s8810_s11 + $0x60] sm:$0xff] }
 0x677   :  { %3155 = vmatprep.mubr.f32.mxu0 %v6053_v7 }
 0x67a   :  { %4977 = vmatmul.mubr.msk.f32.gmra.mrb[46].mxu0 %vm1764_vm1, %v4974_v23 }
 0x67b   :  { %3161 = vmatprep.mubr.f32.mxu0 %v6053_v7 }
 0x67e   :  { %4978 = vmatmul.mubr.msk.f32.gmra.mrb[48].mxu0 %vm1764_vm1, %v4975_v18 }
 0x67f   :  { %3433 = vmatprep.mubr.f32.mxu0 %v6053_v7 }
 0x749   :  { %v3151_v11 = vpop.f32.mrb[44].mxu0 }
 0x74a   :  { %v3186_v42 = vadd.f32 %v3179_v9, %v3151_v11  ;;  %v3153_v44 = vpop.f32.mrb[45].mxu0  ;;  %v5008_v11 = vld [vmem:[%s8810_s11 + $0x110] sm:$0xff] }
 0x74b   :  { %v3187_v47 = vadd.f32 %v3183_v4, %v3153_v44 }
 0x74c   :  { %v3198_v57 = vmul.f32 0.01, %v3186_v42  ;;  %vm3192_vm2 = vcmp.gt.f32.partialorder %v3186_v42, 0.0 }
 0x74d   :  { %vm3193_vm3 = vcmp.gt.f32.partialorder %v3187_v47, 0.0  ;;  %v3199_v52 = vmul.f32 0.01, %v3187_v47  ;;  %v3157_v10 = vpop.f32.mrb[46].mxu0 }
 0x74e   :  { %v3188_v63 = vadd.f32 %v3179_v9, %v3157_v10  ;;  %v3159_v49 = vpop.f32.mrb[47].mxu0  ;;  %v8235_v2 = vsel %vm3192_vm2, %v3186_v42, %v3198_v57  ;;  %v5009_v42 = vld [vmem:[%s8810_s11 + $0x118] sm:$0xff]  ;;  %v5011_v57 = vld [vmem:[%s8810_s11 + $0x128] sm:$0xff]  ;;  %v5012_v10 = vld [vmem:[%s8810_s11 + $0x130] sm:$0xff] }
 0x74f   :  { %v3189_v8 = vadd.f32 %v3183_v4, %v3159_v49  ;;  %v8233_v58 = vsel %vm3193_vm3, %v3187_v47, %v3199_v52  ;;  %v5769_v44 = vpack.c.bf16 %v5009_v42, %v5008_v11  ;;  %v5010_v47 = vld [vmem:[%s8810_s11 + $0x120] sm:$0xff] }
 0x750   :  { %v3200_v33 = vmul.f32 0.01, %v3188_v63  ;;  %4979 = vmatprep.mubr.msk.f32.mxu1 %vm3250_vm4, %v8233_v58  ;;  %vm3194_vm6 = vcmp.gt.f32.partialorder %v3188_v63, 0.0  ;;  %v5772_v52 = vpack.c.bf16 %v5011_v57, %v5010_v47  ;;  %v5024_v42 = vld [vmem:[%s8810_s11 + $0x160] sm:$0xff] }
 0x751   :  { %vm3195_vm5 = vcmp.gt.f32.partialorder %v3189_v8, 0.0  ;;  %v3201_v32 = vmul.f32 0.01, %v3189_v8  ;;  %v3163_v35 = vpop.f32.mrb[48].mxu0  ;;  %3325 = vmatmul.mubr.f32.vlgmr.msra.gmra.mrb[134].mxu1 %v8235_v2 }
 0x752   :  { %v3190_v12 = vadd.f32 %v3179_v9, %v3163_v35  ;;  %v3165_v17 = vpop.f32.mrb[49].mxu0  ;;  %v3206_v36 = vsel %vm3194_vm6, %v3188_v63, %v3200_v33  ;;  %5749 = vmatpush1.bf16.msra.mxu1 %v5748_v24  ;;  %v3350_v9 = vld [vmem:[%s8809_s10 + $0x8] sm:$0xff]  ;;  %v5013_v63 = vld [vmem:[%s8810_s11 + $0x138] sm:$0xff]  ;;  %v5778_v24 = vpack.c.bf16 %v3540_v31, %v3539_v16  ;;  %v5047_v16 = vld [vmem:[%s8810_s11 + $0x1f0] sm:$0xff] }
 0x753   :  { %v3191_v19 = vadd.f32 %v3183_v4, %v3165_v17  ;;  %v3207_v20 = vsel %vm3195_vm5, %v3189_v8, %v3201_v32  ;;  %5750 = vmatprep.subr.bf16.mxu1 %v6054_v62  ;;  %v3351_v4 = vld [vmem:[%s8809_s10 + $0x10] sm:$0xf]  ;;  %v5775_v49 = vpack.c.bf16 %v5013_v63, %v5012_v10  ;;  %v5027_v63 = vld [vmem:[%s8810_s11 + $0x178] sm:$0xff] }
 0x754   :  { %v3202_v30 = vmul.f32 0.01, %v3190_v12  ;;  %4980 = vmatprep.mubr.msk.f32.mxu1 %vm3250_vm4, %v3207_v20  ;;  %vm3196_vm8 = vcmp.gt.f32.partialorder %v3190_v12, 0.0  ;;  %v5026_v10 = vld [vmem:[%s8810_s11 + $0x170] sm:$0xff]  ;;  %v5048_v31 = vld [vmem:[%s8810_s11 + $0x1f8] sm:$0xff] }
 0x755   :  { %vm3197_vm7 = vcmp.gt.f32.partialorder %v3191_v19, 0.0  ;;  %v3203_v43 = vmul.f32 0.01, %v3191_v19  ;;  %3331 = vmatmul.mubr.f32.gmra.mrb[136].mxu1 %v3206_v36 }
 0x756   :  { %v3208_v3 = vsel %vm3196_vm8, %v3190_v12, %v3202_v30  ;;  %5752 = vmatpush1.bf16.msra.mxu1 %v5751_v55  ;;  %v3542_v55 = vld [vmem:[%s8810_s11 + $0x18] sm:$0xff] }
 0x757   :  { %v3209_v46 = vsel %vm3197_vm7, %v3191_v19, %v3203_v43  ;;  %5753 = vmatprep.subr.bf16.mxu1 %v6054_v62  ;;  %v5781_v14 = vpack.c.bf16 %v3542_v55, %v3541_v56  ;;  %v5849_v56 = vpack.c.bf16 %v5048_v31, %v5047_v16  ;;  %v5079_v16 = vld [vmem:[%s8810_s11 + $0x2c8] sm:$0xff] }
 0x758   :  { %4981 = vmatprep.mubr.msk.f32.mxu1 %vm3250_vm4, %v3209_v46 }
 0x759   :  { %3337 = vmatmul.mubr.f32.gmra.mrb[138].mxu1 %v3208_v3 }
 0x75a   :  { %5755 = vmatpush1.bf16.msra.mxu1 %v5754_v60  ;;  %v3544_v60 = vld [vmem:[%s8810_s11 + $0x28] sm:$0xff] }
 0x75b   :  { %5756 = vmatprep.subr.bf16.mxu1 %v6054_v62  ;;  %v5784_v28 = vpack.c.bf16 %v3544_v60, %v3543_v54  ;;  %v5050_v54 = vld [vmem:[%s8810_s11 + $0x208] sm:$0xff]  ;;  %v5034_v60 = vld [vmem:[%s8810_s11 + $0x1b0] sm:$0xff] }
 0x75e   :  { %5758 = vmatpush1.bf16.msra.mxu1 %v5757_v29  ;;  %v3546_v29 = vld [vmem:[%s8810_s11 + $0x38] sm:$0xff] }
 0x75f   :  { %5759 = vmatprep.subr.bf16.mxu1 %v6054_v62  ;;  %v5787_v25 = vpack.c.bf16 %v3546_v29, %v3545_v22 }
 0x762   :  { %5761 = vmatpush1.bf16.msra.mxu1 %v5760_v45  ;;  %v3548_v45 = vld [vmem:[%s8810_s11 + $0x48] sm:$0xff] }
 0x763   :  { %5762 = vmatprep.subr.bf16.mxu1 %v6054_v62  ;;  %v5790_v27 = vpack.c.bf16 %v3548_v45, %v3547_v1  ;;  %v5052_v1 = vld [vmem:[%s8810_s11 + $0x218] sm:$0xff]  ;;  %v5036_v45 = vld [vmem:[%s8810_s11 + $0x1c0] sm:$0xff] }
 0x766   :  { %5764 = vmatpush1.bf16.msra.mxu1 %v5763_v51  ;;  %v3550_v51 = vld [vmem:[%s8810_s11 + $0x58] sm:$0xff] }
 0x767   :  { %5765 = vmatprep.subr.bf16.mxu1 %v6054_v62  ;;  %v5793_v53 = vpack.c.bf16 %v3550_v51, %v3549_v40 }
 0x76a   :  { %5767 = vmatpush1.bf16.msra.mxu1 %v5766_v59  ;;  %v3552_v59 = vld [vmem:[%s8810_s11 + $0x68] sm:$0xff] }
 0x76b   :  { %5768 = vmatprep.subr.bf16.mxu1 %v6054_v62 }
 0x76e   :  { %5770 = vmatpush1.bf16.msra.mxu1 %v5769_v44  ;;  %v5025_v44 = vld [vmem:[%s8810_s11 + $0x168] sm:$0xff] }
 0x76f   :  { %5771 = vmatprep.subr.bf16.mxu1 %v6054_v62 }
 0x772   :  { %5773 = vmatpush1.bf16.msra.mxu1 %v5772_v52  ;;  %v5818_v52 = vpack.c.bf16 %v5025_v44, %v5024_v42 }
 0x773   :  { %5774 = vmatprep.subr.bf16.mxu1 %v6054_v62 }
 0x776   :  { %5776 = vmatpush1.bf16.msra.mxu1 %v5775_v49  ;;  %v5016_v49 = vld [vmem:[%s8811_s12 + $0x4] sm:$0x3] }
 0x824   :  { %v3326_v23 = vpop.f32.mrb[134].mxu1 }
 0x825   :  { %v3328_v18 = vpop.f32.mrb[135].mxu1  ;;  %v3343_v37 = vmax.f32 %v8235_v2, %v3326_v23  ;;  %v5796_v23 = vpack.c.bf16 %v3552_v59, %v3551_v61  ;;  %v5054_v61 = vld [vmem:[%s8810_s11 + $0x228] sm:$0xff]  ;;  %v5038_v59 = vld [vmem:[%s8810_s11 + $0x1d0] sm:$0xff] }
 0x826   :  { %v3344_v21 = vmax.f32 %v8233_v58, %v3328_v18  ;;  %v3553_v18 = vld [vmem:[%s8810_s11 + $0x70] sm:$0xff] }
 0x828   :  { %v3332_v26 = vpop.f32.mrb[136].mxu1 }
 0x829   :  { %v3345_v13 = vmax.f32 %v3206_v36, %v3332_v26  ;;  %v3334_v15 = vpop.f32.mrb[137].mxu1  ;;  %v3554_v26 = vld [vmem:[%s8810_s11 + $0x78] sm:$0xff] }
 0x82a   :  { %v3346_v34 = vmax.f32 %v3207_v20, %v3334_v15  ;;  %v3555_v15 = vld [vmem:[%s8810_s11 + $0x80] sm:$0xff] }
 0x82b   :  { %v5737_v48 = vpack.c.bf16 %v3345_v13, %v3343_v37 }
 0x82c   :  { %v5735_v39 = vpack.c.bf16 %v3346_v34, %v3344_v21  ;;  %v3338_v41 = vpop.f32.mrb[138].mxu1 }
 0x82d   :  { %v3340_v50 = vpop.f32.mrb[139].mxu1  ;;  %v3347_v5 = vmax.f32 %v3208_v3, %v3338_v41  ;;  %v3458_v3 = vld [vmem:[%s8811_s12] sm:$0x3] }
 0x82e   :  { %v3348_v6 = vmax.f32 %v3209_v46, %v3340_v50  ;;  %5736 = vmatprep.subr.bf16.mxu0 %v5735_v39  ;;  %v3558_v39 = vld [vmem:[%s8810_s11 + $0x98] sm:$0xff]  ;;  %v5021_v50 = vld [vmem:[%s8810_s11 + $0x148] sm:$0xff] }
 0x82f   :  { %5738 = vmatpush1.bf16.msra.mxu0 %v5737_v48  ;;  %v5020_v48 = vld [vmem:[%s8810_s11 + $0x140] sm:$0xff] }
 0x830   :  { %4982 = vmatprep.subr.msk.mxu0 %vm3362_vm9, %v3348_v6 }
 0x833   :  { %4983 = vmatpush1.msk.msra.mxu0 %vm3362_vm9, %v3347_v5 }
 0x834   :  { %4984 = vmatmul.mubr.msk.f32.vlgmr.msra.gmra.mrb[64].mxu0 %vm3352_vm10, %v3349_v38 }
 0x835   :  { %3439 = vmatprep.mubr.f32.mxu0 %v6053_v7 }
 0x838   :  { %4985 = vmatmul.mubr.msk.f32.gmra.mrb[66].mxu0 %vm3352_vm10, %v3350_v9  ;;  %v5022_v9 = vld [vmem:[%s8810_s11 + $0x150] sm:$0xff] }
 0x839   :  { %3445 = vmatprep.mubr.f32.mxu0 %v6053_v7 }
 0x83c   :  { %4986 = vmatmul.mubr.msk.f32.gmra.mrb[68].mxu0 %vm3352_vm10, %v3351_v4  ;;  %v5023_v4 = vld [vmem:[%s8810_s11 + $0x158] sm:$0xff] }
 0x83d   :  { %3532 = vmatprep.mubr.f32.mxu0 %v6053_v7  ;;  %v5815_v11 = vpack.c.bf16 %v5023_v4, %v5022_v9  ;;  %v5064_v9 = vld [vmem:[%s8810_s11 + $0x278] sm:$0xff] }
 0x907   :  { %v3435_v8 = vpop.f32.mrb[64].mxu0 }
 0x908   :  { %v3437_v58 = vpop.f32.mrb[65].mxu0  ;;  %v3452_v33 = vmax.f32 %v3343_v37, %v3435_v8  ;;  %v3557_v37 = vld [vmem:[%s8810_s11 + $0x90] sm:$0xff]  ;;  %v5821_v8 = vpack.c.bf16 %v5027_v63, %v5026_v10  ;;  %v5070_v63 = vld [vmem:[%s8810_s11 + $0x280] sm:$0xff] }
 0x909   :  { %v3453_v12 = vmax.f32 %v3344_v21, %v3437_v58  ;;  %v3556_v21 = vld [vmem:[%s8810_s11 + $0x88] sm:$0xff]  ;;  %v5805_v41 = vpack.c.bf16 %v3558_v39, %v3557_v37  ;;  %v5028_v58 = vld [vmem:[%s8810_s11 + $0x180] sm:$0xff] }
 0x90a   :  { %v5058_v37 = vld [vmem:[%s8810_s11 + $0x248] sm:$0xff] }
 0x90b   :  { %v3441_v2 = vpop.f32.mrb[66].mxu0 }
 0x90c   :  { %v3454_v32 = vmax.f32 %v3345_v13, %v3441_v2  ;;  %v3443_v35 = vpop.f32.mrb[67].mxu0  ;;  %v5799_v13 = vpack.c.bf16 %v3554_v26, %v3553_v18  ;;  %v5029_v2 = vld [vmem:[%s8810_s11 + $0x188] sm:$0xff] }
 0x90d   :  { %v3455_v17 = vmax.f32 %v3346_v34, %v3443_v35  ;;  %v5802_v34 = vpack.c.bf16 %v3556_v21, %v3555_v15  ;;  %v5046_v35 = vld [vmem:[%s8810_s11 + $0x1e8] sm:$0xff]  ;;  %v5056_v15 = vld [vmem:[%s8810_s11 + $0x238] sm:$0xff] }
 0x90e   :  { %v8331_v19 = vpack.c.bf16 %v3454_v32, %v3452_v33  ;;  %v5824_v33 = vpack.c.bf16 %v5029_v2, %v5028_v58  ;;  %v5045_v32 = vld [vmem:[%s8810_s11 + $0x1e0] sm:$0xff]  ;;  %v5066_v58 = vld [vmem:[%s8811_s12 + $0x8] sm:$0x3] }
 0x90f   :  { %v8333_v20 = vpack.c.bf16 %v3455_v17, %v3453_v12  ;;  %v3447_v30 = vpop.f32.mrb[68].mxu0  ;;  %v5030_v12 = vld [vmem:[%s8810_s11 + $0x190] sm:$0xff]  ;;  %v5031_v17 = vld [vmem:[%s8810_s11 + $0x198] sm:$0xff] }
 0x910   :  { %v3449_v36 = vpop.f32.mrb[69].mxu0  ;;  %v8342_v46 = vmax.f32 %v3347_v5, %v3447_v30  ;;  %v5812_v5 = vpack.c.bf16 %v5021_v50, %v5020_v48  ;;  %v5041_v30 = vld [vmem:[%s8811_s12 + $0x6] sm:$0x3]  ;;  %v5060_v48 = vld [vmem:[%s8810_s11 + $0x258] sm:$0xff] }
 0x911   :  { %v8335_v43 = vmax.f32 %v3348_v6, %v3449_v36  ;;  %5740 = vmatprep.subr.bf16.mxu0 %v8333_v20  ;;  %5808 = vmatprep.subr.bf16.mxu1 %v8333_v20  ;;  %v5846_v36 = vpack.c.bf16 %v5046_v35, %v5045_v32  ;;  %v5075_v35 = vld [vmem:[%s8810_s11 + $0x2a8] sm:$0xff] }
 0x912   :  { %5742 = vmatpush1.bf16.msra.mxu0 %v8331_v19 }
 0x913   :  { %4987 = vmatprep.subr.msk.mxu0 %vm3362_vm9, %v8335_v43 }
 0x916   :  { %4988 = vmatpush1.msk.msra.mxu0 %vm3362_vm9, %v8342_v46 }
 0x917   :  { %4989 = vmatmul.mubr.msk.f32.vlgmr.msra.gmra.mrb[70].mxu0 %vm3352_vm10, %v3458_v3  ;;  %5744 = vmatprep.subr.bf16.mxu0 %v8333_v20  ;;  %v5827_v3 = vpack.c.bf16 %v5031_v17, %v5030_v12  ;;  %v5076_v17 = vld [vmem:[%s8810_s11 + $0x2b0] sm:$0xff] }
 0x918   :  { %5746 = vmatpush1.bf16.msra.mxu0 %v8331_v19  ;;  %3628 = vmatprep.mubr.f32.mxu0 %v6053_v7 }
 0x919   :  { %4991 = vmatprep.subr.msk.mxu0 %vm3362_vm9, %v8335_v43 }
 0x91c   :  { %4992 = vmatpush1.msk.msra.mxu0 %vm3362_vm9, %v8342_v46 }
 0x91d   :  { %4993 = vmatmul.mubr.msk.f32.vlgmr.msra.gmra.mrb[72].mxu0 %vm3352_vm10, %v4990_v0  ;;  %5777 = vmatprep.subr.bf16.mxu0 %v6054_v62  ;;  %v5032_v0 = vld [vmem:[%s8810_s11 + $0x1a0] sm:$0xff] }
 0x91e   :  { %5779 = vmatpush1.bf16.msra.mxu0 %v5778_v24  ;;  %v5033_v24 = vld [vmem:[%s8810_s11 + $0x1a8] sm:$0xff] }
 0x91f   :  { %5780 = vmatprep.subr.bf16.mxu0 %v6054_v62  ;;  %v5830_v55 = vpack.c.bf16 %v5033_v24, %v5032_v0  ;;  %v5080_v0 = vld [vmem:[%s8810_s11 + $0x2d0] sm:$0xff]  ;;  %v5081_v24 = vld [vmem:[%s8810_s11 + $0x2d8] sm:$0xff] }
 0x922   :  { %5782 = vmatpush1.bf16.msra.mxu0 %v5781_v14  ;;  %v5049_v14 = vld [vmem:[%s8810_s11 + $0x200] sm:$0xff] }
 0x923   :  { %5783 = vmatprep.subr.bf16.mxu0 %v6054_v62  ;;  %v5852_v22 = vpack.c.bf16 %v5050_v54, %v5049_v14  ;;  %v5083_v14 = vld [vmem:[%s8810_s11 + $0x2e8] sm:$0xff] }
 0x926   :  { %5785 = vmatpush1.bf16.msra.mxu0 %v5784_v28  ;;  %v5035_v28 = vld [vmem:[%s8810_s11 + $0x1b8] sm:$0xff] }
 0x927   :  { %5786 = vmatprep.subr.bf16.mxu0 %v6054_v62  ;;  %v5833_v29 = vpack.c.bf16 %v5035_v28, %v5034_v60  ;;  %v5084_v60 = vld [vmem:[%s8810_s11 + $0x2f0] sm:$0xff]  ;;  %v5085_v28 = vld [vmem:[%s8810_s11 + $0x2f8] sm:$0xff] }
 0x92a   :  { %5788 = vmatpush1.bf16.msra.mxu0 %v5787_v25  ;;  %v5051_v25 = vld [vmem:[%s8810_s11 + $0x210] sm:$0xff] }
 0x92b   :  { %5789 = vmatprep.subr.bf16.mxu0 %v6054_v62  ;;  %v5855_v40 = vpack.c.bf16 %v5052_v1, %v5051_v25  ;;  %v5087_v25 = vld [vmem:[%s8810_s11 + $0x308] sm:$0xff] }
 0x92e   :  { %5791 = vmatpush1.bf16.msra.mxu0 %v5790_v27  ;;  %v5037_v27 = vld [vmem:[%s8810_s11 + $0x1c8] sm:$0xff] }
 0x92f   :  { %5792 = vmatprep.subr.bf16.mxu0 %v6054_v62  ;;  %v5836_v51 = vpack.c.bf16 %v5037_v27, %v5036_v45  ;;  %v5088_v45 = vld [vmem:[%s8810_s11 + $0x310] sm:$0xff]  ;;  %v5089_v27 = vld [vmem:[%s8810_s11 + $0x318] sm:$0xff] }
 0x932   :  { %5794 = vmatpush1.bf16.msra.mxu0 %v5793_v53  ;;  %v5053_v53 = vld [vmem:[%s8810_s11 + $0x220] sm:$0xff] }
 0x933   :  { %5795 = vmatprep.subr.bf16.mxu0 %v6054_v62  ;;  %v5858_v18 = vpack.c.bf16 %v5054_v61, %v5053_v53  ;;  %v4327_v53 = vld [vmem:[%s8813_s14 + $0x8] sm:$0xff]  ;;  %v4328_v61 = vld [vmem:[%s8813_s14 + $0x10] sm:$0xff] }
 0x936   :  { %5797 = vmatpush1.bf16.msra.mxu0 %v5796_v23  ;;  %v5039_v23 = vld [vmem:[%s8810_s11 + $0x1d8] sm:$0xff] }
 0x937   :  { %5798 = vmatprep.subr.bf16.mxu0 %v6054_v62  ;;  %v5839_v26 = vpack.c.bf16 %v5039_v23, %v5038_v59  ;;  %v4329_v23 = vld [vmem:[%s8813_s14 + $0x18] sm:$0xff] }
 0x93a   :  { %5800 = vmatpush1.bf16.msra.mxu0 %v5799_v13  ;;  %v5055_v13 = vld [vmem:[%s8810_s11 + $0x230] sm:$0xff] }
 0x93b   :  { %5801 = vmatprep.subr.bf16.mxu0 %v6054_v62  ;;  %v5861_v21 = vpack.c.bf16 %v5056_v15, %v5055_v13  ;;  %v4331_v13 = vld [vmem:[%s8813_s14 + $0x28] sm:$0xff] }
 0x93e   :  { %5803 = vmatpush1.bf16.msra.mxu0 %v5802_v34  ;;  %v5057_v34 = vld [vmem:[%s8810_s11 + $0x240] sm:$0xff] }
 0x93f   :  { %5804 = vmatprep.subr.bf16.mxu0 %v6054_v62  ;;  %v5864_v39 = vpack.c.bf16 %v5058_v37, %v5057_v34  ;;  %v4333_v34 = vld [vmem:[%s8813_s14 + $0x38] sm:$0xff] }
 0x942   :  { %5806 = vmatpush1.bf16.msra.mxu0 %v5805_v41  ;;  %v5059_v41 = vld [vmem:[%s8810_s11 + $0x250] sm:$0xff] }
 0x943   :  { %5811 = vmatprep.subr.bf16.mxu0 %v6054_v62  ;;  %v5867_v50 = vpack.c.bf16 %v5060_v48, %v5059_v41  ;;  %v4335_v41 = vld [vmem:[%s8813_s14 + $0x48] sm:$0xff] }
 0x9ea   :  { %v3534_v6 = vpop.f32.mrb[70].mxu0 }
 0x9eb   :  { %v3536_v38 = vpop.f32.mrb[71].mxu0 }
 0x9ec   :  { %5015 = vmatprep.mubr.msk.f32.mxu0 %vm3250_vm4, %v3536_v38  ;;  %v5063_v38 = vld [vmem:[%s8810_s11 + $0x270] sm:$0xff] }
 0x9ed   :  { %3797 = vmatmul.mubr.f32.vlgmr.msra.gmra.mrb[74].mxu0 %v3534_v6  ;;  %v5062_v6 = vld [vmem:[%s8810_s11 + $0x268] sm:$0xff]  ;;  %v5873_v4 = vpack.c.bf16 %v5064_v9, %v5063_v38 }
 0x9ee   :  { %5813 = vmatpush1.bf16.msra.mxu0 %v5812_v5 }
 0x9ef   :  { %5814 = vmatprep.subr.bf16.mxu0 %v6054_v62 }
 0x9f0   :  { %v3630_v47 = vpop.f32.mrb[72].mxu0 }
 0x9f1   :  { %v3632_v57 = vpop.f32.mrb[73].mxu0 }
 0x9f2   :  { %5816 = vmatpush1.bf16.msra.mxu0 %v5815_v11  ;;  %5014 = vmatprep.mubr.msk.f32.mxu1 %vm3250_vm4, %v3632_v57 }
 0x9f3   :  { %3724 = vmatmul.mubr.f32.vlgmr.msra.gmra.mrb[140].mxu1 %v3630_v47  ;;  %5817 = vmatprep.subr.bf16.mxu0 %v6054_v62 }
 0x9f4   :  { %5810 = vmatpush1.bf16.msra.mxu1 %v8331_v19  ;;  %3871 = vmatprep.mubr.f32.mxu1 %v6053_v7 }
 0x9f5   :  { %5017 = vmatprep.subr.msk.mxu1 %vm3362_vm9, %v8335_v43 }
 0x9f6   :  { %5819 = vmatpush1.bf16.msra.mxu0 %v5818_v52 }
 0x9f7   :  { %5820 = vmatprep.subr.bf16.mxu0 %v6054_v62 }
 0x9f8   :  { %5018 = vmatpush1.msk.msra.mxu1 %vm3362_vm9, %v8342_v46 }
 0x9f9   :  { %5019 = vmatmul.mubr.msk.f32.vlgmr.msra.gmra.mrb[142].mxu1 %vm3352_vm10, %v5016_v49  ;;  %5842 = vmatprep.subr.bf16.mxu1 %v8333_v20  ;;  %v5071_v49 = vld [vmem:[%s8810_s11 + $0x288] sm:$0xff] }
 0x9fa   :  { %5822 = vmatpush1.bf16.msra.mxu0 %v5821_v8  ;;  %5844 = vmatpush1.bf16.msra.mxu1 %v8331_v19 }
 0x9fb   :  { %5042 = vmatprep.subr.msk.mxu1 %vm3362_vm9, %v8335_v43  ;;  %5823 = vmatprep.subr.bf16.mxu0 %v6054_v62 }
 0x9fc   :  { %4042 = vmatprep.mubr.f32.mxu1 %v6053_v7 }
 0x9fe   :  { %5825 = vmatpush1.bf16.msra.mxu0 %v5824_v33  ;;  %5043 = vmatpush1.msk.msra.mxu1 %vm3362_vm9, %v8342_v46  ;;  %v5072_v33 = vld [vmem:[%s8810_s11 + $0x290] sm:$0xff] }
 0x9ff   :  { %5044 = vmatmul.mubr.msk.f32.vlgmr.msra.gmra.mrb[144].mxu1 %vm3352_vm10, %v5041_v30  ;;  %5826 = vmatprep.subr.bf16.mxu0 %v6054_v62  ;;  %v5077_v30 = vld [vmem:[%s8810_s11 + $0x2b8] sm:$0xff] }
 0xa00   :  { %5845 = vmatprep.subr.bf16.mxu1 %v6054_v62 }
 0xa01   :  { %5847 = vmatpush1.bf16.msra.mxu1 %v5846_v36  ;;  %v5889_v36 = vpack.c.bf16 %v5077_v30, %v5076_v17 }
 0xa02   :  { %5828 = vmatpush1.bf16.msra.mxu0 %v5827_v3  ;;  %5848 = vmatprep.subr.bf16.mxu1 %v6054_v62  ;;  %v5078_v3 = vld [vmem:[%s8810_s11 + $0x2c0] sm:$0xff] }
 0xa03   :  { %5829 = vmatprep.subr.bf16.mxu0 %v6054_v62  ;;  %v5892_v31 = vpack.c.bf16 %v5079_v16, %v5078_v3  ;;  %v4430_v3 = vld [vmem:[%s8815_s16 + $0x28] sm:$0xff] }
 0xa05   :  { %5850 = vmatpush1.bf16.msra.mxu1 %v5849_v56  ;;  %v5895_v56 = vpack.c.bf16 %v5081_v24, %v5080_v0  ;;  %v4432_v0 = vld [vmem:[%s8815_s16 + $0x38] sm:$0xff] }
 0xa06   :  { %5831 = vmatpush1.bf16.msra.mxu0 %v5830_v55  ;;  %5851 = vmatprep.subr.bf16.mxu1 %v6054_v62  ;;  %v5082_v55 = vld [vmem:[%s8810_s11 + $0x2e0] sm:$0xff] }
 0xa07   :  { %5832 = vmatprep.subr.bf16.mxu0 %v6054_v62  ;;  %v5898_v54 = vpack.c.bf16 %v5083_v14, %v5082_v55  ;;  %v4434_v55 = vld [vmem:[%s8815_s16 + $0x48] sm:$0xff] }
 0xa09   :  { %5853 = vmatpush1.bf16.msra.mxu1 %v5852_v22  ;;  %v5901_v22 = vpack.c.bf16 %v5085_v28, %v5084_v60 }
 0xa0a   :  { %5834 = vmatpush1.bf16.msra.mxu0 %v5833_v29  ;;  %5854 = vmatprep.subr.bf16.mxu1 %v6054_v62  ;;  %v5086_v29 = vld [vmem:[%s8810_s11 + $0x300] sm:$0xff] }
 0xa0b   :  { %5835 = vmatprep.subr.bf16.mxu0 %v6054_v62  ;;  %v5904_v1 = vpack.c.bf16 %v5087_v25, %v5086_v29 }
 0xa0d   :  { %5856 = vmatpush1.bf16.msra.mxu1 %v5855_v40  ;;  %v5907_v40 = vpack.c.bf16 %v5089_v27, %v5088_v45 }
 0xa0e   :  { %5837 = vmatpush1.bf16.msra.mxu0 %v5836_v51  ;;  %5857 = vmatprep.subr.bf16.mxu1 %v6054_v62  ;;  %v4326_v51 = vld [vmem:[%s8813_s14] sm:$0xff] }
 0xa0f   :  { %5838 = vmatprep.subr.bf16.mxu0 %v6054_v62  ;;  %v5910_v59 = vpack.c.bf16 %v4327_v53, %v4326_v51 }
 0xa11   :  { %5859 = vmatpush1.bf16.msra.mxu1 %v5858_v18  ;;  %v5913_v18 = vpack.c.bf16 %v4329_v23, %v4328_v61 }
 0xa12   :  { %5840 = vmatpush1.bf16.msra.mxu0 %v5839_v26  ;;  %5860 = vmatprep.subr.bf16.mxu1 %v6054_v62  ;;  %v4330_v26 = vld [vmem:[%s8813_s14 + $0x20] sm:$0xff] }
 0xa13   :  { %5876 = vmatprep.subr.bf16.mxu0 %v8333_v20  ;;  %v5061_v20 = vld [vmem:[%s8810_s11 + $0x260] sm:$0xff]  ;;  %v5916_v15 = vpack.c.bf16 %v4331_v13, %v4330_v26 }
 0xa14   :  { %v5870_v5 = vpack.c.bf16 %v5062_v6, %v5061_v20  ;;  %v4337_v20 = vld [vmem:[%s8813_s14 + $0x58] sm:$0xff] }
 0xa15   :  { %5862 = vmatpush1.bf16.msra.mxu1 %v5861_v21  ;;  %v4332_v21 = vld [vmem:[%s8813_s14 + $0x30] sm:$0xff] }
 0xa16   :  { %5863 = vmatprep.subr.bf16.mxu1 %v6054_v62  ;;  %v5919_v37 = vpack.c.bf16 %v4333_v34, %v4332_v21 }
 0xa19   :  { %5865 = vmatpush1.bf16.msra.mxu1 %v5864_v39  ;;  %v4334_v39 = vld [vmem:[%s8813_s14 + $0x40] sm:$0xff] }
 0xa1a   :  { %5866 = vmatprep.subr.bf16.mxu1 %v6054_v62  ;;  %v5922_v48 = vpack.c.bf16 %v4335_v41, %v4334_v39 }
 0xa1d   :  { %5868 = vmatpush1.bf16.msra.mxu1 %v5867_v50  ;;  %v4336_v50 = vld [vmem:[%s8813_s14 + $0x50] sm:$0xff] }
 0xa1e   :  { %5869 = vmatprep.subr.bf16.mxu1 %v6054_v62  ;;  %v5925_v6 = vpack.c.bf16 %v4337_v20, %v4336_v50 }
 0xa21   :  { %5871 = vmatpush1.bf16.msra.mxu1 %v5870_v5 }
 0xa22   :  { %5872 = vmatprep.subr.bf16.mxu1 %v6054_v62 }
 0xa25   :  { %5874 = vmatpush1.bf16.msra.mxu1 %v5873_v4 }
 0xa26   :  { %5909 = vmatprep.subr.bf16.mxu1 %v6054_v62 }
 0xac0   :  { %v3798_v11 = vpop.f32.mrb[74].mxu0 }
 0xac1   :  { %v3800_v42 = vpop.f32.mrb[75].mxu0 }
 0xac6   :  { %v3725_v44 = vpop.f32.mrb[140].mxu1 }
 0xac7   :  { %v8596_v47 = vadd.f32 %v3798_v11, %v3725_v44  ;;  %v3727_v57 = vpop.f32.mrb[141].mxu1 }
 0xacc   :  { %v3873_v52 = vpop.f32.mrb[142].mxu1 }
 0xacd   :  { %v3875_v10 = vpop.f32.mrb[143].mxu1 }
 0xace   :  { %5040 = vmatprep.mubr.msk.f32.mxu0 %vm3250_vm4, %v3875_v10  ;;  %v4339_v10 = vld [vmem:[%s8813_s14 + $0x68] sm:$0xff] }
 0xacf   :  { %3967 = vmatmul.mubr.f32.vlgmr.msra.gmra.mrb[76].mxu0 %v3873_v52  ;;  %v4338_v52 = vld [vmem:[%s8813_s14 + $0x60] sm:$0xff] }
 0xad0   :  { %5878 = vmatpush1.bf16.msra.mxu0 %v8331_v19  ;;  %4213 = vmatprep.mubr.f32.mxu0 %v6053_v7  ;;  %v5880_v19 = vpack.c.bf16 %v5071_v49, %v5070_v63  ;;  %v5928_v63 = vpack.c.bf16 %v4339_v10, %v4338_v52 }
 0xad1   :  { %5067 = vmatprep.subr.msk.mxu0 %vm3362_vm9, %v8335_v43  ;;  %v5073_v43 = vld [vmem:[%s8810_s11 + $0x298] sm:$0xff] }
 0xad2   :  { %v4044_v8 = vpop.f32.mrb[144].mxu1  ;;  %v5883_v32 = vpack.c.bf16 %v5073_v43, %v5072_v33  ;;  %v4426_v33 = vld [vmem:[%s8815_s16 + $0x8] sm:$0xff] }
 0xad3   :  { %v4046_v2 = vpop.f32.mrb[145].mxu1 }
 0xad4   :  { %5068 = vmatpush1.msk.msra.mxu0 %vm3362_vm9, %v8342_v46  ;;  %5065 = vmatprep.mubr.msk.f32.mxu1 %vm3250_vm4, %v4046_v2  ;;  %v5074_v46 = vld [vmem:[%s8810_s11 + $0x2a0] sm:$0xff] }
 0xad5   :  { %5069 = vmatmul.mubr.msk.f32.vlgmr.msra.gmra.mrb[78].mxu0 %vm3352_vm10, %v5066_v58  ;;  %4138 = vmatmul.mubr.f32.vlgmr.msra.gmra.mrb[146].mxu1 %v4044_v8  ;;  %v5886_v12 = vpack.c.bf16 %v5075_v35, %v5074_v46  ;;  %v5091_v8 = vld [vmem:[%s8812_s13] ss:$0 sm:$0xff]  ;;  %v4427_v35 = vld [vmem:[%s8815_s16 + $0x10] sm:$0xff] }
 0xad6   :  { %5879 = vmatprep.subr.bf16.mxu0 %v6054_v62  ;;  %5911 = vmatpush3.bf16.msra.mxu1 %v5910_v59 }
 0xad7   :  { %5881 = vmatpush1.bf16.msra.mxu0 %v5880_v19  ;;  %5912 = vmatprep.subr.bf16.mxu1 %v6054_v62  ;;  %v4425_v19 = vld [vmem:[%s8815_s16] sm:$0xff] }
 0xad8   :  { %5882 = vmatprep.subr.bf16.mxu0 %v6054_v62  ;;  %5155 = vmatprep.mubr.msk.f32.mxu1 %vm6055_vm11, %v6053_v7  ;;  %v5931_v46 = vpack.c.bf16 %v4426_v33, %v4425_v19 }
 0xada   :  { %5914 = vmatpush3.bf16.msra.mxu1 %v5913_v18 }
 0xadb   :  { %5884 = vmatpush1.bf16.msra.mxu0 %v5883_v32  ;;  %5915 = vmatprep.subr.bf16.mxu1 %v6054_v62 }
 0xadc   :  { %5885 = vmatprep.subr.bf16.mxu0 %v6054_v62 }
 0xade   :  { %5917 = vmatpush3.bf16.msra.mxu1 %v5916_v15 }
 0xadf   :  { %5887 = vmatpush1.bf16.msra.mxu0 %v5886_v12  ;;  %5918 = vmatprep.subr.bf16.mxu1 %v6054_v62  ;;  %v4428_v12 = vld [vmem:[%s8815_s16 + $0x18] sm:$0xff] }
 0xae0   :  { %5888 = vmatprep.subr.bf16.mxu0 %v6054_v62  ;;  %v5934_v30 = vpack.c.bf16 %v4428_v12, %v4427_v35 }
 0xae2   :  { %5920 = vmatpush3.bf16.msra.mxu1 %v5919_v37 }
 0xae3   :  { %5890 = vmatpush1.bf16.msra.mxu0 %v5889_v36  ;;  %5921 = vmatprep.subr.bf16.mxu1 %v6054_v62  ;;  %v4429_v36 = vld [vmem:[%s8815_s16 + $0x20] sm:$0xff] }
 0xae4   :  { %5891 = vmatprep.subr.bf16.mxu0 %v6054_v62  ;;  %v5937_v16 = vpack.c.bf16 %v4430_v3, %v4429_v36 }
 0xae6   :  { %5923 = vmatpush3.bf16.msra.mxu1 %v5922_v48 }
 0xae7   :  { %5893 = vmatpush1.bf16.msra.mxu0 %v5892_v31  ;;  %5924 = vmatprep.subr.bf16.mxu1 %v6054_v62  ;;  %v4431_v31 = vld [vmem:[%s8815_s16 + $0x30] sm:$0xff] }
 0xae8   :  { %5894 = vmatprep.subr.bf16.mxu0 %v6054_v62  ;;  %v5940_v24 = vpack.c.bf16 %v4432_v0, %v4431_v31 }
 0xaea   :  { %5926 = vmatpush3.bf16.msra.mxu1 %v5925_v6 }
 0xaeb   :  { %5896 = vmatpush1.bf16.msra.mxu0 %v5895_v56  ;;  %5927 = vmatprep.subr.bf16.mxu1 %v6054_v62  ;;  %v4433_v56 = vld [vmem:[%s8815_s16 + $0x40] sm:$0xff] }
 0xaec   :  { %5897 = vmatprep.subr.bf16.mxu0 %v6054_v62  ;;  %v5943_v14 = vpack.c.bf16 %v4434_v55, %v4433_v56 }
 0xaee   :  { %5929 = vmatpush3.bf16.msra.mxu1 %v5928_v63 }
 0xaef   :  { %5899 = vmatpush1.bf16.msra.mxu0 %v5898_v54  ;;  %5153 = vmatprep.subr.mxu1 %v6053_v7  ;;  %v4435_v54 = vld [vmem:[%s8815_s16 + $0x50] sm:$0xf]  ;;  %s4528_s16 = sshll.u32 %s6056_s4, 4  ;;  %s4529_s16 = int_to_ptr.vmem [resolvable:$true] %s4528_s16 }
 0xaf0   :  { %5900 = vmatprep.subr.bf16.mxu0 %v6054_v62  ;;  %p6034_p1 = scmp.lt.s32.totalorder %s4529_s16, %s4529_s16 }
 0xaf3   :  { %5902 = vmatpush1.bf16.msra.mxu0 %v5901_v22 }
 0xaf4   :  { %5903 = vmatprep.subr.bf16.mxu0 %v6054_v62 }
 0xaf7   :  { %5905 = vmatpush1.bf16.msra.mxu0 %v5904_v1 }
 0xaf8   :  { %5906 = vmatprep.subr.bf16.mxu0 %v6054_v62 }
 0xafb   :  { %5908 = vmatpush1.bf16.msra.mxu0 %v5907_v40 }
 0xba2   :  { %v3968_v5 = vpop.f32.mrb[76].mxu0 }
 0xba3   :  { %v3972_v38 = vadd.f32 %v3968_v5, %v8596_v47  ;;  %v3970_v9 = vpop.f32.mrb[77].mxu0  ;;  %v4340_v47 = vld [vmem:[%s8813_s14 + $0x70] sm:$0xff] }
 0xba4   :  { %5154 = vmatpush3.msra.mxu1 %v4340_v47 }
 0xba5   :  { %5930 = vmatprep.subr.bf16.mxu1 %v6054_v62 }
 0xba8   :  { %v4215_v4 = vpop.f32.mrb[78].mxu0  ;;  %v4139_v11 = vpop.f32.mrb[146].mxu1 }
 0xba9   :  { %v4143_v42 = vadd.f32 %v4139_v11, %v3972_v38  ;;  %v4217_v44 = vpop.f32.mrb[79].mxu0  ;;  %v4141_v57 = vpop.f32.mrb[147].mxu1 }
 0xbaa   :  { %5090 = vmatprep.mubr.msk.f32.mxu0 %vm3250_vm4, %v4217_v44 }
 0xbab   :  { %4309 = vmatmul.mubr.f32.vlgmr.msra.gmra.mrb[80].mxu0 %v4215_v4 }
 0xc7e   :  { %v4310_v49 = vpop.f32.mrb[80].mxu0 }
 0xc7f   :  { %v4314_v58 = vadd.f32 %v4310_v49, %v4143_v42  ;;  %v4312_v2 = vpop.f32.mrb[81].mxu0 }
 0xc81   :  { %v4322_v43 = vadd.f32 %v5091_v8, %v4314_v58 }
 0xc83   :  { %vm4323_vm12 = vcmp.gt.f32.partialorder %v4322_v43, 0.0  ;;  %v4324_v32 = vmul.f32 0.01, %v4322_v43 }
 0xc85   :  { %v4325_v17 = vsel %vm4323_vm12, %v4322_v43, %v4324_v32 }
 0xc86   :  { %5156 = vmatmul.mubr.msk.f32.vlgmr.msra.gmra.mrb[148].mxu1 %vm4348_vm13, %v4325_v17 }
 0xc87   :  { %5932 = vmatpush3.bf16.msra.mxu1 %v5931_v46  ;;  %5180 = vmatprep.mubr.msk.f32.mxu1 %vm6055_vm11, %v6053_v7 }
 0xc88   :  { %5933 = vmatprep.subr.bf16.mxu1 %v6054_v62 }
 0xc8b   :  { %5935 = vmatpush3.bf16.msra.mxu1 %v5934_v30 }
 0xc8c   :  { %5936 = vmatprep.subr.bf16.mxu1 %v6054_v62 }
 0xc8f   :  { %5938 = vmatpush3.bf16.msra.mxu1 %v5937_v16 }
 0xc90   :  { %5939 = vmatprep.subr.bf16.mxu1 %v6054_v62 }
 0xc93   :  { %5941 = vmatpush3.bf16.msra.mxu1 %v5940_v24 }
 0xc94   :  { %5942 = vmatprep.subr.bf16.mxu1 %v6054_v62  ;;  %v5092_v62 = vld [vmem:[%s8814_s15] ss:$0 sm:$0xff]  ;;  %s6029_s15 = scalar_lea.vmem %s4529_s16, 32 }
 0xc95   :  { %p6030_p0 = scmp.ne.s32.totalorder %s4529_s16, %s6029_s15  ;;  %p6035_p2 = scmp.lt.s32.totalorder %s6029_s15, %s6029_s15 }
 0xc97   :  { %5944 = vmatpush3.bf16.msra.mxu1 %v5943_v14  ;;  %p6036_p3 = por %p6035_p2, %p6034_p1 }
 0xc98   :  { %5178 = vmatprep.subr.mxu1 %v6053_v7  ;;  %v5094_v7 = vld [vmem:[%s8816_s17] ss:$0 sm:$0xff] }
 0xc99   :  { %p6037_p4 = pnand %p6036_p3, %p6030_p0 }
 0xc9b   :  { %5179 = vmatpush3.msk.msra.mxu1 %vm3362_vm9, %v4435_v54 }
 0xd59   :  { %v4418_v60 = vpop.f32.mrb[148].mxu1 }
 0xd5a   :  { %v4419_v28 = vadd.f32 %v5092_v62, %v4418_v60  ;;  %v5157_v22 = vpop.f32.mrb[149].mxu1 }
 0xd5c   :  { %vm4422_vm14 = vcmp.gt.f32.partialorder %v4419_v28, 0.0  ;;  %v4423_v29 = vmul.f32 0.01, %v4419_v28 }
 0xd5e   :  { %v4424_v25 = vsel %vm4422_vm14, %v4419_v28, %v4423_v29 }
 0xd5f   :  { %5181 = vmatmul.mubr.msk.f32.vlgmr.msra.gmra.mrb[150].mxu1 %vm4443_vm15, %v4424_v25 }
 0xe32   :  { %v4516_v1 = vpop.f32.mrb[150].mxu1 }
 0xe33   :  { %v4517_v45 = vadd.f32 %v5094_v7, %v4516_v1  ;;  %v5182_v27 = vpop.f32.mrb[151].mxu1 }
 0xe35   :  { %4521 = vst.msk [vmem:[#allocation2] sm:$0x3] %vm4520_vm0, %v4517_v45 }
 0xe36   :  { %6040 = shalt.err (!%p6037_p4)
}
 0xe37   :  { %s6041_s23 = scalar_lea.hbm %s8817_s18, 32 }
 0xe38   :  { %p6042_p5 = scmp.ne.s32.totalorder %s8817_s18, %s6041_s23  ;;  %p6045_p6 = scmp.lt.u32.totalorder %s6041_s23, %s8817_s18 }
 0xe3a   :  { %p6047_p7 = pnand %p6045_p6, %p6042_p5 }
 0xe3c   :  { %6050 = shalt.err (!%p6047_p7)
}
 0xe3d   :  { %4531 = dma.vmem_to_hbm [thread:$0]  %s4529_s16, 32, %s8817_s18, [#allocation3]  }
 0xe3e   :  { %6051 = dma.done.wait [#allocation3], 32  }
 0xe3f   :  { %6052 = vsyncadd [#allocation3], 4294967264 }
 0xe40   :  { %4535 = vsyncpa [#allocation3], 1 }

</bundles_post_ra>
